<compile_context>
chip_gen: v7x
topology: tpu7x:2x2x1
jax: 0.10.0
libtpu: 0.0.40
codegen_flags: <defaults>
</compile_context>

<pallas_src>
import jax
import jax.numpy as jnp
from jax import lax
from jax.experimental import pallas as pl
from jax.experimental.pallas import tpu as pltpu

# ----- model hyper-parameters (defaults of the PyTorch module) -----
T_IN = 3                       # t_input_dim
T_EMB = 8                      # t_emb_dim (even -> PeriodicEmbedding has linear_layer2)
T_HALF = (T_EMB - 1) // 2      # 3
COORD_HID = 32                 # coord_hidden_dim
COORD_EMB = 8                  # coord_embed_dim
GRID_SIZE = 10
GRID_EMB = 8                   # grid_embed_dim
P_EMB = 5                      # periodic_embed_dim (odd -> no linear_layer2)
P_HALF = (P_EMB - 1) // 2      # 2
OTHER = 5                      # other feature dim
D_IN = T_IN + 4 + OTHER        # input_dim = 12
E_DIM = T_IN * T_EMB + (2 * COORD_EMB + 2 * GRID_EMB + 2 * P_EMB + 4) + OTHER   # 75
HIDDEN = 32                    # hidden_dim
OUT_DIM = 1                    # output_dim
N_MODELS = 10
O_DIM = OUT_DIM * N_MODELS     # 10

# row offsets of each feature group inside the (conceptual) 75-wide combined embedding
TEMP_END = T_IN * T_EMB                     # 24
CE1_OFF = TEMP_END                          # 24..32
CE2_OFF = CE1_OFF + COORD_EMB               # 32..40
GRID_OFF = CE2_OFF + COORD_EMB              # 40..56
P1_OFF = GRID_OFF + 2 * GRID_EMB            # 56..61
P2_OFF = P1_OFF + P_EMB                     # 61..66
REL_OFF = P2_OFF + P_EMB                    # 66..68
DST_OFF = REL_OFF + 2                       # 68..69
ANG_OFF = DST_OFF + 1                       # 69..70
OTH_OFF = ANG_OFF + 1                       # 70..75

_PI = 3.141592653589793
_PI_2 = 1.5707963267948966
_PI_4 = 0.7853981633974483


def _sign(v):
    # explicit sign() from compare+select (always lowers on Mosaic)
    return jnp.where(v > 0.0, 1.0, jnp.where(v < 0.0, -1.0, 0.0))


def _atan_01(t):
    # arctan on [0, 1], Cephes single-precision style (abs err ~1e-7); mul/add/div/select only.
    red = t > 0.4142135623730951                      # tan(pi/8)
    w = jnp.where(red, (t - 1.0) / (t + 1.0), t)      # |w| <= tan(pi/8)
    z = w * w
    p = (((8.05374449538e-2 * z - 1.38776856032e-1) * z
          + 1.99777106478e-1) * z - 3.33329491539e-1) * z * w + w
    return jnp.where(red, p + _PI_4, p)


def _atan2(y, x):
    # quadrant-corrected arctangent; atan2(0, 0) == 0 like torch.atan2.
    ax, ay = jnp.abs(x), jnp.abs(y)
    den = jnp.maximum(ax, ay)
    t = jnp.minimum(ax, ay) / jnp.where(den == 0.0, 1.0, den)
    a = _atan_01(t)
    a = jnp.where(ay > ax, _PI_2 - a, a)
    a = jnp.where(x < 0.0, _PI - a, a)
    return jnp.where(y < 0.0, -a, a)


def combined_kernel(
    x_ref,
    t_wb_ref, sp_wb_ref, ce0_ref, ce1_ref,
    wce1_ref, wce2_ref, gtab_ref, wtemp_ref,
    wper_ref, wx_ref, wda_ref, fcb_ref,
    wh1_ref, wh2_ref, wout_ref, bout_ref,
    out_ref,
):
    f32 = jnp.float32
    x = x_ref[...]                                     # (D_IN, TB)  feature-major
    tb = x.shape[1]
    c1 = x[3:5, :]                                     # (2, TB)
    c2 = x[5:7, :]                                     # (2, TB)

    # ---------------- TemporalEmbedding: packed args, ONE sin over (24, TB) --------------
    t_wb = t_wb_ref[...]                               # (24, 5): w0,w1,w2 | bias | kind
    t_arg = (t_wb[:, 0:1] * x[0:1, :] + t_wb[:, 1:2] * x[1:2, :]
             + t_wb[:, 2:3] * x[2:3, :] + t_wb[:, 3:4])
    t_kind = t_wb[:, 4:5]                              # 0 = linear, 1 = sin, 2 = sign(sin)
    t_sin = jnp.sin(t_arg)
    temporal = jnp.where(t_kind < 0.5, t_arg,
                         jnp.where(t_kind < 1.5, t_sin, _sign(t_sin)))       # (24, TB)

    # ---------------- coord1 / coord2 stacked along the lane (batch) axis ----------------
    c_all = jnp.concatenate([c1, c2], axis=1)          # (2, 2*TB)

    # CoordinateEmbedding MLP 2 -> 32 -> (32, residual); the final 32->8 layer is folded
    # host-side into fc_in (W_ce1 / W_ce2), so only the shared part runs here.
    ce0 = ce0_ref[...]                                 # (32, 3): w | bias
    h0 = jnp.maximum(ce0[:, 0:1] * c_all[0:1, :]
                     + ce0[:, 1:2] * c_all[1:2, :] + ce0[:, 2:3], 0.0)       # (32, 2*TB)
    ce1 = ce1_ref[...]                                 # (32, 33): W | bias
    h1 = jnp.maximum(jnp.dot(ce1[:, :COORD_HID], h0, preferred_element_type=f32)
                     + ce1[:, COORD_HID:], 0.0) + h0                         # (32, 2*TB)

    # spatial PeriodicEmbedding(2, 5): packed args, ONE sin over (5, 2*TB)
    sp = sp_wb_ref[...]                                # (5, 4): w0,w1 | bias | kind
    sp_arg = sp[:, 0:1] * c_all[0:1, :] + sp[:, 1:2] * c_all[1:2, :] + sp[:, 2:3]
    sp_kind = sp[:, 3:4]
    sp_sin = jnp.sin(sp_arg)
    per_all = jnp.where(sp_kind < 0.5, sp_arg,
                        jnp.where(sp_kind < 1.5, sp_sin, _sign(sp_sin)))     # (5, 2*TB)

    # ---------------- grid embedding: one-hot against the fc_in-folded table -------------
    gi = (c1 * GRID_SIZE).astype(jnp.int32)            # trunc toward zero, like torch .long()
    flat = gi[0:1, :] * GRID_SIZE + gi[1:2, :]         # (1, TB)
    flat = jnp.clip(flat, 0, GRID_SIZE * GRID_SIZE - 1)   # clamp like a jnp gather would
    rows = lax.broadcasted_iota(jnp.int32, (GRID_SIZE * GRID_SIZE, tb), 0)
    onehot = (rows == flat).astype(f32)                # (100, TB)
    # NOTE: reproduces upstream behaviour -- both grid slots use coord1 (folded host-side).

    # ---------------- relative / distance / angle (atan2 fully in-kernel) ----------------
    rx = c2[0:1, :] - c1[0:1, :]
    ry = c2[1:2, :] - c1[1:2, :]
    dist = jnp.sqrt(rx * rx + ry * ry)                 # (1, TB)
    angle = _atan2(ry, rx)                             # (1, TB)

    # ---------------- fc_in: accumulate straight into the (32, TB) hidden layout ---------
    h = jnp.dot(wtemp_ref[...], temporal, preferred_element_type=f32)        # temporal
    h = h + jnp.dot(wce1_ref[...], h1[:, :tb], preferred_element_type=f32)   # coord1 (folded)
    h = h + jnp.dot(wce2_ref[...], h1[:, tb:], preferred_element_type=f32)   # coord2 (folded)
    h = h + jnp.dot(gtab_ref[...], onehot, preferred_element_type=f32)       # grid1+grid2
    wper = wper_ref[...]                               # (32, 10)
    h = h + jnp.dot(wper[:, :P_EMB], per_all[:, :tb], preferred_element_type=f32)
    h = h + jnp.dot(wper[:, P_EMB:], per_all[:, tb:], preferred_element_type=f32)
    h = h + jnp.dot(wx_ref[...], x, preferred_element_type=f32)  # rel (c2-c1) + other feats
    wda = wda_ref[...]                                 # (32, 2): dist | angle columns
    h = h + wda[:, 0:1] * dist + wda[:, 1:2] * angle
    fcb = fcb_ref[...]                                 # (32, 3): b_in | b_h1 | b_h2
    h = jnp.maximum(h + fcb[:, 0:1], 0.0)

    # ---------------- residual fc layers + output head (lane-dense (10, TB) store) -------
    h = jnp.maximum(jnp.dot(wh1_ref[...], h, preferred_element_type=f32)
                    + fcb[:, 1:2], 0.0) + h
    h = jnp.maximum(jnp.dot(wh2_ref[...], h, preferred_element_type=f32)
                    + fcb[:, 2:3], 0.0) + h
    out_ref[...] = jnp.dot(wout_ref[...], h, preferred_element_type=f32) + bout_ref[...]


def init_params(key):
    keys = iter(jax.random.split(key, 32))

    def nrm(shape, scale=0.3):
        return scale * jax.random.normal(next(keys), shape, dtype=jnp.float32)

    return {
        "t_lin_w": nrm((1, T_IN)), "t_lin_b": nrm((1, T_IN), 0.1),
        "t_lin2_w": nrm((1, T_IN)), "t_lin2_b": nrm((1, T_IN), 0.1),
        "t_per_w": nrm((T_IN, T_HALF), 1.0), "t_per_b": nrm((T_IN, T_HALF), 1.0),
        "t_non_w": nrm((T_IN, T_HALF), 1.0), "t_non_b": nrm((T_IN, T_HALF), 1.0),
        "ce_w0": nrm((2, COORD_HID)), "ce_b0": nrm((1, COORD_HID), 0.1),
        "ce_w1": nrm((COORD_HID, COORD_HID), 0.15), "ce_b1": nrm((1, COORD_HID), 0.1),
        "ce_w2": nrm((COORD_HID, COORD_EMB), 0.15), "ce_b2": nrm((1, COORD_EMB), 0.1),
        "sp_lin_w": nrm((2, 1)), "sp_lin_b": nrm((1, 1), 0.1),
        "sp_per_w": nrm((2, P_HALF), 1.0), "sp_per_b": nrm((1, P_HALF), 1.0),
        "sp_non_w": nrm((2, P_HALF), 1.0), "sp_non_b": nrm((1, P_HALF), 1.0),
        "fc_in_w": nrm((E_DIM, HIDDEN), 0.1), "fc_in_b": nrm((1, HIDDEN), 0.05),
        "fc_h1_w": nrm((HIDDEN, HIDDEN), 0.15), "fc_h1_b": nrm((1, HIDDEN), 0.05),
        "fc_h2_w": nrm((HIDDEN, HIDDEN), 0.15), "fc_h2_b": nrm((1, HIDDEN), 0.05),
        "fc_out_w": nrm((HIDDEN, O_DIM), 0.15), "fc_out_b": nrm((1, O_DIM), 0.05),
        "grid_table": nrm((GRID_SIZE ** 2, GRID_EMB), 0.5),
    }


def _pack_params(p):
    """Host-side: transpose to feature-major, fold ce_w2/ce_b2 + grid table into fc_in,
    and consolidate the small weights into 16 kernel inputs."""
    f_in = p["fc_in_w"]                                 # (75, 32)

    # --- temporal packed arg table: (24, 5) = [w_x0, w_x1, w_x2 | bias | kind] ---
    n_lin = 2 if T_EMB % 2 == 0 else 1
    t_w = jnp.zeros((TEMP_END, T_IN), jnp.float32)
    t_b = jnp.zeros((TEMP_END, 1), jnp.float32)
    for i in range(T_IN):
        o = i * T_EMB
        vals_w = jnp.concatenate([p["t_lin_w"][0, i:i + 1], p["t_lin2_w"][0, i:i + 1],
                                  p["t_per_w"][i], p["t_non_w"][i]])
        vals_b = jnp.concatenate([p["t_lin_b"][0, i:i + 1], p["t_lin2_b"][0, i:i + 1],
                                  p["t_per_b"][i], p["t_non_b"][i]])
        t_w = t_w.at[o:o + T_EMB, i].set(vals_w)
        t_b = t_b.at[o:o + T_EMB, 0].set(vals_b)
    t_kind = jnp.tile(jnp.array([0.0] * n_lin + [1.0] * T_HALF + [2.0] * T_HALF,
                                jnp.float32), T_IN)[:, None]
    t_wb = jnp.concatenate([t_w, t_b, t_kind], axis=1)                       # (24, 5)

    # --- spatial periodic packed arg table: (5, 4) = [w_x, w_y | bias | kind] ---
    sp_w = jnp.concatenate([p["sp_lin_w"], p["sp_per_w"], p["sp_non_w"]], axis=1).T
    sp_b = jnp.concatenate([p["sp_lin_b"], p["sp_per_b"], p["sp_non_b"]], axis=1).T
    sp_kind = jnp.array([0.0] + [1.0] * P_HALF + [2.0] * P_HALF, jnp.float32)[:, None]
    sp_wb = jnp.concatenate([sp_w, sp_b, sp_kind], axis=1)                   # (5, 4)

    # --- coordinate MLP (transposed), last layer folded into fc_in ---
    ce0_wb = jnp.concatenate([p["ce_w0"].T, p["ce_b0"].T], axis=1)           # (32, 3)
    ce1_wb = jnp.concatenate([p["ce_w1"].T, p["ce_b1"].T], axis=1)           # (32, 33)
    w_ce1 = (p["ce_w2"] @ f_in[CE1_OFF:CE2_OFF]).T                           # (32, 32)
    w_ce2 = (p["ce_w2"] @ f_in[CE2_OFF:GRID_OFF]).T                          # (32, 32)
    b_fold = (p["ce_b2"] @ (f_in[CE1_OFF:CE2_OFF] + f_in[CE2_OFF:GRID_OFF])).T   # (32, 1)

    # --- grid table folded into fc_in (grid1 == grid2 == table[c1]) ---
    g_tab = (p["grid_table"] @ (f_in[GRID_OFF:GRID_OFF + GRID_EMB]
                                + f_in[GRID_OFF + GRID_EMB:P1_OFF])).T       # (32, 100)

    w_temp = f_in[:TEMP_END].T                                               # (32, 24)
    w_per = jnp.concatenate([f_in[P1_OFF:P2_OFF].T, f_in[P2_OFF:REL_OFF].T], axis=1)  # (32,10)

    # --- the part of fc_in that is linear in x: rel = c2 - c1 and the raw other features ---
    w_rel = f_in[REL_OFF:DST_OFF].T                                          # (32, 2)
    w_x = jnp.zeros((HIDDEN, D_IN), jnp.float32)
    w_x = w_x.at[:, T_IN:T_IN + 2].set(-w_rel)
    w_x = w_x.at[:, T_IN + 2:T_IN + 4].set(w_rel)
    w_x = w_x.at[:, T_IN + 4:].set(f_in[OTH_OFF:E_DIM].T)                    # (32, 12)

    w_da = jnp.concatenate([f_in[DST_OFF:ANG_OFF].T, f_in[ANG_OFF:OTH_OFF].T], axis=1)  # (32,2)
    fc_b = jnp.concatenate([p["fc_in_b"].T + b_fold,
                            p["fc_h1_b"].T, p["fc_h2_b"].T], axis=1)         # (32, 3)

    return [t_wb, sp_wb, ce0_wb, ce1_wb, w_ce1, w_ce2, g_tab, w_temp, w_per,
            w_x, w_da, fc_b, p["fc_h1_w"].T, p["fc_h2_w"].T,
            p["fc_out_w"].T, p["fc_out_b"].T]


def _pick_tile(batch):
    # Largest tile in {2048, 1024, 512, 256} that still gives >= 2 grid steps, so on v7x
    # the "parallel" batch axis shards across both TensorCores (single-TC v5e/v6e just get
    # bigger tiles); tiny batches fall back to one padded 256-wide step.
    for tb in (2048, 1024, 512, 256):
        if batch >= 2 * tb:
            return tb
    return 256


def combined_forward(params, x):
    B = x.shape[0]
    tb = _pick_tile(B)
    Bp = ((B + tb - 1) // tb) * tb                      # pad batch instead of asserting
    xt = jnp.transpose(x)                               # (D_IN, B) feature-major
    if Bp != B:
        xt = jnp.pad(xt, ((0, 0), (0, Bp - B)))

    weights = _pack_params(params)

    in_specs = ([pl.BlockSpec((D_IN, tb), lambda i: (0, i))]
                + [pl.BlockSpec(w.shape, lambda i: (0, 0)) for w in weights])

    out_t = pl.pallas_call(
        combined_kernel,
        out_shape=jax.ShapeDtypeStruct((O_DIM, Bp), jnp.float32),
        grid_spec=pltpu.PrefetchScalarGridSpec(
            num_scalar_prefetch=0,
            grid=(Bp // tb,),
            in_specs=in_specs,
            out_specs=pl.BlockSpec((O_DIM, tb), lambda i: (0, i)),
        ),
        compiler_params=pltpu.CompilerParams(dimension_semantics=("parallel",)),
    )(xt, *weights)
    return jnp.transpose(out_t)[:B]                     # (B, O_DIM)


def _grid_lookup(table, coord):
    idx = (coord * GRID_SIZE).astype(jnp.int32)         # torch .long() -> trunc toward zero
    flat = idx[:, 0] * GRID_SIZE + idx[:, 1]
    return table[flat]


def reference_forward(p, x):
    # plain-JAX mirror of the PyTorch forward with the same parameters
    temps = []
    for i in range(T_IN):
        xi = x[:, i:i + 1]
        lin = xi * p["t_lin_w"][0, i] + p["t_lin_b"][0, i]
        lin2 = xi * p["t_lin2_w"][0, i] + p["t_lin2_b"][0, i]
        per = jnp.sin(xi * p["t_per_w"][i] + p["t_per_b"][i])
        non = jnp.sign(jnp.sin(xi * p["t_non_w"][i] + p["t_non_b"][i]))
        temps.append(jnp.concatenate([lin, lin2, per, non], axis=1))
    temporal = jnp.concatenate(temps, axis=1)

    c1 = x[:, T_IN:T_IN + 2]
    c2 = x[:, T_IN + 2:T_IN + 4]

    def coord_embed(c):
        h = jnp.maximum(c @ p["ce_w0"] + p["ce_b0"], 0.0)
        h = jnp.maximum(h @ p["ce_w1"] + p["ce_b1"], 0.0) + h
        return h @ p["ce_w2"] + p["ce_b2"]

    def sp_periodic(c):
        lin = c @ p["sp_lin_w"] + p["sp_lin_b"]
        per = jnp.sin(c @ p["sp_per_w"] + p["sp_per_b"])
        non = jnp.sign(jnp.sin(c @ p["sp_non_w"] + p["sp_non_b"]))
        return jnp.concatenate([lin, per, non], axis=1)

    rel = c2 - c1
    dist = jnp.sqrt(jnp.sum(rel ** 2, axis=1, keepdims=True))
    angle = jnp.arctan2(rel[:, 1], rel[:, 0])[:, None]
    emb = jnp.concatenate(
        [temporal,
         coord_embed(c1), coord_embed(c2),
         _grid_lookup(p["grid_table"], c1), _grid_lookup(p["grid_table"], c1),
         sp_periodic(c1), sp_periodic(c2),
         rel, dist, angle, x[:, T_IN + 4:]],
        axis=1)

    h = jnp.maximum(emb @ p["fc_in_w"] + p["fc_in_b"], 0.0)
    h = jnp.maximum(h @ p["fc_h1_w"] + p["fc_h1_b"], 0.0) + h
    h = jnp.maximum(h @ p["fc_h2_w"] + p["fc_h2_b"], 0.0) + h
    return h @ p["fc_out_w"] + p["fc_out_b"]


if __name__ == "__main__":
    key = jax.random.PRNGKey(0)
    kp, kx1, kx2, kx3 = jax.random.split(key, 4)
    params = init_params(kp)

    # small deterministic batch
    B = 16
    t_feat = jax.random.uniform(kx1, (B, T_IN), dtype=jnp.float32) * 2.0
    coords = jax.random.uniform(kx2, (B, 4), minval=0.05, maxval=0.95, dtype=jnp.float32)
    other = jax.random.normal(kx3, (B, OTHER), dtype=jnp.float32)
    x = jnp.concatenate([t_feat, coords, other], axis=1)            # (16, 12)

    out = jax.block_until_ready(combined_forward(params, x))
    ref = reference_forward(params, x)
    assert out.shape == (B, O_DIM), out.shape
    assert jnp.allclose(out, ref, atol=2e-2, rtol=2e-2), float(jnp.max(jnp.abs(out - ref)))

    # also exercise the padded / multi-step-grid path (batch not a tile multiple)
    B2 = 530
    k2a, k2b, k2c = jax.random.split(jax.random.PRNGKey(1), 3)
    x2 = jnp.concatenate(
        [jax.random.uniform(k2a, (B2, T_IN), dtype=jnp.float32) * 2.0,
         jax.random.uniform(k2b, (B2, 4), minval=0.05, maxval=0.95, dtype=jnp.float32),
         jax.random.normal(k2c, (B2, OTHER), dtype=jnp.float32)], axis=1)
    out2 = jax.block_until_ready(combined_forward(params, x2))
    ref2 = reference_forward(params, x2)
    assert out2.shape == (B2, O_DIM), out2.shape
    assert jnp.allclose(out2, ref2, atol=2e-2, rtol=2e-2), float(jnp.max(jnp.abs(out2 - ref2)))

    print("KERNEL_OK")
</pallas_src>

<mosaic_0001>
module attributes {stable_mosaic.version = 11 : i64} {
  func.func @combined_kernel(%arg0: i32, %arg1: memref<12x256xf32, #tpu.memory_space<vmem>>, %arg2: memref<24x5xf32, #tpu.memory_space<vmem>>, %arg3: memref<5x4xf32, #tpu.memory_space<vmem>>, %arg4: memref<32x3xf32, #tpu.memory_space<vmem>>, %arg5: memref<32x33xf32, #tpu.memory_space<vmem>>, %arg6: memref<32x32xf32, #tpu.memory_space<vmem>>, %arg7: memref<32x32xf32, #tpu.memory_space<vmem>>, %arg8: memref<32x100xf32, #tpu.memory_space<vmem>>, %arg9: memref<32x24xf32, #tpu.memory_space<vmem>>, %arg10: memref<32x10xf32, #tpu.memory_space<vmem>>, %arg11: memref<32x12xf32, #tpu.memory_space<vmem>>, %arg12: memref<32x2xf32, #tpu.memory_space<vmem>>, %arg13: memref<32x3xf32, #tpu.memory_space<vmem>>, %arg14: memref<32x32xf32, #tpu.memory_space<vmem>>, %arg15: memref<32x32xf32, #tpu.memory_space<vmem>>, %arg16: memref<10x32xf32, #tpu.memory_space<vmem>>, %arg17: memref<10x1xf32, #tpu.memory_space<vmem>>, %arg18: memref<10x256xf32, #tpu.memory_space<vmem>>) attributes {dimension_semantics = [#tpu.dimension_semantics<parallel>], iteration_bounds = array<i64: 1>, scalar_prefetch = 0 : i64, scratch_operands = 0 : i64, tpu.core_type = #tpu.core_type<tc>, window_params = [{transform_indices = @transform_0, window_bounds = array<i64: 12, 256>}, {pipeline_mode = #tpu.pipeline_mode<synchronous>, transform_indices = @transform_1, window_bounds = array<i64: 24, 5>}, {pipeline_mode = #tpu.pipeline_mode<synchronous>, transform_indices = @transform_2, window_bounds = array<i64: 5, 4>}, {pipeline_mode = #tpu.pipeline_mode<synchronous>, transform_indices = @transform_3, window_bounds = array<i64: 32, 3>}, {pipeline_mode = #tpu.pipeline_mode<synchronous>, transform_indices = @transform_4, window_bounds = array<i64: 32, 33>}, {pipeline_mode = #tpu.pipeline_mode<synchronous>, transform_indices = @transform_5, window_bounds = array<i64: 32, 32>}, {pipeline_mode = #tpu.pipeline_mode<synchronous>, transform_indices = @transform_6, window_bounds = array<i64: 32, 32>}, {pipeline_mode = #tpu.pipeline_mode<synchronous>, transform_indices = @transform_7, window_bounds = array<i64: 32, 100>}, {pipeline_mode = #tpu.pipeline_mode<synchronous>, transform_indices = @transform_8, window_bounds = array<i64: 32, 24>}, {pipeline_mode = #tpu.pipeline_mode<synchronous>, transform_indices = @transform_9, window_bounds = array<i64: 32, 10>}, {pipeline_mode = #tpu.pipeline_mode<synchronous>, transform_indices = @transform_10, window_bounds = array<i64: 32, 12>}, {pipeline_mode = #tpu.pipeline_mode<synchronous>, transform_indices = @transform_11, window_bounds = array<i64: 32, 2>}, {pipeline_mode = #tpu.pipeline_mode<synchronous>, transform_indices = @transform_12, window_bounds = array<i64: 32, 3>}, {pipeline_mode = #tpu.pipeline_mode<synchronous>, transform_indices = @transform_13, window_bounds = array<i64: 32, 32>}, {pipeline_mode = #tpu.pipeline_mode<synchronous>, transform_indices = @transform_14, window_bounds = array<i64: 32, 32>}, {pipeline_mode = #tpu.pipeline_mode<synchronous>, transform_indices = @transform_15, window_bounds = array<i64: 10, 32>}, {pipeline_mode = #tpu.pipeline_mode<synchronous>, transform_indices = @transform_16, window_bounds = array<i64: 10, 1>}, {transform_indices = @transform_17, window_bounds = array<i64: 10, 256>}]} {
    %c0 = arith.constant 0 : index
    %c0_0 = arith.constant 0 : index
    %0 = vector.load %arg1[%c0, %c0_0] : memref<12x256xf32, #tpu.memory_space<vmem>>, vector<12x256xf32>
    %1 = vector.extract_strided_slice %0 {offsets = [3, 0], sizes = [2, 256], strides = [1, 1]} : vector<12x256xf32> to vector<2x256xf32>
    %2 = vector.extract_strided_slice %0 {offsets = [5, 0], sizes = [2, 256], strides = [1, 1]} : vector<12x256xf32> to vector<2x256xf32>
    %c0_1 = arith.constant 0 : index
    %c0_2 = arith.constant 0 : index
    %3 = vector.load %arg2[%c0_1, %c0_2] : memref<24x5xf32, #tpu.memory_space<vmem>>, vector<24x5xf32>
    %4 = vector.extract_strided_slice %3 {offsets = [0, 0], sizes = [24, 1], strides = [1, 1]} : vector<24x5xf32> to vector<24x1xf32>
    %5 = vector.extract_strided_slice %0 {offsets = [0, 0], sizes = [1, 256], strides = [1, 1]} : vector<12x256xf32> to vector<1x256xf32>
    %6 = vector.broadcast %4 : vector<24x1xf32> to vector<24x256xf32>
    %7 = vector.broadcast %5 : vector<1x256xf32> to vector<24x256xf32>
    %8 = arith.mulf %6, %7 : vector<24x256xf32>
    %9 = vector.extract_strided_slice %3 {offsets = [0, 1], sizes = [24, 1], strides = [1, 1]} : vector<24x5xf32> to vector<24x1xf32>
    %10 = vector.extract_strided_slice %0 {offsets = [1, 0], sizes = [1, 256], strides = [1, 1]} : vector<12x256xf32> to vector<1x256xf32>
    %11 = vector.broadcast %9 : vector<24x1xf32> to vector<24x256xf32>
    %12 = vector.broadcast %10 : vector<1x256xf32> to vector<24x256xf32>
    %13 = arith.mulf %11, %12 : vector<24x256xf32>
    %14 = arith.addf %8, %13 : vector<24x256xf32>
    %15 = vector.extract_strided_slice %3 {offsets = [0, 2], sizes = [24, 1], strides = [1, 1]} : vector<24x5xf32> to vector<24x1xf32>
    %16 = vector.extract_strided_slice %0 {offsets = [2, 0], sizes = [1, 256], strides = [1, 1]} : vector<12x256xf32> to vector<1x256xf32>
    %17 = vector.broadcast %15 : vector<24x1xf32> to vector<24x256xf32>
    %18 = vector.broadcast %16 : vector<1x256xf32> to vector<24x256xf32>
    %19 = arith.mulf %17, %18 : vector<24x256xf32>
    %20 = arith.addf %14, %19 : vector<24x256xf32>
    %21 = vector.extract_strided_slice %3 {offsets = [0, 3], sizes = [24, 1], strides = [1, 1]} : vector<24x5xf32> to vector<24x1xf32>
    %22 = vector.broadcast %21 : vector<24x1xf32> to vector<24x256xf32>
    %23 = arith.addf %20, %22 : vector<24x256xf32>
    %24 = vector.extract_strided_slice %3 {offsets = [0, 4], sizes = [24, 1], strides = [1, 1]} : vector<24x5xf32> to vector<24x1xf32>
    %25 = math.sin %23 : vector<24x256xf32>
    %cst = arith.constant 5.000000e-01 : f32
    %26 = vector.broadcast %cst : f32 to vector<24x1xf32>
    %27 = arith.cmpf olt, %24, %26 : vector<24x1xf32>
    %cst_3 = arith.constant 1.500000e+00 : f32
    %28 = vector.broadcast %cst_3 : f32 to vector<24x1xf32>
    %29 = arith.cmpf olt, %24, %28 : vector<24x1xf32>
    %cst_4 = arith.constant 0.000000e+00 : f32
    %30 = vector.broadcast %cst_4 : f32 to vector<24x256xf32>
    %31 = arith.cmpf ogt, %25, %30 : vector<24x256xf32>
    %cst_5 = arith.constant 0.000000e+00 : f32
    %32 = vector.broadcast %cst_5 : f32 to vector<24x256xf32>
    %33 = arith.cmpf olt, %25, %32 : vector<24x256xf32>
    %cst_6 = arith.constant -1.000000e+00 : f32
    %cst_7 = arith.constant 0.000000e+00 : f32
    %34 = vector.broadcast %cst_6 : f32 to vector<24x256xf32>
    %35 = vector.broadcast %cst_7 : f32 to vector<24x256xf32>
    %36 = arith.select %33, %34, %35 : vector<24x256xi1>, vector<24x256xf32>
    %cst_8 = arith.constant 1.000000e+00 : f32
    %37 = vector.broadcast %cst_8 : f32 to vector<24x256xf32>
    %38 = arith.select %31, %37, %36 : vector<24x256xi1>, vector<24x256xf32>
    %39 = vector.shape_cast %29 : vector<24x1xi1> to vector<24x1xi1>
    %40 = vector.broadcast %39 : vector<24x1xi1> to vector<24x256xi1>
    %41 = arith.select %40, %25, %38 : vector<24x256xi1>, vector<24x256xf32>
    %42 = vector.shape_cast %27 : vector<24x1xi1> to vector<24x1xi1>
    %43 = vector.broadcast %42 : vector<24x1xi1> to vector<24x256xi1>
    %44 = arith.select %43, %23, %41 : vector<24x256xi1>, vector<24x256xf32>
    %45 = tpu.concatenate %1, %2 in 1 : vector<2x256xf32>, vector<2x256xf32> -> vector<2x512xf32>
    %c0_9 = arith.constant 0 : index
    %c0_10 = arith.constant 0 : index
    %46 = vector.load %arg4[%c0_9, %c0_10] : memref<32x3xf32, #tpu.memory_space<vmem>>, vector<32x3xf32>
    %47 = vector.extract_strided_slice %46 {offsets = [0, 0], sizes = [32, 1], strides = [1, 1]} : vector<32x3xf32> to vector<32x1xf32>
    %48 = vector.extract_strided_slice %45 {offsets = [0, 0], sizes = [1, 512], strides = [1, 1]} : vector<2x512xf32> to vector<1x512xf32>
    %49 = vector.broadcast %47 : vector<32x1xf32> to vector<32x512xf32>
    %50 = vector.broadcast %48 : vector<1x512xf32> to vector<32x512xf32>
    %51 = arith.mulf %49, %50 : vector<32x512xf32>
    %52 = vector.extract_strided_slice %46 {offsets = [0, 1], sizes = [32, 1], strides = [1, 1]} : vector<32x3xf32> to vector<32x1xf32>
    %53 = vector.extract_strided_slice %45 {offsets = [1, 0], sizes = [1, 512], strides = [1, 1]} : vector<2x512xf32> to vector<1x512xf32>
    %54 = vector.broadcast %52 : vector<32x1xf32> to vector<32x512xf32>
    %55 = vector.broadcast %53 : vector<1x512xf32> to vector<32x512xf32>
    %56 = arith.mulf %54, %55 : vector<32x512xf32>
    %57 = arith.addf %51, %56 : vector<32x512xf32>
    %58 = vector.extract_strided_slice %46 {offsets = [0, 2], sizes = [32, 1], strides = [1, 1]} : vector<32x3xf32> to vector<32x1xf32>
    %59 = vector.broadcast %58 : vector<32x1xf32> to vector<32x512xf32>
    %60 = arith.addf %57, %59 : vector<32x512xf32>
    %cst_11 = arith.constant 0.000000e+00 : f32
    %61 = vector.broadcast %cst_11 : f32 to vector<32x512xf32>
    %62 = arith.maximumf %60, %61 : vector<32x512xf32>
    %c0_12 = arith.constant 0 : index
    %c0_13 = arith.constant 0 : index
    %63 = vector.load %arg5[%c0_12, %c0_13] : memref<32x33xf32, #tpu.memory_space<vmem>>, vector<32x33xf32>
    %64 = vector.extract_strided_slice %63 {offsets = [0, 0], sizes = [32, 32], strides = [1, 1]} : vector<32x33xf32> to vector<32x32xf32>
    %cst_14 = arith.constant dense<0.000000e+00> : vector<32x512xf32>
    %65 = tpu.matmul %64, %62, %cst_14 {dimension_numbers = #tpu.dot_dimension_numbers<[1], [0], [0], [1], [0, 0, 1, 1], [], []>} : vector<32x32xf32>, vector<32x512xf32>, vector<32x512xf32> -> vector<32x512xf32>
    %66 = vector.extract_strided_slice %63 {offsets = [0, 32], sizes = [32, 1], strides = [1, 1]} : vector<32x33xf32> to vector<32x1xf32>
    %67 = vector.broadcast %66 : vector<32x1xf32> to vector<32x512xf32>
    %68 = arith.addf %65, %67 : vector<32x512xf32>
    %cst_15 = arith.constant 0.000000e+00 : f32
    %69 = vector.broadcast %cst_15 : f32 to vector<32x512xf32>
    %70 = arith.maximumf %68, %69 : vector<32x512xf32>
    %71 = arith.addf %70, %62 : vector<32x512xf32>
    %c0_16 = arith.constant 0 : index
    %c0_17 = arith.constant 0 : index
    %72 = vector.load %arg3[%c0_16, %c0_17] : memref<5x4xf32, #tpu.memory_space<vmem>>, vector<5x4xf32>
    %73 = vector.extract_strided_slice %72 {offsets = [0, 0], sizes = [5, 1], strides = [1, 1]} : vector<5x4xf32> to vector<5x1xf32>
    %74 = vector.extract_strided_slice %45 {offsets = [0, 0], sizes = [1, 512], strides = [1, 1]} : vector<2x512xf32> to vector<1x512xf32>
    %75 = vector.broadcast %73 : vector<5x1xf32> to vector<5x512xf32>
    %76 = vector.broadcast %74 : vector<1x512xf32> to vector<5x512xf32>
    %77 = arith.mulf %75, %76 : vector<5x512xf32>
    %78 = vector.extract_strided_slice %72 {offsets = [0, 1], sizes = [5, 1], strides = [1, 1]} : vector<5x4xf32> to vector<5x1xf32>
    %79 = vector.extract_strided_slice %45 {offsets = [1, 0], sizes = [1, 512], strides = [1, 1]} : vector<2x512xf32> to vector<1x512xf32>
    %80 = vector.broadcast %78 : vector<5x1xf32> to vector<5x512xf32>
    %81 = vector.broadcast %79 : vector<1x512xf32> to vector<5x512xf32>
    %82 = arith.mulf %80, %81 : vector<5x512xf32>
    %83 = arith.addf %77, %82 : vector<5x512xf32>
    %84 = vector.extract_strided_slice %72 {offsets = [0, 2], sizes = [5, 1], strides = [1, 1]} : vector<5x4xf32> to vector<5x1xf32>
    %85 = vector.broadcast %84 : vector<5x1xf32> to vector<5x512xf32>
    %86 = arith.addf %83, %85 : vector<5x512xf32>
    %87 = vector.extract_strided_slice %72 {offsets = [0, 3], sizes = [5, 1], strides = [1, 1]} : vector<5x4xf32> to vector<5x1xf32>
    %88 = math.sin %86 : vector<5x512xf32>
    %cst_18 = arith.constant 5.000000e-01 : f32
    %89 = vector.broadcast %cst_18 : f32 to vector<5x1xf32>
    %90 = arith.cmpf olt, %87, %89 : vector<5x1xf32>
    %cst_19 = arith.constant 1.500000e+00 : f32
    %91 = vector.broadcast %cst_19 : f32 to vector<5x1xf32>
    %92 = arith.cmpf olt, %87, %91 : vector<5x1xf32>
    %cst_20 = arith.constant 0.000000e+00 : f32
    %93 = vector.broadcast %cst_20 : f32 to vector<5x512xf32>
    %94 = arith.cmpf ogt, %88, %93 : vector<5x512xf32>
    %cst_21 = arith.constant 0.000000e+00 : f32
    %95 = vector.broadcast %cst_21 : f32 to vector<5x512xf32>
    %96 = arith.cmpf olt, %88, %95 : vector<5x512xf32>
    %cst_22 = arith.constant -1.000000e+00 : f32
    %cst_23 = arith.constant 0.000000e+00 : f32
    %97 = vector.broadcast %cst_22 : f32 to vector<5x512xf32>
    %98 = vector.broadcast %cst_23 : f32 to vector<5x512xf32>
    %99 = arith.select %96, %97, %98 : vector<5x512xi1>, vector<5x512xf32>
    %cst_24 = arith.constant 1.000000e+00 : f32
    %100 = vector.broadcast %cst_24 : f32 to vector<5x512xf32>
    %101 = arith.select %94, %100, %99 : vector<5x512xi1>, vector<5x512xf32>
    %102 = vector.shape_cast %92 : vector<5x1xi1> to vector<5x1xi1>
    %103 = vector.broadcast %102 : vector<5x1xi1> to vector<5x512xi1>
    %104 = arith.select %103, %88, %101 : vector<5x512xi1>, vector<5x512xf32>
    %105 = vector.shape_cast %90 : vector<5x1xi1> to vector<5x1xi1>
    %106 = vector.broadcast %105 : vector<5x1xi1> to vector<5x512xi1>
    %107 = arith.select %106, %86, %104 : vector<5x512xi1>, vector<5x512xf32>
    %cst_25 = arith.constant 1.000000e+01 : f32
    %108 = vector.broadcast %cst_25 : f32 to vector<2x256xf32>
    %109 = arith.mulf %1, %108 : vector<2x256xf32>
    %110 = arith.fptosi %109 : vector<2x256xf32> to vector<2x256xi32>
    %111 = vector.extract_strided_slice %110 {offsets = [0, 0], sizes = [1, 256], strides = [1, 1]} : vector<2x256xi32> to vector<1x256xi32>
    %c10_i32 = arith.constant 10 : i32
    %112 = vector.broadcast %c10_i32 : i32 to vector<1x256xi32>
    %113 = arith.muli %111, %112 : vector<1x256xi32>
    %114 = vector.extract_strided_slice %110 {offsets = [1, 0], sizes = [1, 256], strides = [1, 1]} : vector<2x256xi32> to vector<1x256xi32>
    %115 = arith.addi %113, %114 : vector<1x256xi32>
    %c0_i32 = arith.constant 0 : i32
    %c99_i32 = arith.constant 99 : i32
    %116 = vector.broadcast %c0_i32 : i32 to vector<1x256xi32>
    %117 = arith.maxsi %116, %115 : vector<1x256xi32>
    %118 = vector.broadcast %c99_i32 : i32 to vector<1x256xi32>
    %119 = arith.minsi %118, %117 : vector<1x256xi32>
    %120 = tpu.iota {dimensions = array<i32: 0>} : vector<100x256xi32>
    %121 = vector.broadcast %119 : vector<1x256xi32> to vector<100x256xi32>
    %122 = arith.cmpi eq, %120, %121 : vector<100x256xi32>
    %123 = arith.extui %122 : vector<100x256xi1> to vector<100x256xi32>
    %124 = arith.sitofp %123 : vector<100x256xi32> to vector<100x256xf32>
    %125 = vector.extract_strided_slice %2 {offsets = [0, 0], sizes = [1, 256], strides = [1, 1]} : vector<2x256xf32> to vector<1x256xf32>
    %126 = vector.extract_strided_slice %1 {offsets = [0, 0], sizes = [1, 256], strides = [1, 1]} : vector<2x256xf32> to vector<1x256xf32>
    %127 = arith.subf %125, %126 : vector<1x256xf32>
    %128 = vector.extract_strided_slice %2 {offsets = [1, 0], sizes = [1, 256], strides = [1, 1]} : vector<2x256xf32> to vector<1x256xf32>
    %129 = vector.extract_strided_slice %1 {offsets = [1, 0], sizes = [1, 256], strides = [1, 1]} : vector<2x256xf32> to vector<1x256xf32>
    %130 = arith.subf %128, %129 : vector<1x256xf32>
    %131 = arith.mulf %127, %127 : vector<1x256xf32>
    %132 = arith.mulf %130, %130 : vector<1x256xf32>
    %133 = arith.addf %131, %132 : vector<1x256xf32>
    %134 = math.sqrt %133 : vector<1x256xf32>
    %135 = math.absf %127 : vector<1x256xf32>
    %136 = math.absf %130 : vector<1x256xf32>
    %137 = arith.maximumf %135, %136 : vector<1x256xf32>
    %138 = arith.minimumf %135, %136 : vector<1x256xf32>
    %cst_26 = arith.constant 0.000000e+00 : f32
    %139 = vector.broadcast %cst_26 : f32 to vector<1x256xf32>
    %140 = arith.cmpf oeq, %137, %139 : vector<1x256xf32>
    %cst_27 = arith.constant 1.000000e+00 : f32
    %141 = vector.broadcast %cst_27 : f32 to vector<1x256xf32>
    %142 = arith.select %140, %141, %137 : vector<1x256xi1>, vector<1x256xf32>
    %143 = arith.divf %138, %142 : vector<1x256xf32>
    %cst_28 = arith.constant 0.414213568 : f32
    %144 = vector.broadcast %cst_28 : f32 to vector<1x256xf32>
    %145 = arith.cmpf ogt, %143, %144 : vector<1x256xf32>
    %cst_29 = arith.constant 1.000000e+00 : f32
    %146 = vector.broadcast %cst_29 : f32 to vector<1x256xf32>
    %147 = arith.subf %143, %146 : vector<1x256xf32>
    %cst_30 = arith.constant 1.000000e+00 : f32
    %148 = vector.broadcast %cst_30 : f32 to vector<1x256xf32>
    %149 = arith.addf %143, %148 : vector<1x256xf32>
    %150 = arith.divf %147, %149 : vector<1x256xf32>
    %151 = arith.select %145, %150, %143 : vector<1x256xi1>, vector<1x256xf32>
    %152 = arith.mulf %151, %151 : vector<1x256xf32>
    %cst_31 = arith.constant 0.0805374458 : f32
    %153 = vector.broadcast %cst_31 : f32 to vector<1x256xf32>
    %154 = arith.mulf %153, %152 : vector<1x256xf32>
    %cst_32 = arith.constant 0.138776854 : f32
    %155 = vector.broadcast %cst_32 : f32 to vector<1x256xf32>
    %156 = arith.subf %154, %155 : vector<1x256xf32>
    %157 = arith.mulf %156, %152 : vector<1x256xf32>
    %cst_33 = arith.constant 0.199777111 : f32
    %158 = vector.broadcast %cst_33 : f32 to vector<1x256xf32>
    %159 = arith.addf %157, %158 : vector<1x256xf32>
    %160 = arith.mulf %159, %152 : vector<1x256xf32>
    %cst_34 = arith.constant 0.333329499 : f32
    %161 = vector.broadcast %cst_34 : f32 to vector<1x256xf32>
    %162 = arith.subf %160, %161 : vector<1x256xf32>
    %163 = arith.mulf %162, %152 : vector<1x256xf32>
    %164 = arith.mulf %163, %151 : vector<1x256xf32>
    %165 = arith.addf %164, %151 : vector<1x256xf32>
    %cst_35 = arith.constant 0.785398185 : f32
    %166 = vector.broadcast %cst_35 : f32 to vector<1x256xf32>
    %167 = arith.addf %165, %166 : vector<1x256xf32>
    %168 = arith.select %145, %167, %165 : vector<1x256xi1>, vector<1x256xf32>
    %169 = arith.cmpf ogt, %136, %135 : vector<1x256xf32>
    %cst_36 = arith.constant 1.57079637 : f32
    %170 = vector.broadcast %cst_36 : f32 to vector<1x256xf32>
    %171 = arith.subf %170, %168 : vector<1x256xf32>
    %172 = arith.select %169, %171, %168 : vector<1x256xi1>, vector<1x256xf32>
    %cst_37 = arith.constant 0.000000e+00 : f32
    %173 = vector.broadcast %cst_37 : f32 to vector<1x256xf32>
    %174 = arith.cmpf olt, %127, %173 : vector<1x256xf32>
    %cst_38 = arith.constant 3.14159274 : f32
    %175 = vector.broadcast %cst_38 : f32 to vector<1x256xf32>
    %176 = arith.subf %175, %172 : vector<1x256xf32>
    %177 = arith.select %174, %176, %172 : vector<1x256xi1>, vector<1x256xf32>
    %cst_39 = arith.constant 0.000000e+00 : f32
    %178 = vector.broadcast %cst_39 : f32 to vector<1x256xf32>
    %179 = arith.cmpf olt, %130, %178 : vector<1x256xf32>
    %cst_40 = arith.constant 0.000000e+00 : f32
    %180 = vector.broadcast %cst_40 : f32 to vector<1x256xf32>
    %181 = arith.subf %180, %177 : vector<1x256xf32>
    %182 = arith.select %179, %181, %177 : vector<1x256xi1>, vector<1x256xf32>
    %c0_41 = arith.constant 0 : index
    %c0_42 = arith.constant 0 : index
    %183 = vector.load %arg9[%c0_41, %c0_42] : memref<32x24xf32, #tpu.memory_space<vmem>>, vector<32x24xf32>
    %cst_43 = arith.constant dense<0.000000e+00> : vector<32x256xf32>
    %184 = tpu.matmul %183, %44, %cst_43 {dimension_numbers = #tpu.dot_dimension_numbers<[1], [0], [0], [1], [0, 0, 1, 1], [], []>} : vector<32x24xf32>, vector<24x256xf32>, vector<32x256xf32> -> vector<32x256xf32>
    %c0_44 = arith.constant 0 : index
    %c0_45 = arith.constant 0 : index
    %185 = vector.load %arg6[%c0_44, %c0_45] : memref<32x32xf32, #tpu.memory_space<vmem>>, vector<32x32xf32>
    %186 = vector.extract_strided_slice %71 {offsets = [0, 0], sizes = [32, 256], strides = [1, 1]} : vector<32x512xf32> to vector<32x256xf32>
    %cst_46 = arith.constant dense<0.000000e+00> : vector<32x256xf32>
    %187 = tpu.matmul %185, %186, %cst_46 {dimension_numbers = #tpu.dot_dimension_numbers<[1], [0], [0], [1], [0, 0, 1, 1], [], []>} : vector<32x32xf32>, vector<32x256xf32>, vector<32x256xf32> -> vector<32x256xf32>
    %188 = arith.addf %184, %187 : vector<32x256xf32>
    %c0_47 = arith.constant 0 : index
    %c0_48 = arith.constant 0 : index
    %189 = vector.load %arg7[%c0_47, %c0_48] : memref<32x32xf32, #tpu.memory_space<vmem>>, vector<32x32xf32>
    %190 = vector.extract_strided_slice %71 {offsets = [0, 256], sizes = [32, 256], strides = [1, 1]} : vector<32x512xf32> to vector<32x256xf32>
    %cst_49 = arith.constant dense<0.000000e+00> : vector<32x256xf32>
    %191 = tpu.matmul %189, %190, %cst_49 {dimension_numbers = #tpu.dot_dimension_numbers<[1], [0], [0], [1], [0, 0, 1, 1], [], []>} : vector<32x32xf32>, vector<32x256xf32>, vector<32x256xf32> -> vector<32x256xf32>
    %192 = arith.addf %188, %191 : vector<32x256xf32>
    %c0_50 = arith.constant 0 : index
    %c0_51 = arith.constant 0 : index
    %193 = vector.load %arg8[%c0_50, %c0_51] : memref<32x100xf32, #tpu.memory_space<vmem>>, vector<32x100xf32>
    %cst_52 = arith.constant dense<0.000000e+00> : vector<32x256xf32>
    %194 = tpu.matmul %193, %124, %cst_52 {dimension_numbers = #tpu.dot_dimension_numbers<[1], [0], [0], [1], [0, 0, 1, 1], [], []>} : vector<32x100xf32>, vector<100x256xf32>, vector<32x256xf32> -> vector<32x256xf32>
    %195 = arith.addf %192, %194 : vector<32x256xf32>
    %c0_53 = arith.constant 0 : index
    %c0_54 = arith.constant 0 : index
    %196 = vector.load %arg10[%c0_53, %c0_54] : memref<32x10xf32, #tpu.memory_space<vmem>>, vector<32x10xf32>
    %197 = vector.extract_strided_slice %196 {offsets = [0, 0], sizes = [32, 5], strides = [1, 1]} : vector<32x10xf32> to vector<32x5xf32>
    %198 = vector.extract_strided_slice %107 {offsets = [0, 0], sizes = [5, 256], strides = [1, 1]} : vector<5x512xf32> to vector<5x256xf32>
    %cst_55 = arith.constant dense<0.000000e+00> : vector<32x256xf32>
    %199 = tpu.matmul %197, %198, %cst_55 {dimension_numbers = #tpu.dot_dimension_numbers<[1], [0], [0], [1], [0, 0, 1, 1], [], []>} : vector<32x5xf32>, vector<5x256xf32>, vector<32x256xf32> -> vector<32x256xf32>
    %200 = arith.addf %195, %199 : vector<32x256xf32>
    %201 = vector.extract_strided_slice %196 {offsets = [0, 5], sizes = [32, 5], strides = [1, 1]} : vector<32x10xf32> to vector<32x5xf32>
    %202 = vector.extract_strided_slice %107 {offsets = [0, 256], sizes = [5, 256], strides = [1, 1]} : vector<5x512xf32> to vector<5x256xf32>
    %cst_56 = arith.constant dense<0.000000e+00> : vector<32x256xf32>
    %203 = tpu.matmul %201, %202, %cst_56 {dimension_numbers = #tpu.dot_dimension_numbers<[1], [0], [0], [1], [0, 0, 1, 1], [], []>} : vector<32x5xf32>, vector<5x256xf32>, vector<32x256xf32> -> vector<32x256xf32>
    %204 = arith.addf %200, %203 : vector<32x256xf32>
    %c0_57 = arith.constant 0 : index
    %c0_58 = arith.constant 0 : index
    %205 = vector.load %arg11[%c0_57, %c0_58] : memref<32x12xf32, #tpu.memory_space<vmem>>, vector<32x12xf32>
    %cst_59 = arith.constant dense<0.000000e+00> : vector<32x256xf32>
    %206 = tpu.matmul %205, %0, %cst_59 {dimension_numbers = #tpu.dot_dimension_numbers<[1], [0], [0], [1], [0, 0, 1, 1], [], []>} : vector<32x12xf32>, vector<12x256xf32>, vector<32x256xf32> -> vector<32x256xf32>
    %207 = arith.addf %204, %206 : vector<32x256xf32>
    %c0_60 = arith.constant 0 : index
    %c0_61 = arith.constant 0 : index
    %208 = vector.load %arg12[%c0_60, %c0_61] : memref<32x2xf32, #tpu.memory_space<vmem>>, vector<32x2xf32>
    %209 = vector.extract_strided_slice %208 {offsets = [0, 0], sizes = [32, 1], strides = [1, 1]} : vector<32x2xf32> to vector<32x1xf32>
    %210 = vector.broadcast %209 : vector<32x1xf32> to vector<32x256xf32>
    %211 = vector.broadcast %134 : vector<1x256xf32> to vector<32x256xf32>
    %212 = arith.mulf %210, %211 : vector<32x256xf32>
    %213 = arith.addf %207, %212 : vector<32x256xf32>
    %214 = vector.extract_strided_slice %208 {offsets = [0, 1], sizes = [32, 1], strides = [1, 1]} : vector<32x2xf32> to vector<32x1xf32>
    %215 = vector.broadcast %214 : vector<32x1xf32> to vector<32x256xf32>
    %216 = vector.broadcast %182 : vector<1x256xf32> to vector<32x256xf32>
    %217 = arith.mulf %215, %216 : vector<32x256xf32>
    %218 = arith.addf %213, %217 : vector<32x256xf32>
    %c0_62 = arith.constant 0 : index
    %c0_63 = arith.constant 0 : index
    %219 = vector.load %arg13[%c0_62, %c0_63] : memref<32x3xf32, #tpu.memory_space<vmem>>, vector<32x3xf32>
    %220 = vector.extract_strided_slice %219 {offsets = [0, 0], sizes = [32, 1], strides = [1, 1]} : vector<32x3xf32> to vector<32x1xf32>
    %221 = vector.broadcast %220 : vector<32x1xf32> to vector<32x256xf32>
    %222 = arith.addf %218, %221 : vector<32x256xf32>
    %cst_64 = arith.constant 0.000000e+00 : f32
    %223 = vector.broadcast %cst_64 : f32 to vector<32x256xf32>
    %224 = arith.maximumf %222, %223 : vector<32x256xf32>
    %c0_65 = arith.constant 0 : index
    %c0_66 = arith.constant 0 : index
    %225 = vector.load %arg14[%c0_65, %c0_66] : memref<32x32xf32, #tpu.memory_space<vmem>>, vector<32x32xf32>
    %cst_67 = arith.constant dense<0.000000e+00> : vector<32x256xf32>
    %226 = tpu.matmul %225, %224, %cst_67 {dimension_numbers = #tpu.dot_dimension_numbers<[1], [0], [0], [1], [0, 0, 1, 1], [], []>} : vector<32x32xf32>, vector<32x256xf32>, vector<32x256xf32> -> vector<32x256xf32>
    %227 = vector.extract_strided_slice %219 {offsets = [0, 1], sizes = [32, 1], strides = [1, 1]} : vector<32x3xf32> to vector<32x1xf32>
    %228 = vector.broadcast %227 : vector<32x1xf32> to vector<32x256xf32>
    %229 = arith.addf %226, %228 : vector<32x256xf32>
    %cst_68 = arith.constant 0.000000e+00 : f32
    %230 = vector.broadcast %cst_68 : f32 to vector<32x256xf32>
    %231 = arith.maximumf %229, %230 : vector<32x256xf32>
    %232 = arith.addf %231, %224 : vector<32x256xf32>
    %c0_69 = arith.constant 0 : index
    %c0_70 = arith.constant 0 : index
    %233 = vector.load %arg15[%c0_69, %c0_70] : memref<32x32xf32, #tpu.memory_space<vmem>>, vector<32x32xf32>
    %cst_71 = arith.constant dense<0.000000e+00> : vector<32x256xf32>
    %234 = tpu.matmul %233, %232, %cst_71 {dimension_numbers = #tpu.dot_dimension_numbers<[1], [0], [0], [1], [0, 0, 1, 1], [], []>} : vector<32x32xf32>, vector<32x256xf32>, vector<32x256xf32> -> vector<32x256xf32>
    %235 = vector.extract_strided_slice %219 {offsets = [0, 2], sizes = [32, 1], strides = [1, 1]} : vector<32x3xf32> to vector<32x1xf32>
    %236 = vector.broadcast %235 : vector<32x1xf32> to vector<32x256xf32>
    %237 = arith.addf %234, %236 : vector<32x256xf32>
    %cst_72 = arith.constant 0.000000e+00 : f32
    %238 = vector.broadcast %cst_72 : f32 to vector<32x256xf32>
    %239 = arith.maximumf %237, %238 : vector<32x256xf32>
    %240 = arith.addf %239, %232 : vector<32x256xf32>
    %c0_73 = arith.constant 0 : index
    %c0_74 = arith.constant 0 : index
    %241 = vector.load %arg16[%c0_73, %c0_74] : memref<10x32xf32, #tpu.memory_space<vmem>>, vector<10x32xf32>
    %cst_75 = arith.constant dense<0.000000e+00> : vector<10x256xf32>
    %242 = tpu.matmul %241, %240, %cst_75 {dimension_numbers = #tpu.dot_dimension_numbers<[1], [0], [0], [1], [0, 0, 1, 1], [], []>} : vector<10x32xf32>, vector<32x256xf32>, vector<10x256xf32> -> vector<10x256xf32>
    %c0_76 = arith.constant 0 : index
    %c0_77 = arith.constant 0 : index
    %243 = vector.load %arg17[%c0_76, %c0_77] : memref<10x1xf32, #tpu.memory_space<vmem>>, vector<10x1xf32>
    %244 = vector.broadcast %243 : vector<10x1xf32> to vector<10x256xf32>
    %245 = arith.addf %242, %244 : vector<10x256xf32>
    %c0_78 = arith.constant 0 : index
    %c0_79 = arith.constant 0 : index
    %246 = vector.load %arg18[%c0_78, %c0_79] : memref<10x256xf32, #tpu.memory_space<vmem>>, vector<10x256xf32>
    tpu.vector_store %arg18[%c0_78, %c0_79], %245 {strides = array<i32>} : memref<10x256xf32, #tpu.memory_space<vmem>>, vector<10x256xf32>,
    return
  }
  func.func @transform_0(%arg0: i32) -> (i32, i32) {
    %c0_i32 = arith.constant 0 : i32
    %c0_i32_0 = arith.constant 0 : i32
    return %c0_i32, %arg0 : i32, i32
  }
  func.func @transform_1(%arg0: i32) -> (i32, i32) {
    %c0_i32 = arith.constant 0 : i32
    %c0_i32_0 = arith.constant 0 : i32
    %c0_i32_1 = arith.constant 0 : i32
    return %c0_i32, %c0_i32_0 : i32, i32
  }
  func.func @transform_2(%arg0: i32) -> (i32, i32) {
    %c0_i32 = arith.constant 0 : i32
    %c0_i32_0 = arith.constant 0 : i32
    %c0_i32_1 = arith.constant 0 : i32
    return %c0_i32, %c0_i32_0 : i32, i32
  }
  func.func @transform_3(%arg0: i32) -> (i32, i32) {
    %c0_i32 = arith.constant 0 : i32
    %c0_i32_0 = arith.constant 0 : i32
    %c0_i32_1 = arith.constant 0 : i32
    return %c0_i32, %c0_i32_0 : i32, i32
  }
  func.func @transform_4(%arg0: i32) -> (i32, i32) {
    %c0_i32 = arith.constant 0 : i32
    %c0_i32_0 = arith.constant 0 : i32
    %c0_i32_1 = arith.constant 0 : i32
    return %c0_i32, %c0_i32_0 : i32, i32
  }
  func.func @transform_5(%arg0: i32) -> (i32, i32) {
    %c0_i32 = arith.constant 0 : i32
    %c0_i32_0 = arith.constant 0 : i32
    %c0_i32_1 = arith.constant 0 : i32
    return %c0_i32, %c0_i32_0 : i32, i32
  }
  func.func @transform_6(%arg0: i32) -> (i32, i32) {
    %c0_i32 = arith.constant 0 : i32
    %c0_i32_0 = arith.constant 0 : i32
    %c0_i32_1 = arith.constant 0 : i32
    return %c0_i32, %c0_i32_0 : i32, i32
  }
  func.func @transform_7(%arg0: i32) -> (i32, i32) {
    %c0_i32 = arith.constant 0 : i32
    %c0_i32_0 = arith.constant 0 : i32
    %c0_i32_1 = arith.constant 0 : i32
    return %c0_i32, %c0_i32_0 : i32, i32
  }
  func.func @transform_8(%arg0: i32) -> (i32, i32) {
    %c0_i32 = arith.constant 0 : i32
    %c0_i32_0 = arith.constant 0 : i32
    %c0_i32_1 = arith.constant 0 : i32
    return %c0_i32, %c0_i32_0 : i32, i32
  }
  func.func @transform_9(%arg0: i32) -> (i32, i32) {
    %c0_i32 = arith.constant 0 : i32
    %c0_i32_0 = arith.constant 0 : i32
    %c0_i32_1 = arith.constant 0 : i32
    return %c0_i32, %c0_i32_0 : i32, i32
  }
  func.func @transform_10(%arg0: i32) -> (i32, i32) {
    %c0_i32 = arith.constant 0 : i32
    %c0_i32_0 = arith.constant 0 : i32
    %c0_i32_1 = arith.constant 0 : i32
    return %c0_i32, %c0_i32_0 : i32, i32
  }
  func.func @transform_11(%arg0: i32) -> (i32, i32) {
    %c0_i32 = arith.constant 0 : i32
    %c0_i32_0 = arith.constant 0 : i32
    %c0_i32_1 = arith.constant 0 : i32
    return %c0_i32, %c0_i32_0 : i32, i32
  }
  func.func @transform_12(%arg0: i32) -> (i32, i32) {
    %c0_i32 = arith.constant 0 : i32
    %c0_i32_0 = arith.constant 0 : i32
    %c0_i32_1 = arith.constant 0 : i32
    return %c0_i32, %c0_i32_0 : i32, i32
  }
  func.func @transform_13(%arg0: i32) -> (i32, i32) {
    %c0_i32 = arith.constant 0 : i32
    %c0_i32_0 = arith.constant 0 : i32
    %c0_i32_1 = arith.constant 0 : i32
    return %c0_i32, %c0_i32_0 : i32, i32
  }
  func.func @transform_14(%arg0: i32) -> (i32, i32) {
    %c0_i32 = arith.constant 0 : i32
    %c0_i32_0 = arith.constant 0 : i32
    %c0_i32_1 = arith.constant 0 : i32
    return %c0_i32, %c0_i32_0 : i32, i32
  }
  func.func @transform_15(%arg0: i32) -> (i32, i32) {
    %c0_i32 = arith.constant 0 : i32
    %c0_i32_0 = arith.constant 0 : i32
    %c0_i32_1 = arith.constant 0 : i32
    return %c0_i32, %c0_i32_0 : i32, i32
  }
  func.func @transform_16(%arg0: i32) -> (i32, i32) {
    %c0_i32 = arith.constant 0 : i32
    %c0_i32_0 = arith.constant 0 : i32
    %c0_i32_1 = arith.constant 0 : i32
    return %c0_i32, %c0_i32_0 : i32, i32
  }
  func.func @transform_17(%arg0: i32) -> (i32, i32) {
    %c0_i32 = arith.constant 0 : i32
    %c0_i32_0 = arith.constant 0 : i32
    return %c0_i32, %arg0 : i32, i32
  }
}

</mosaic_0001>

<bundles_post_ra>
// kernel: tpu_custom_call.1
= control target key start
LH: loop header
LB: loop body
LE: loop exit
PB: predicated region body
PF: predicated region fallthrough
CT: control target
= control target key end

     0   :  { %s6241_s0 = inlined_call_operand.vmem [shape: f32[12,256], index: 0, kind: input, shape index: {}]   ;;  %s6242_s1 = inlined_call_operand.vmem [shape: f32[24,5], index: 1, kind: input, shape index: {}]   ;;  %s6243_s2 = inlined_call_operand.vmem [shape: f32[5,4], index: 2, kind: input, shape index: {}]   ;;  %s6244_s3 = inlined_call_operand.vmem [shape: f32[32,3], index: 3, kind: input, shape index: {}]   ;;  %s6245_s4 = inlined_call_operand.vmem [shape: f32[32,33], index: 4, kind: input, shape index: {}]   ;;  %s6246_s5 = inlined_call_operand.vmem [shape: f32[32,32], index: 5, kind: input, shape index: {}]   ;;  %s6247_s6 = inlined_call_operand.vmem [shape: f32[32,32], index: 6, kind: input, shape index: {}]   ;;  %s6248_s7 = inlined_call_operand.vmem [shape: f32[32,100], index: 7, kind: input, shape index: {}]   ;;  %s6249_s8 = inlined_call_operand.vmem [shape: f32[32,24], index: 8, kind: input, shape index: {}]   ;;  %s6250_s9 = inlined_call_operand.vmem [shape: f32[32,10], index: 9, kind: input, shape index: {}]   ;;  %s6251_s10 = inlined_call_operand.vmem [shape: f32[32,12], index: 10, kind: input, shape index: {}]   ;;  %s6252_s11 = inlined_call_operand.vmem [shape: f32[32,2], index: 11, kind: input, shape index: {}]   ;;  %s6253_s12 = inlined_call_operand.vmem [shape: f32[32,3], index: 12, kind: input, shape index: {}]   ;;  %s6254_s13 = inlined_call_operand.vmem [shape: f32[32,32], index: 13, kind: input, shape index: {}]   ;;  %s6255_s14 = inlined_call_operand.vmem [shape: f32[32,32], index: 14, kind: input, shape index: {}]   ;;  %s6256_s15 = inlined_call_operand.vmem [shape: f32[10,32], index: 15, kind: input, shape index: {}]   ;;  %s6257_s16 = inlined_call_operand.vmem [shape: f32[10,1], index: 16, kind: input, shape index: {}]   ;;  %s6258_s17 = inlined_call_operand.hbm [shape: f32[10,256], index: 17, kind: output, shape index: {}]  }
   0x1   :  { %6338 = sst [smem:[#allocation33_spill]] %s6241_s0 }
   0x2   :  { %6339 = sst [smem:[#allocation34_spill]] %s6242_s1 }
   0x3   :  { %v877_v0 = vld [vmem:[%s6244_s3] sm:$0xff]  ;;  %v6281_v1 = vmov 1   ;;  %v6279_v2 = vmov 0   ;;  %v878_v3 = vld [vmem:[%s6244_s3 + $0x8] sm:$0xff] }
   0x4   :  { %3706 = vset.pattern.permute.xlu1 %v6281_v1  ;;  %3705 = vset.pattern.permute.xlu0 %v6279_v2 }
   0x5   :  { %934 = vperm.xlu1 %3706, %v877_v0   ;;  %883 = vperm.xlu0 %3705, %v877_v0  }
   0x6   :  { %22 = vsyncpa [#allocation3], 0  ;;  %v879_v4 = vld [vmem:[%s6244_s3 + $0x10] sm:$0xff]  ;;  %v880_v5 = vld [vmem:[%s6244_s3 + $0x18] sm:$0xff]  ;;  %v6269_v6 = vmov 2   ;;  %s6340_s3 = sld [smem:[#allocation34_spill]]  ;;  %v79_v27 = vlaneseq }
   0x7   :  { %v3829_v10 = vmov 3   ;;  %v6283_v11 = vmov 0.0   ;;  %v1288_v12 = vld [vmem:[%s6243_s2] sm:$0x1f]  ;;  %v3831_v14 = vmov 32   ;;  %v3998_v15 = vld [vmem:[%s6245_s4 + $0x18] sm:$0xff] }
   0x8   :  { %1142 = vmatprep.mubr.f32.mxu1 %v6283_v11  ;;  %2114 = vmatprep.mubr.f32.mxu0 %v6283_v11  ;;  %v3991_v13 = vld [vmem:[%s6245_s4] sm:$0xff]  ;;  %v3832_v17 = vmov 4   ;;  %vm1735_vm2 = vcmp.lt.f32.partialorder %v1288_v12, 1.5  ;;  %v4021_v20 = vld [vmem:[%s6245_s4 + $0x8] sm:$0xff]  ;;  %v4027_v21 = vld [vmem:[%s6245_s4 + $0x10] sm:$0xff]  ;;  %vm1734_vm7 = vcmp.lt.f32.partialorder %v1288_v12, 0.5 }
   0x9   :  { %938 = vperm.xlu1 %3706, %v878_v3   ;;  %888 = vperm.xlu0 %3705, %v878_v3   ;;  %v1752_v19 = vsel %vm1735_vm2, 1, %v6279_v2  ;;  %v1761_v26 = vsel %vm1734_vm7, 1, %v6279_v2  ;;  %v4041_v29 = vshrl.u32 %v79_v27, 7  ;;  %s6342_s19 = sld [smem:[#allocation33_spill]]  ;;  %vm6335_vm8 = vcmask 261120   ;;  %s3839_s22 = smov 123  }
   0xa   :  { %s3842_s0 = smov [#allocation2]  }
   0xb   :  { %6341 = vst [vmem:[#allocation5_spill] sm:$0xff] %v4041_v29  ;;  %v951_v35 = vsub.s32 4, %v4041_v29  ;;  %v4057_v38 = vsub.s32 3, %v4041_v29  ;;  %s3343_s30 = sshll.u32 %s3842_s0, 4  ;;  %s3344_s30 = int_to_ptr.vmem [resolvable:$true] %s3343_s30 }
   0xc   :  { %v3957_v7 = vld [vmem:[%s6340_s3 + $0x8] sm:$0xff]  ;;  %v3964_v8 = vld [vmem:[%s6340_s3] sm:$0xff]  ;;  %v3971_v9 = vld [vmem:[%s6340_s3 + $0x10] sm:$0xff]  ;;  %p3807_p1 = scmp.lt.s32.totalorder %s3344_s30, %s3344_s30 }
   0xd   :  { %3707 = vset.pattern.permute.xlu1 %v6279_v2  ;;  %893 = vperm.xlu0 %3705, %v879_v4   ;;  %vm803_vm0 = vcmp.lt.f32.partialorder %v3957_v7, 1.5  ;;  %vm804_vm1 = vcmp.lt.f32.partialorder %v3971_v9, 1.5  ;;  %vm802_vm3 = vcmp.lt.f32.partialorder %v3964_v8, 1.5  ;;  %vm799_vm4 = vcmp.lt.f32.partialorder %v3964_v8, 0.5  ;;  %6343 = vst [vmem:[#allocation6_spill] sm:$0xff] %v4057_v38 }
   0xe   :  { %898 = vperm.xlu1 %3707, %v880_v5   ;;  %v830_v16 = vsel %vm803_vm0, 1, %v6279_v2  ;;  %v831_v18 = vsel %vm804_vm1, 1, %v6279_v2  ;;  %v829_v22 = vsel %vm802_vm3, 1, %v6279_v2  ;;  %v850_v23 = vsel %vm799_vm4, 1, %v6279_v2 }
   0xf   :  { %vm800_vm5 = vcmp.lt.f32.partialorder %v3957_v7, 0.5  ;;  %vm801_vm6 = vcmp.lt.f32.partialorder %v3971_v9, 0.5  ;;  %v4046_v31 = vld [vmem:[%s6342_s19] sm:$0xff]  ;;  %v4051_v32 = vld [vmem:[%s6342_s19 + $0x8] sm:$0xff] }
  0x10   :  { %v851_v24 = vsel %vm800_vm5, 1, %v6279_v2  ;;  %v852_v25 = vsel %vm801_vm6, 1, %v6279_v2  ;;  %v873_v33 = vrot.slane %v4046_v31, 2  ;;  %v874_v34 = vrot.slane %v4051_v32, 2 }
  0x11   :  { %3708 = vset.pattern.permute.xlu0 %v6281_v1  ;;  %v4060_v39 = vrot.slane %v4046_v31, %v951_v35  ;;  %v4063_v40 = vrot.slane %v4051_v32, %v951_v35  ;;  %v4075_v45 = vrot.slane %v4046_v31, %v4057_v38  ;;  %v4079_v46 = vrot.slane %v4051_v32, %v4057_v38 }
  0x12   :  { %3709 = vset.pattern.permute.xlu1 %v6281_v1  ;;  %942 = vperm.xlu0 %3708, %v879_v4   ;;  %v4065_v41 = vrot.slane %v873_v33, %v951_v35  ;;  %v4067_v42 = vrot.slane %v874_v34, %v951_v35  ;;  %v4082_v47 = vrot.slane %v873_v33, %v4057_v38 }
  0x13   :  { %946 = vperm.xlu1 %3709, %v880_v5   ;;  %v4085_v48 = vrot.slane %v874_v34, %v4057_v38 }
  0x16   :  { %3711 = vset.pattern.permute.xlu0 %v6269_v6 }
  0x17   :  { %3710 = vset.pattern.permute.xlu1 %v6269_v6  ;;  %1002 = vperm.xlu0 %3711, %v878_v3  }
  0x18   :  { %998 = vperm.xlu1 %3710, %v877_v0  }
  0x1b   :  { %3714 = vset.pattern.permute.xlu0 %v6281_v1 }
  0x1c   :  { %1006 = vperm.xlu1 %3710, %v879_v4   ;;  %98 = vperm.xlu0 %3714, %v3957_v7  }
  0x20   :  { %1010 = vperm.xlu1 %3710, %v880_v5   ;;  %3715 = vset.pattern.permute.xlu0 %v6279_v2 }
  0x21   :  { %66 = vperm.xlu0 %3715, %v3964_v8  }
  0x24   :  { %3712 = vset.pattern.permute.xlu1 %v6279_v2 }
  0x25   :  { %71 = vperm.xlu1 %3712, %v3957_v7   ;;  %76 = vperm.xlu0 %3715, %v3971_v9  }
  0x29   :  { %3713 = vset.pattern.permute.xlu1 %v6281_v1  ;;  %3719 = vset.pattern.permute.xlu0 %v3829_v10 }
  0x2a   :  { %94 = vperm.xlu1 %3713, %v3964_v8   ;;  %162 = vperm.xlu0 %3719, %v3957_v7  }
  0x2e   :  { %3716 = vset.pattern.permute.xlu1 %v6269_v6  ;;  %3722 = vset.pattern.permute.xlu0 %v6279_v2 }
  0x2f   :  { %126 = vperm.xlu1 %3716, %v3964_v8   ;;  %1291 = vperm.xlu0 %3722, %v1288_v12  }
  0x33   :  { %130 = vperm.xlu1 %3716, %v3957_v7   ;;  %3725 = vset.pattern.permute.xlu0 %v3831_v14 }
  0x34   :  { %1051 = vperm.xlu0 %3725, %v3991_v13  }
  0x37   :  { %3717 = vset.pattern.permute.xlu1 %v6281_v1 }
  0x38   :  { %102 = vperm.xlu1 %3717, %v3971_v9   ;;  %1066 = vperm.xlu0 %3725, %v3998_v15  }
  0x3c   :  { %3718 = vset.pattern.permute.xlu1 %v3829_v10  ;;  %3728 = vset.pattern.permute.xlu0 %v3832_v17 }
  0x3d   :  { %158 = vperm.xlu1 %3718, %v3964_v8   ;;  %836 = vperm.xlu0 %3728, %v830_v16  }
  0x41   :  { %3720 = vset.pattern.permute.xlu1 %v6269_v6  ;;  %839 = vperm.xlu0 %3728, %v831_v18  }
  0x42   :  { %134 = vperm.xlu1 %3720, %v3971_v9  }
  0x45   :  { %3729 = vset.pattern.permute.xlu0 %v3829_v10 }
  0x46   :  { %3721 = vset.pattern.permute.xlu1 %v3829_v10  ;;  %1754 = vperm.xlu0 %3729, %v1752_v19  }
  0x47   :  { %166 = vperm.xlu1 %3721, %v3971_v9  }
  0x4a   :  { %3734 = vset.pattern.permute.xlu0 %v6281_v1 }
  0x4b   :  { %3723 = vset.pattern.permute.xlu1 %v6281_v1  ;;  %v6296_v1 = vmov 1326507024  }
  0x4c   :  { %1299 = vperm.xlu1 %3723, %v1288_v12  }
  0x50   :  { %3724 = vset.pattern.permute.xlu1 %v6269_v6 }
  0x51   :  { %1311 = vperm.xlu1 %3724, %v1288_v12  }
  0x55   :  { %3726 = vset.pattern.permute.xlu1 %v3831_v14 }
  0x56   :  { %1056 = vperm.xlu1 %3726, %v4021_v20  }
  0x5a   :  { %1061 = vperm.xlu1 %3726, %v4027_v21  }
  0x5e   :  { %3727 = vset.pattern.permute.xlu1 %v3832_v17 }
  0x5f   :  { %833 = vperm.xlu1 %3727, %v829_v22  }
  0x63   :  { %854 = vperm.xlu1 %3727, %v850_v23  }
  0x67   :  { %857 = vperm.xlu1 %3727, %v851_v24  }
  0x6b   :  { %860 = vperm.xlu1 %3727, %v852_v25  }
  0x6f   :  { %3730 = vset.pattern.permute.xlu1 %v3829_v10 }
  0x70   :  { %1763 = vperm.xlu1 %3730, %v1761_v26  }
  0x74   :  { %3731 = vset.pattern.permute.xlu1 %v6279_v2 }
  0x84   :  { %v935_v28 = vpop.permute.xlu1 %934  ;;  %v884_v30 = vpop.permute.xlu0 %883 }
  0x85   :  { %v965_v49 = vmul.f32 %v4060_v39, %v935_v28  ;;  %v966_v50 = vmul.f32 %v4063_v40, %v935_v28  ;;  %v967_v51 = vmul.f32 %v4065_v41, %v935_v28  ;;  %v968_v52 = vmul.f32 %v4067_v42, %v935_v28 }
  0x86   :  { %v917_v58 = vmul.f32 %v4075_v45, %v884_v30  ;;  %v918_v59 = vmul.f32 %v4079_v46, %v884_v30  ;;  %v919_v60 = vmul.f32 %v4082_v47, %v884_v30  ;;  %v920_v61 = vmul.f32 %v4085_v48, %v884_v30 }
  0x88   :  { %v939_v36 = vpop.permute.xlu1 %938  ;;  %v889_v37 = vpop.permute.xlu0 %888  ;;  %v983_v9 = vadd.f32 %v967_v51, %v919_v60  ;;  %v984_v10 = vadd.f32 %v968_v52, %v920_v61  ;;  %v982_v12 = vadd.f32 %v966_v50, %v918_v59  ;;  %v981_v14 = vadd.f32 %v965_v49, %v917_v58 }
  0x89   :  { %v969_v53 = vmul.f32 %v4060_v39, %v939_v36  ;;  %v970_v54 = vmul.f32 %v4063_v40, %v939_v36  ;;  %v921_v55 = vmul.f32 %v4075_v45, %v889_v37  ;;  %v922_v56 = vmul.f32 %v4079_v46, %v889_v37 }
  0x8a   :  { %v971_v63 = vmul.f32 %v4065_v41, %v939_v36  ;;  %v923_v0 = vmul.f32 %v4082_v47, %v889_v37  ;;  %v972_v3 = vmul.f32 %v4067_v42, %v939_v36  ;;  %v924_v4 = vmul.f32 %v4085_v48, %v889_v37 }
  0x8b   :  { %v986_v5 = vadd.f32 %v970_v54, %v922_v56  ;;  %v985_v7 = vadd.f32 %v969_v53, %v921_v55 }
  0x8c   :  { %v4069_v43 = vpop.permute.xlu0 %893  ;;  %v987_v17 = vadd.f32 %v971_v63, %v923_v0  ;;  %v988_v24 = vadd.f32 %v972_v3, %v924_v4 }
  0x8d   :  { %v4071_v44 = vpop.permute.xlu1 %898  ;;  %v925_v27 = vmul.f32 %v4075_v45, %v4069_v43  ;;  %v926_v28 = vmul.f32 %v4079_v46, %v4069_v43  ;;  %v928_v49 = vmul.f32 %v4085_v48, %v4069_v43 }
  0x8e   :  { %v929_v50 = vmul.f32 %v4075_v45, %v4071_v44  ;;  %v930_v54 = vmul.f32 %v4079_v46, %v4071_v44  ;;  %v932_v0 = vmul.f32 %v4085_v48, %v4071_v44 }
  0x91   :  { %v943_v57 = vpop.permute.xlu0 %942 }
  0x92   :  { %v947_v62 = vpop.permute.xlu1 %946  ;;  %v974_v16 = vmul.f32 %v4063_v40, %v943_v57  ;;  %v973_v23 = vmul.f32 %v4060_v39, %v943_v57  ;;  %v976_v51 = vmul.f32 %v4067_v42, %v943_v57 }
  0x93   :  { %v977_v34 = vmul.f32 %v4060_v39, %v947_v62  ;;  %v978_v35 = vmul.f32 %v4063_v40, %v947_v62  ;;  %v980_v55 = vmul.f32 %v4067_v42, %v947_v62 }
  0x94   :  { %v990_v53 = vadd.f32 %v974_v16, %v926_v28  ;;  %v989_v58 = vadd.f32 %v973_v23, %v925_v27 }
  0x95   :  { %v993_v4 = vadd.f32 %v977_v34, %v929_v50  ;;  %v927_v50 = vmul.f32 %v4082_v47, %v4069_v43 }
  0x96   :  { %v1003_v8 = vpop.permute.xlu0 %1002 }
  0x97   :  { %v999_v18 = vpop.permute.xlu1 %998  ;;  %v4104_v19 = vadd.f32 %v1003_v8, %v986_v5  ;;  %v4106_v22 = vadd.f32 %v1003_v8, %v985_v7  ;;  %v4131_v56 = vadd.f32 %v1003_v8, %v988_v24  ;;  %v994_v5 = vadd.f32 %v978_v35, %v930_v54 }
  0x98   :  { %v4109_v25 = vadd.f32 %v999_v18, %v982_v12  ;;  %v4111_v26 = vadd.f32 %v999_v18, %v981_v14  ;;  %v4133_v59 = vadd.f32 %v999_v18, %v984_v10  ;;  %v931_v7 = vmul.f32 %v4082_v47, %v4071_v44 }
  0x99   :  { %6344 = vst [vmem:[#allocation7_spill] sm:$0xff] %v4104_v19  ;;  %6345 = vst [vmem:[#allocation8_spill] sm:$0xff] %v4106_v22  ;;  %v6275_v30 = vmax.f32 %v4104_v19, 0.0  ;;  %v6278_v33 = vmax.f32 %v4106_v22, 0.0  ;;  %v975_v10 = vmul.f32 %v4065_v41, %v943_v57  ;;  %v979_v12 = vmul.f32 %v4065_v41, %v947_v62 }
  0x9a   :  { %6346 = vst [vmem:[#allocation9_spill] sm:$0xff] %v4109_v25  ;;  %6347 = vst [vmem:[#allocation10_spill] sm:$0xff] %v4111_v26  ;;  %v6276_v36 = vmax.f32 %v4109_v25, 0.0  ;;  %v6277_v37 = vmax.f32 %v4111_v26, 0.0  ;;  %v992_v14 = vadd.f32 %v976_v51, %v928_v49  ;;  %v4153_v23 = vadd.f32 %v1003_v8, %v987_v17 }
  0x9b   :  { %v1007_v52 = vpop.permute.xlu1 %1006  ;;  %6348 = vst [vmem:[#allocation11_spill] sm:$0xff] %v4131_v56  ;;  %6349 = vst [vmem:[#allocation12_spill] sm:$0xff] %v4133_v59  ;;  %v996_v24 = vadd.f32 %v980_v55, %v932_v0  ;;  %v4159_v34 = vadd.f32 %v999_v18, %v983_v9  ;;  %v6265_v44 = vmax.f32 %v4133_v59, 0.0  ;;  %v6266_v57 = vmax.f32 %v4131_v56, 0.0 }
  0x9c   :  { %v4135_v60 = vadd.f32 %v1007_v52, %v990_v53  ;;  %v3504_v61 = vpack.c.bf16 %v6275_v30, %v6276_v36  ;;  %v3506_v63 = vpack.c.bf16 %v6278_v33, %v6277_v37  ;;  %v4147_v3 = vadd.f32 %v1007_v52, %v989_v58  ;;  %6352 = vst [vmem:[#allocation15_spill] sm:$0xff] %v4153_v23 }
  0x9d   :  { %6355 = vst [vmem:[#allocation18_spill] sm:$0xff] %v4159_v34  ;;  %v995_v51 = vadd.f32 %v979_v12, %v931_v7  ;;  %v4171_v9 = vadd.f32 %v1007_v52, %v992_v14  ;;  %v6267_v55 = vmax.f32 %v4153_v23, 0.0  ;;  %v6268_v58 = vmax.f32 %v4159_v34, 0.0  ;;  %v99_v12 = vpop.permute.xlu0 %98 }
  0x9e   :  { %6350 = vst [vmem:[#allocation13_spill] sm:$0xff] %v4135_v60  ;;  %6351 = vst [vmem:[#allocation14_spill] sm:$0xff] %v4147_v3  ;;  %3505 = vmatprep.subr.bf16.mxu1 %v3504_v61  ;;  %v6272_v35 = vmax.f32 %v4135_v60, 0.0  ;;  %v6273_v8 = vmax.f32 %v4147_v3, 0.0  ;;  %v991_v61 = vadd.f32 %v975_v10, %v927_v50  ;;  %v81_v7 = vsub.s32 0, %v4041_v29 }
  0x9f   :  { %v1011_v16 = vpop.permute.xlu1 %1010  ;;  %3507 = vmatpush1.bf16.msra.mxu1 %v3506_v63  ;;  %6357 = vst [vmem:[#allocation20_spill] sm:$0xff] %v4171_v9  ;;  %v3512_v63 = vpack.c.bf16 %v6266_v57, %v6265_v44  ;;  %v107_v10 = vsub.s32 1, %v4041_v29 }
  0xa0   :  { %v4155_v27 = vadd.f32 %v1011_v16, %v993_v4  ;;  %v4157_v28 = vadd.f32 %v1011_v16, %v994_v5  ;;  %v4164_v62 = vadd.f32 %v1011_v16, %v996_v24  ;;  %v4183_v43 = vadd.f32 %v1011_v16, %v995_v51 }
  0xa1   :  { %v4190_v4 = vadd.f32 %v1007_v52, %v991_v61  ;;  %v6261_v5 = vmax.f32 %v4171_v9, 0.0  ;;  %v3514_v16 = vpack.c.bf16 %v6267_v55, %v6268_v58  ;;  %v4209_v51 = vrot.slane %v4046_v31, %v81_v7 }
  0xa2   :  { %6353 = vst [vmem:[#allocation16_spill] sm:$0xff] %v4155_v27  ;;  %6354 = vst [vmem:[#allocation17_spill] sm:$0xff] %v4157_v28  ;;  %v6271_v49 = vmax.f32 %v4157_v28, 0.0  ;;  %v6274_v17 = vmax.f32 %v4155_v27, 0.0  ;;  %v6262_v0 = vmax.f32 %v4164_v62, 0.0  ;;  %v6263_v14 = vmax.f32 %v4183_v43, 0.0 }
  0xa3   :  { %6356 = vst [vmem:[#allocation19_spill] sm:$0xff] %v4164_v62  ;;  %6358 = vst [vmem:[#allocation21_spill] sm:$0xff] %v4183_v43  ;;  %v6264_v50 = vmax.f32 %v4190_v4, 0.0  ;;  %v139_v61 = vsub.s32 2, %v4041_v29 }
  0xa4   :  { %v3508_v18 = vpack.c.bf16 %v6271_v49, %v6272_v35  ;;  %v3510_v53 = vpack.c.bf16 %v6274_v17, %v6273_v8  ;;  %v72_v54 = vpop.permute.xlu1 %71  ;;  %6359 = vst [vmem:[#allocation22_spill] sm:$0xff] %v4190_v4  ;;  %v3516_v52 = vpack.c.bf16 %v6262_v0, %v6261_v5  ;;  %v4226_v5 = vrot.slane %v4051_v32, %v107_v10 }
  0xa5   :  { %v89_v0 = vmul.f32 %v4209_v51, %v72_v54  ;;  %v4232_v44 = vrot.slane %v4046_v31, %v139_v61  ;;  %v4241_v55 = vrot.slane %v4051_v32, %v139_v61 }
  0xa6   :  { %3509 = vmatprep.subr.bf16.mxu1 %v3508_v18  ;;  %v4212_v18 = vrot.slane %v4046_v31, %v107_v10  ;;  %v116_v10 = vmul.f32 %v4226_v5, %v99_v12 }
  0xa7   :  { %3511 = vmatpush1.bf16.msra.mxu1 %v3510_v53  ;;  %v3518_v53 = vpack.c.bf16 %v6263_v14, %v6264_v50 }
  0xa8   :  { %3513 = vmatprep.subr.bf16.mxu1 %v3512_v63  ;;  %v115_v14 = vmul.f32 %v4212_v18, %v99_v12 }
  0xa9   :  { %v95_v24 = vpop.permute.xlu1 %94 }
  0xaa   :  { %3378 = vmatmul.mubr.msk.f32.vlgmr.msra.gmra.mrb[0].mxu1 %vm6335_vm8, %v3991_v13  ;;  %v113_v50 = vmul.f32 %v4212_v18, %v95_v24  ;;  %v121_v58 = vadd.f32 %v115_v14, %v89_v0  ;;  %v114_v49 = vmul.f32 %v4226_v5, %v95_v24 }
  0xab   :  { %3515 = vmatpush1.bf16.msra.mxu1 %v3514_v16  ;;  %1148 = vmatprep.mubr.f32.mxu1 %v6283_v11  ;;  %v67_v16 = vpop.permute.xlu0 %66 }
  0xac   :  { %3517 = vmatprep.subr.bf16.mxu1 %v3516_v52  ;;  %v4223_v52 = vrot.slane %v4051_v32, %v81_v7  ;;  %v87_v57 = vmul.f32 %v4209_v51, %v67_v16 }
  0xae   :  { %3379 = vmatmul.mubr.msk.f32.gmra.mrb[2].mxu1 %vm6335_vm8, %v4021_v20  ;;  %v127_v63 = vpop.permute.xlu1 %126  ;;  %v90_v7 = vmul.f32 %v4223_v52, %v72_v54  ;;  %v88_v6 = vmul.f32 %v4223_v52, %v67_v16  ;;  %v119_v8 = vadd.f32 %v113_v50, %v87_v57 }
  0xaf   :  { %3519 = vmatpush1.bf16.msra.mxu1 %v3518_v53  ;;  %1154 = vmatprep.mubr.f32.mxu1 %v6283_v11  ;;  %v77_v31 = vpop.permute.xlu0 %76  ;;  %v145_v35 = vmul.f32 %v4232_v44, %v127_v63  ;;  %v146_v0 = vmul.f32 %v4241_v55, %v127_v63 }
  0xb0   :  { %v122_v54 = vadd.f32 %v116_v10, %v90_v7  ;;  %v120_v14 = vadd.f32 %v114_v49, %v88_v6 }
  0xb1   :  { %v151_v16 = vadd.f32 %v145_v35, %v119_v8 }
  0xb2   :  { %3380 = vmatmul.mubr.msk.f32.gmra.mrb[4].mxu1 %vm6335_vm8, %v4027_v21  ;;  %v131_v53 = vpop.permute.xlu1 %130  ;;  %v152_v36 = vadd.f32 %v146_v0, %v120_v14 }
  0xb3   :  { %1160 = vmatprep.mubr.f32.mxu1 %v6283_v11  ;;  %v147_v17 = vmul.f32 %v4232_v44, %v131_v53  ;;  %v148_v32 = vmul.f32 %v4241_v55, %v131_v53  ;;  %v163_v57 = vpop.permute.xlu0 %162 }
  0xb5   :  { %v153_v61 = vadd.f32 %v147_v17, %v121_v58  ;;  %v154_v24 = vadd.f32 %v148_v32, %v122_v54 }
  0xb6   :  { %3381 = vmatmul.mubr.msk.f32.gmra.mrb[6].mxu1 %vm6335_vm8, %v3998_v15 }
  0xb7   :  { %1231 = vmatprep.mubr.f32.mxu1 %v6283_v11  ;;  %v103_v12 = vpop.permute.xlu1 %102  ;;  %v4255_v30 = vadd.f32 %v163_v57, %v153_v61  ;;  %v4262_v6 = vadd.f32 %v163_v57, %v154_v24  ;;  %v92_v24 = vmul.f32 %v4223_v52, %v77_v31 }
  0xb8   :  { %v117_v32 = vmul.f32 %v4212_v18, %v103_v12 }
  0xb9   :  { %v490_v17 = vand.u32 2139095040, %v4262_v6 }
  0xba   :  { %3382 = vmatmul.mubr.msk.f32.vlgmr.msra.gmra.mrb[8].mxu1 %vm6335_vm8, %v3991_v13  ;;  %v386_v13 = vand.u32 2139095040, %v4255_v30 }
  0xbb   :  { %1237 = vmatprep.mubr.f32.mxu1 %v6283_v11  ;;  %v491_v10 = vshrl.u32 %v490_v17, 23 }
  0xbc   :  { %v159_v50 = vpop.permute.xlu1 %158 }
  0xbd   :  { %v4257_v7 = vadd.f32 %v159_v50, %v151_v16  ;;  %v4266_v49 = vadd.f32 %v159_v50, %v152_v36  ;;  %v3366_v0 = vadd.s32 4294967169, %v491_v10  ;;  %v6286_v50 = vand.u32 2147483647, %v4255_v30 }
  0xbe   :  { %3383 = vmatmul.mubr.msk.f32.gmra.mrb[10].mxu1 %vm6335_vm8, %v4021_v20  ;;  %v387_v20 = vshrl.u32 %v386_v13, 23 }
  0xbf   :  { %1243 = vmatprep.mubr.f32.mxu1 %v6283_v11  ;;  %v178_v35 = vand.u32 2139095040, %v4257_v7  ;;  %v282_v63 = vand.u32 2139095040, %v4266_v49  ;;  %v497_v13 = vadd.s32 1, %v3366_v0 }
  0xc0   :  { %v3362_v36 = vadd.s32 4294967169, %v387_v20  ;;  %v4284_v20 = vand.u32 8388607, %v6286_v50 }
  0xc1   :  { %v179_v8 = vshrl.u32 %v178_v35, 23  ;;  %v283_v54 = vshrl.u32 %v282_v63, 23  ;;  %v135_v14 = vpop.permute.xlu1 %134  ;;  %v6285_v63 = vand.u32 2147483647, %v4262_v6  ;;  %vm498_vm11 = vcmp.gt.s32.totalorder %v497_v13, 0 }
  0xc2   :  { %3384 = vmatmul.mubr.msk.f32.gmra.mrb[12].mxu1 %vm6335_vm8, %v4027_v21  ;;  %v91_v21 = vmul.f32 %v4209_v51, %v77_v31  ;;  %v393_v61 = vadd.s32 1, %v3362_v36  ;;  %v6287_v31 = vand.u32 2147483647, %v4257_v7 }
  0xc3   :  { %1249 = vmatprep.mubr.f32.mxu1 %v6283_v11  ;;  %v3354_v58 = vadd.s32 4294967169, %v179_v8  ;;  %v3358_v57 = vadd.s32 4294967169, %v283_v54  ;;  %v149_v8 = vmul.f32 %v4232_v44, %v135_v14 }
  0xc4   :  { %v123_v35 = vadd.f32 %v117_v32, %v91_v21  ;;  %vm394_vm10 = vcmp.gt.s32.totalorder %v393_v61, 0 }
  0xc5   :  { %v185_v53 = vadd.s32 1, %v3354_v58  ;;  %v289_v51 = vadd.s32 1, %v3358_v57  ;;  %v1292_v58 = vpop.permute.xlu0 %1291 }
  0xc6   :  { %3385 = vmatmul.mubr.msk.f32.gmra.mrb[14].mxu1 %vm6335_vm8, %v3998_v15  ;;  %v118_v15 = vmul.f32 %v4226_v5, %v103_v12  ;;  %v150_v5 = vmul.f32 %v4241_v55, %v135_v14  ;;  %v155_v52 = vadd.f32 %v149_v8, %v123_v35  ;;  %v395_v12 = vsel %vm394_vm10, %v393_v61, 0  ;;  %v167_v44 = vpop.permute.xlu1 %166 }
  0xc7   :  { %2442 = vmatprep.mubr.f32.mxu1 %v6283_v11  ;;  %vm186_vm9 = vcmp.gt.s32.totalorder %v185_v53, 0  ;;  %v4290_v10 = vmul.f32 %v1292_v58, %v4075_v45  ;;  %vm290_vm12 = vcmp.gt.s32.totalorder %v289_v51, 0  ;;  %v4293_v36 = vmul.f32 %v1292_v58, %v4079_v46 }
  0xc8   :  { %v187_v16 = vsel %vm186_vm9, %v185_v53, 0  ;;  %v124_v18 = vadd.f32 %v118_v15, %v92_v24  ;;  %v4296_v54 = vmul.f32 %v1292_v58, %v4082_v47  ;;  %v4299_v21 = vmul.f32 %v1292_v58, %v4085_v48 }
  0xc9   :  { %v189_v17 = vand.u32 31, %v187_v16  ;;  %v4301_v55 = vsel %vm498_vm11, %v497_v13, 0  ;;  %v4307_v45 = vand.u32 8388607, %v6285_v63  ;;  %v4309_v14 = vand.u32 31, %v395_v12 }
  0xca   :  { %v156_v46 = vadd.f32 %v150_v5, %v124_v18  ;;  %v4311_v61 = vadd.f32 %v167_v44, %v155_v52  ;;  %v182_v47 = vand.u32 8388607, %v6287_v31  ;;  %v188_v48 = vshrl.u32 %v187_v16, 5 }
  0xcb   :  { %v190_v53 = vsub.s32 32, %v189_v17  ;;  %v291_v57 = vsel %vm290_vm12, %v289_v51, 0  ;;  %v6304_v24 = vmov 683565275   ;;  %v6292_v35 = vmov 2475754826  }
  0xcc   :  { %v192_v15 = vshll.u32 %v6304_v24, %v189_v17  ;;  %v195_v8 = vshll.u32 %v6292_v35, %v189_v17  ;;  %v6288_v58 = vmov 2131351028   ;;  %v6290_v5 = vmov 2102212464  }
  0xcd   :  { %v193_v13 = vshrl.u32 %v6292_v35, %v190_v53  ;;  %v196_v37 = vshrl.u32 %v6288_v58, %v190_v53  ;;  %v198_v18 = vshll.u32 %v6288_v58, %v189_v17  ;;  %v199_v52 = vshrl.u32 %v6290_v5, %v190_v53 }
  0xce   :  { %v201_v33 = vshll.u32 %v6290_v5, %v189_v17  ;;  %v6294_v16 = vmov 920167782   ;;  %v205_v11 = vshrl.u32 %v6296_v1, %v190_v53  ;;  %v4325_v63 = vshrl.u32 %v395_v12, 5 }
  0xcf   :  { %v202_v51 = vshrl.u32 %v6294_v16, %v190_v53  ;;  %v204_v2 = vshll.u32 %v6294_v16, %v189_v17  ;;  %v4328_v50 = vsub.s32 32, %v4309_v14  ;;  %v4330_v31 = vadd.f32 %v167_v44, %v156_v46 }
  0xd0   :  { %v594_v0 = vand.u32 2139095040, %v4311_v61  ;;  %v4334_v58 = vand.u32 31, %v4301_v55  ;;  %v293_v5 = vand.u32 31, %v291_v57  ;;  %v183_v35 = vor.u32 8388608, %v182_v47 }
  0xd1   :  { %v191_v32 = vshrl.u32 %v6304_v24, %v190_v53  ;;  %v194_v17 = vor.u32 %v193_v13, %v192_v15  ;;  %v197_v16 = vor.u32 %v196_v37, %v195_v8  ;;  %v6360_v1 = vand.u32 2147483647, %v4266_v49 }
  0xd2   :  { %v4343_v38 = vshrl.u32 %v6304_v24, %v4328_v50  ;;  %v200_v44 = vor.u32 %v199_v52, %v198_v18  ;;  %v203_v46 = vor.u32 %v202_v51, %v201_v33  ;;  %v206_v29 = vor.u32 %v205_v11, %v204_v2 }
  0xd3   :  { %v4339_v12 = vand.u32 8388607, %v6360_v1  ;;  %vm207_vm13 = vcmp.lt.s32.totalorder %v188_v48, 1  ;;  %v4345_v9 = vshrl.u32 %v291_v57, 5  ;;  %v4347_v62 = vshrl.u32 %v594_v0, 23 }
  0xd4   :  { %v698_v53 = vand.u32 2139095040, %v4330_v31  ;;  %vm210_vm14 = vcmp.lt.s32.totalorder %v188_v48, 4  ;;  %v294_v37 = vsub.s32 32, %v293_v5  ;;  %vm209_vm15 = vcmp.lt.s32.totalorder %v188_v48, 3 }
  0xd5   :  { %v211_v47 = vsel %vm207_vm13, %v191_v32, %v194_v17  ;;  %v212_v1 = vsel %vm210_vm14, %v200_v44, 2102212464  ;;  %vm208_vm0 = vcmp.lt.s32.totalorder %v188_v48, 2  ;;  %v215_v13 = vsel %vm207_vm13, %v194_v17, %v197_v16 }
  0xd6   :  { %v213_v15 = vsel %vm209_vm15, %v197_v16, %v212_v1  ;;  %v223_v8 = vshll.u32 %v183_v35, 8  ;;  %v216_v24 = vsel %vm210_vm14, %v203_v46, 920167782  ;;  %v219_v18 = vsel %vm207_vm13, %v197_v16, %v200_v44 }
  0xd7   :  { %v220_v33 = vsel %vm210_vm14, %v206_v29, 1326507024  ;;  %v287_v2 = vor.u32 8388608, %v4339_v12  ;;  %v214_v11 = vsel %vm208_vm0, %v211_v47, %v213_v15  ;;  %v217_v57 = vsel %vm209_vm15, %v200_v44, %v216_v24 }
  0xd8   :  { %v221_v0 = vsel %vm209_vm15, %v203_v46, %v220_v33  ;;  %v6361_v52 = vmov 683565275   ;;  %v218_v43 = vsel %vm208_vm0, %v215_v13, %v217_v57  ;;  %v6362_v32 = vmov 2475754826  }
  0xd9   :  { %v295_v51 = vshrl.u32 %v6361_v52, %v294_v37  ;;  %v222_v4 = vsel %vm208_vm0, %v219_v18, %v221_v0  ;;  %v296_v59 = vshll.u32 %v6361_v52, %v293_v5  ;;  %v297_v56 = vshrl.u32 %v6362_v32, %v294_v37 }
  0xda   :  { %v4354_v48 = vmul.u32.u64.low %v223_v8, %v222_v4  ;;  %v4355_v1 = vmul.u32.u64.high %v223_v8, %v222_v4, %v4354_v48  ;;  %v4357_v35 = vmul.u32.u64.low %v223_v8, %v218_v43  ;;  %v4358_v17 = vmul.u32.u64.high %v223_v8, %v218_v43, %v4357_v35 }
  0xdb   :  { %v298_v29 = vor.u32 %v297_v56, %v296_v59  ;;  %v299_v16 = vshll.u32 %v6362_v32, %v293_v5  ;;  %v6363_v24 = vmov 2131351028   ;;  %v6364_v46 = vmov 2102212464  }
  0xdc   :  { %v300_v12 = vshrl.u32 %v6363_v24, %v294_v37  ;;  %v302_v44 = vshll.u32 %v6363_v24, %v293_v5  ;;  %v303_v47 = vshrl.u32 %v6364_v46, %v294_v37  ;;  %v305_v15 = vshll.u32 %v6364_v46, %v293_v5 }
  0xdd   :  { %v6365_v13 = vmov 920167782   ;;  %v230_v33 = vmul.u32 %v223_v8, %v214_v11  ;;  %v6366_v43 = vmov 1326507024   ;;  %vm311_vm1 = vcmp.lt.s32.totalorder %v4345_v9, 1 }
  0xde   :  { %v306_v18 = vshrl.u32 %v6365_v13, %v294_v37  ;;  %v308_v4 = vshll.u32 %v6365_v13, %v293_v5  ;;  %v301_v57 = vor.u32 %v300_v12, %v299_v16  ;;  %v309_v0 = vshrl.u32 %v6366_v43, %v294_v37  ;;  %v1300_v5 = vpop.permute.xlu1 %1299 }
  0xdf   :  { %vm232_vm2 = vc.u32 %v4355_v1, %v4357_v35  ;;  %v233_v56 = vadd.s32 1, %v4358_v17  ;;  %v304_v59 = vor.u32 %v303_v47, %v302_v44  ;;  %vm312_vm3 = vcmp.lt.s32.totalorder %v4345_v9, 2 }
  0xe0   :  { %v307_v48 = vor.u32 %v306_v18, %v305_v15  ;;  %v310_v23 = vor.u32 %v309_v0, %v308_v4  ;;  %vm313_vm4 = vcmp.lt.s32.totalorder %v4345_v9, 3  ;;  %vm314_vm5 = vcmp.lt.s32.totalorder %v4345_v9, 4 }
  0xe1   :  { %v234_v8 = vsel %vm232_vm2, %v233_v56, %v4358_v17  ;;  %v315_v37 = vsel %vm311_vm1, %v295_v51, %v298_v29  ;;  %v316_v11 = vsel %vm314_vm5, %v304_v59, 2102212464  ;;  %v319_v16 = vsel %vm311_vm1, %v298_v29, %v301_v57 }
  0xe2   :  { %v235_v12 = vadd.s32 %v234_v8, %v230_v33  ;;  %v317_v44 = vsel %vm313_vm4, %v301_v57, %v316_v11  ;;  %v320_v47 = vsel %vm314_vm5, %v307_v48, 920167782  ;;  %v323_v15 = vsel %vm311_vm1, %v301_v57, %v304_v59 }
  0xe3   :  { %v699_v18 = vshrl.u32 %v698_v53, 23  ;;  %v321_v4 = vsel %vm313_vm4, %v304_v59, %v320_v47  ;;  %v324_v17 = vsel %vm314_vm5, %v310_v23, 1326507024  ;;  %v327_v0 = vshll.u32 %v287_v2, 8 }
  0xe4   :  { %v1302_v51 = vmul.f32 %v1300_v5, %v4060_v39  ;;  %v236_v56 = vadd.s32 536870912, %v235_v12  ;;  %v322_v29 = vsel %vm312_vm3, %v319_v16, %v321_v4  ;;  %v325_v33 = vsel %vm313_vm4, %v307_v48, %v324_v17 }
  0xe5   :  { %v318_v8 = vsel %vm312_vm3, %v315_v37, %v317_v44  ;;  %v326_v53 = vsel %vm312_vm3, %v323_v15, %v325_v33  ;;  %v4396_v57 = vmul.u32.u64.low %v327_v0, %v322_v29  ;;  %v4397_v11 = vmul.u32.u64.high %v327_v0, %v322_v29, %v4396_v57 }
  0xe6   :  { %v1303_v23 = vmul.f32 %v1300_v5, %v4063_v40  ;;  %v4401_v39 = vshrl.u32 %v236_v56, 30  ;;  %v4403_v2 = vmul.u32.u64.low %v327_v0, %v326_v53  ;;  %v4404_v59 = vmul.u32.u64.high %v327_v0, %v326_v53, %v4403_v2 }
  0xe7   :  { %v3370_v16 = vadd.s32 4294967169, %v4347_v62  ;;  %v4407_v48 = vadd.s32 4294967169, %v699_v18  ;;  %v1304_v37 = vmul.f32 %v1300_v5, %v4065_v41  ;;  %v1305_v9 = vmul.f32 %v1300_v5, %v4067_v42 }
  0xe8   :  { %v238_v44 = vshll.u32 %v4401_v39, 30  ;;  %v334_v47 = vmul.u32 %v327_v0, %v318_v8  ;;  %v400_v15 = vshll.u32 %v6361_v52, %v4309_v14  ;;  %v401_v40 = vshrl.u32 %v6362_v32, %v4328_v50 }
  0xe9   :  { %v337_v4 = vadd.s32 1, %v4397_v11  ;;  %v403_v62 = vshll.u32 %v6362_v32, %v4309_v14  ;;  %v404_v18 = vshrl.u32 %v6363_v24, %v4328_v50  ;;  %v409_v41 = vshll.u32 %v6364_v46, %v4309_v14 }
  0xea   :  { %v4423_v42 = vsub.s32 %v235_v12, %v238_v44  ;;  %vm336_vm6 = vc.u32 %v4404_v59, %v4396_v57  ;;  %v406_v5 = vshll.u32 %v6363_v24, %v4309_v14  ;;  %v407_v17 = vshrl.u32 %v6364_v46, %v4328_v50  ;;  %v1312_v44 = vpop.permute.xlu1 %1311 }
  0xeb   :  { %v1306_v0 = vadd.f32 %v1302_v51, %v4290_v10  ;;  %v1307_v56 = vadd.f32 %v1303_v23, %v4293_v36  ;;  %v338_v29 = vsel %vm336_vm6, %v337_v4, %v4397_v11  ;;  %v410_v33 = vshrl.u32 %v6365_v13, %v4328_v50 }
  0xec   :  { %v1308_v12 = vadd.f32 %v1304_v37, %v4296_v54  ;;  %v241_v8 = vsub.s32 0, %v4423_v42  ;;  %v339_v53 = vadd.s32 %v338_v29, %v334_v47  ;;  %v412_v2 = vshll.u32 %v6365_v13, %v4309_v14 }
  0xed   :  { %v402_v34 = vor.u32 %v401_v40, %v400_v15  ;;  %v405_v28 = vor.u32 %v404_v18, %v403_v62  ;;  %v411_v60 = vor.u32 %v410_v33, %v409_v41  ;;  %v413_v10 = vshrl.u32 %v6366_v43, %v4328_v50 }
  0xee   :  { %v3355_v36 = vmin.u32 %v241_v8, %v4423_v42  ;;  %v340_v51 = vadd.s32 536870912, %v339_v53  ;;  %v408_v11 = vor.u32 %v407_v17, %v406_v5  ;;  %vm415_vm7 = vcmp.lt.s32.totalorder %v4325_v63, 1 }
  0xef   :  { %v1309_v54 = vadd.f32 %v1305_v9, %v4299_v21  ;;  %v414_v23 = vor.u32 %v413_v10, %v412_v2  ;;  %vm417_vm9 = vcmp.lt.s32.totalorder %v4325_v63, 3  ;;  %vm418_vm10 = vcmp.lt.s32.totalorder %v4325_v63, 4 }
  0xf0   :  { %v601_v14 = vadd.s32 1, %v3370_v16  ;;  %v4447_v37 = vadd.f32 %v1312_v44, %v1306_v0  ;;  %v4449_v47 = vadd.f32 %v1312_v44, %v1307_v56  ;;  %v243_v15 = vclz %v3355_v36 }
  0xf1   :  { %v4451_v50 = vshrl.u32 %v340_v51, 30  ;;  %vm416_vm11 = vcmp.lt.s32.totalorder %v4325_v63, 2  ;;  %v423_v40 = vsel %vm415_vm7, %v402_v34, %v405_v28  ;;  %v424_v21 = vsel %vm418_vm10, %v411_v60, 920167782 }
  0xf2   :  { %6367 = vst [vmem:[#allocation23_spill] sm:$0xff] %v4449_v47  ;;  %v3356_v9 = vadd.s32 4294967294, %v243_v15  ;;  %v425_v4 = vsel %vm417_vm9, %v408_v11, %v424_v21  ;;  %v427_v16 = vsel %vm415_vm7, %v405_v28, %v408_v11  ;;  %v428_v62 = vsel %vm418_vm10, %v414_v23, 1326507024 }
  0xf3   :  { %v4464_v18 = vadd.f32 %v1312_v44, %v1308_v12  ;;  %v4466_v41 = vadd.f32 %v1312_v44, %v1309_v54  ;;  %v342_v5 = vshll.u32 %v4451_v50, 30  ;;  %v420_v17 = vsel %vm418_vm10, %v408_v11, 2102212464 }
  0xf4   :  { %v231_v0 = vadd.s32 %v4357_v35, %v4355_v1  ;;  %vm3357_vm12 = vcmp.lt.s32.totalorder %v3356_v9, 0  ;;  %v429_v56 = vsel %vm417_vm9, %v411_v60, %v428_v62  ;;  %v6370_v29 = vor.u32 8388608, %v4284_v20 }
  0xf5   :  { %6368 = vst [vmem:[#allocation24_spill] sm:$0xff] %v4464_v18  ;;  %6369 = vst [vmem:[#allocation25_spill] sm:$0xff] %v4466_v41  ;;  %v246_v8 = vsel %vm3357_vm12, 0, %v3356_v9  ;;  %v4477_v12 = vsub.s32 %v339_v53, %v342_v5  ;;  %v426_v2 = vsel %vm416_vm11, %v423_v40, %v425_v4  ;;  %v430_v44 = vsel %vm416_vm11, %v427_v16, %v429_v56 }
  0xf6   :  { %v431_v33 = vshll.u32 %v6370_v29, 8  ;;  %v247_v10 = vsub.s32 32, %v246_v8  ;;  %v251_v36 = vsub.s32 4294967266, %v246_v8  ;;  %v419_v1 = vsel %vm415_vm7, %v4343_v38, %v402_v34 }
  0xf7   :  { %v421_v60 = vsel %vm417_vm9, %v405_v28, %v420_v17  ;;  %vm602_vm13 = vcmp.gt.s32.totalorder %v601_v14, 0  ;;  %v345_v20 = vsub.s32 0, %v4477_v12  ;;  %v1321_v51 = vand.u32 2139095040, %v4447_v37 }
  0xf8   :  { %v4489_v35 = vmul.u32.u64.low %v431_v33, %v430_v44  ;;  %v4490_v53 = vmul.u32.u64.high %v431_v33, %v430_v44, %v4489_v35  ;;  %v252_v11 = vadd.s32 127, %v251_v36  ;;  %v248_v15 = vshll.u32 %v4423_v42, %v246_v8 }
  0xf9   :  { %v4493_v54 = vmul.u32.u64.low %v431_v33, %v426_v2  ;;  %v4494_v23 = vmul.u32.u64.high %v431_v33, %v426_v2, %v4493_v54  ;;  %v249_v40 = vshrl.u32 %v231_v0, %v247_v10  ;;  %v3359_v38 = vmin.u32 %v345_v20, %v4477_v12 }
  0xfa   :  { %v422_v28 = vsel %vm416_vm11, %v419_v1, %v421_v60  ;;  %v1425_v34 = vand.u32 2139095040, %v4449_v47  ;;  %v1529_v21 = vand.u32 2139095040, %v4464_v18  ;;  %v1633_v9 = vand.u32 2139095040, %v4466_v41 }
  0xfb   :  { %v253_v4 = vshll.u32 %v252_v11, 23  ;;  %v4505_v16 = vshrl.u32 %v4301_v55, 5  ;;  %v502_v62 = vsub.s32 32, %v4334_v58  ;;  %v347_v5 = vclz %v3359_v38 }
  0xfc   :  { %v4510_v17 = vsel %vm602_vm13, %v601_v14, 0  ;;  %v4513_v63 = vadd.s32 1, %v4407_v48  ;;  %v438_v0 = vmul.u32 %v431_v33, %v422_v28  ;;  %vm440_vm14 = vc.u32 %v4490_v53, %v4493_v54 }
  0xfd   :  { %v1322_v56 = vshrl.u32 %v1321_v51, 23  ;;  %v250_v29 = vor.u32 %v249_v40, %v248_v15  ;;  %v3360_v8 = vadd.s32 4294967294, %v347_v5  ;;  %v441_v55 = vadd.s32 1, %v4494_v23 }
  0xfe   :  { %v1426_v2 = vshrl.u32 %v1425_v34, 23  ;;  %v1530_v44 = vshrl.u32 %v1529_v21, 23  ;;  %v4518_v10 = vshrl.u32 %v1633_v9, 23  ;;  %v254_v36 = vor.u32 4788187, %v253_v4 }
  0xff   :  { %vm3361_vm15 = vcmp.lt.s32.totalorder %v3360_v8, 0  ;;  %v442_v14 = vsel %vm440_vm14, %v441_v55, %v4494_v23  ;;  %v504_v48 = vshll.u32 %v6361_v52, %v4334_v58  ;;  %v505_v33 = vshrl.u32 %v6362_v32, %v502_v62 }
 0x100   :  { %v350_v1 = vsel %vm3361_vm15, 0, %v3360_v8  ;;  %v443_v60 = vadd.s32 %v442_v14, %v438_v0  ;;  %v507_v20 = vshll.u32 %v6362_v32, %v4334_v58  ;;  %v508_v35 = vshrl.u32 %v6363_v24, %v502_v62 }
 0x101   :  { %v257_v51 = vcvt.s32.f32 %v250_v29  ;;  %v355_v11 = vsub.s32 4294967266, %v350_v1  ;;  %v513_v15 = vshll.u32 %v6364_v46, %v4334_v58  ;;  %v514_v40 = vshrl.u32 %v6365_v13, %v502_v62 }
 0x102   :  { %v255_v23 = vand.u32 2147483647, %v254_v36  ;;  %v444_v38 = vadd.s32 536870912, %v443_v60  ;;  %v510_v28 = vshll.u32 %v6363_v24, %v4334_v58  ;;  %v511_v34 = vshrl.u32 %v6364_v46, %v502_v62 }
 0x103   :  { %vm706_vm0 = vcmp.gt.s32.totalorder %v4513_v63, 0  ;;  %v335_v21 = vadd.s32 %v4396_v57, %v4404_v59  ;;  %v351_v9 = vsub.s32 32, %v350_v1  ;;  %v516_v4 = vshll.u32 %v6365_v13, %v4334_v58 }
 0x104   :  { %v517_v5 = vshrl.u32 %v6366_v43, %v502_v62  ;;  %v3386_v0 = vadd.s32 4294967169, %v1322_v56  ;;  %v4539_v29 = vshrl.u32 %v444_v38, 30  ;;  %v506_v8 = vor.u32 %v505_v33, %v504_v48 }
 0x105   :  { %v509_v55 = vor.u32 %v508_v35, %v507_v20  ;;  %v3390_v36 = vadd.s32 4294967169, %v1426_v2  ;;  %v356_v14 = vadd.s32 127, %v355_v11  ;;  %v515_v42 = vor.u32 %v514_v40, %v513_v15 }
 0x106   :  { %vm519_vm1 = vcmp.lt.s32.totalorder %v4505_v16, 1  ;;  %vm177_vm2 = vcmp.lt.s32.totalorder %v4257_v7, 0  ;;  %v258_v3 = vmul.f32 %v257_v51, %v255_v23  ;;  %v446_v57 = vshll.u32 %v4539_v29, 30 }
 0x107   :  { %v512_v59 = vor.u32 %v511_v34, %v510_v28  ;;  %vm522_vm3 = vcmp.lt.s32.totalorder %v4505_v16, 4  ;;  %v352_v58 = vshll.u32 %v4477_v12, %v350_v1  ;;  %v353_v56 = vshrl.u32 %v335_v21, %v351_v9 }
 0x108   :  { %v518_v38 = vor.u32 %v517_v5, %v516_v4  ;;  %vm521_vm4 = vcmp.lt.s32.totalorder %v4505_v16, 3  ;;  %v4547_v48 = vsub.s32 %v443_v60, %v446_v57  ;;  %v503_v2 = vshrl.u32 %v6361_v52, %v502_v62 }
 0x109   :  { %vm520_vm5 = vcmp.lt.s32.totalorder %v4505_v16, 2  ;;  %v527_v33 = vsel %vm519_vm1, %v506_v8, %v509_v55  ;;  %v3394_v20 = vadd.s32 4294967169, %v1530_v44  ;;  %v6371_v35 = vand.u32 2147483647, %v4257_v7 }
 0x10a   :  { %v357_v12 = vshll.u32 %v356_v14, 23  ;;  %v524_v1 = vsel %vm522_vm3, %v512_v59, 2102212464  ;;  %v528_v60 = vsel %vm522_vm3, %v515_v42, 920167782  ;;  %v259_v62 = vxor.u32 2147483648, %v258_v3 }
 0x10b   :  { %vm4555_vm6 = vcmp.le.f32.partialorder %v6371_v35, 0.7853982  ;;  %v449_v11 = vsub.s32 0, %v4547_v48  ;;  %v529_v15 = vsel %vm521_vm4, %v512_v59, %v528_v60  ;;  %v531_v44 = vsel %vm519_vm1, %v509_v55, %v512_v59 }
 0x10c   :  { %v354_v40 = vor.u32 %v353_v56, %v352_v58  ;;  %v530_v23 = vsel %vm520_vm5, %v527_v33, %v529_v15  ;;  %v532_v28 = vsel %vm522_vm3, %v518_v38, 1326507024  ;;  %v6374_v34 = vor.u32 8388608, %v4307_v45 }
 0x10d   :  { %v3363_v9 = vmin.u32 %v449_v11, %v4547_v48  ;;  %v523_v4 = vsel %vm519_vm1, %v503_v2, %v506_v8  ;;  %v525_v5 = vsel %vm521_vm4, %v509_v55, %v524_v1  ;;  %v533_v14 = vsel %vm521_vm4, %v515_v42, %v532_v28 }
 0x10e   :  { %v535_v21 = vshll.u32 %v6374_v34, 8  ;;  %v358_v57 = vor.u32 4788187, %v357_v12  ;;  %v534_v59 = vsel %vm520_vm5, %v531_v44, %v533_v14  ;;  %v4588_v45 = vshrl.u32 %v4510_v17, 5 }
 0x10f   :  { %v707_v8 = vsel %vm706_vm0, %v4513_v63, 0  ;;  %v261_v55 = vsub.s32 4, %v4401_v39  ;;  %v451_v38 = vclz %v3363_v9  ;;  %v3398_v42 = vadd.s32 4294967169, %v4518_v10 }
 0x110   :  { %v4583_v58 = vmul.u32.u64.low %v535_v21, %v530_v23  ;;  %v4584_v56 = vmul.u32.u64.high %v535_v21, %v530_v23, %v4583_v58  ;;  %v526_v2 = vsel %vm520_vm5, %v523_v4, %v525_v5  ;;  %v1328_v12 = vadd.s32 1, %v3386_v0 }
 0x111   :  { %v4597_v33 = vmul.u32.u64.low %v535_v21, %v534_v59  ;;  %v4598_v35 = vmul.u32.u64.high %v535_v21, %v534_v59, %v4597_v33  ;;  %v1432_v1 = vadd.s32 1, %v3390_v36  ;;  %v1536_v60 = vadd.s32 1, %v3394_v20 }
 0x112   :  { %v3364_v11 = vadd.s32 4294967294, %v451_v38  ;;  %v260_v15 = vsel %vm177_vm2, %v259_v62, %v258_v3  ;;  %v359_v44 = vand.u32 2147483647, %v358_v57  ;;  %v361_v63 = vcvt.s32.f32 %v354_v40 }
 0x113   :  { %v545_v23 = vadd.s32 1, %v4584_v56  ;;  %v4604_v28 = vand.u32 31, %v4510_v17  ;;  %v262_v16 = vsel %vm177_vm2, %v261_v55, %v4401_v39  ;;  %vm281_vm7 = vcmp.lt.s32.totalorder %v4266_v49, 0 }
 0x114   :  { %vm3365_vm9 = vcmp.lt.s32.totalorder %v3364_v11, 0  ;;  %v542_v10 = vmul.u32 %v535_v21, %v526_v2  ;;  %v4610_v0 = vshrl.u32 %v707_v8, 5  ;;  %v1640_v36 = vadd.s32 1, %v3398_v42 }
 0x115   :  { %v454_v20 = vsel %vm3365_vm9, 0, %v3364_v11  ;;  %vm544_vm10 = vc.u32 %v4598_v35, %v4583_v58  ;;  %vm1329_vm11 = vcmp.gt.s32.totalorder %v1328_v12, 0  ;;  %vm1433_vm12 = vcmp.gt.s32.totalorder %v1432_v1, 0 }
 0x116   :  { %v263_v3 = vsel %vm4555_vm6, %v4257_v7, %v260_v15  ;;  %v459_v17 = vsub.s32 4294967266, %v454_v20  ;;  %vm1537_vm13 = vcmp.gt.s32.totalorder %v1536_v60, 0  ;;  %v264_v39 = vsel %vm4555_vm6, 0, %v262_v16 }
 0x117   :  { %v362_v62 = vmul.f32 %v361_v63, %v359_v44  ;;  %v546_v40 = vsel %vm544_vm10, %v545_v23, %v4584_v56  ;;  %v6375_v34 = vand.u32 2147483647, %v4266_v49  ;;  %v439_v9 = vadd.s32 %v4493_v54, %v4490_v53 }
 0x118   :  { %v455_v4 = vsub.s32 32, %v454_v20  ;;  %v460_v5 = vadd.s32 127, %v459_v17  ;;  %v547_v14 = vadd.s32 %v546_v40, %v542_v10  ;;  %v606_v57 = vsub.s32 32, %v4604_v28 }
 0x119   :  { %vm4622_vm14 = vcmp.le.f32.partialorder %v6375_v34, 0.7853982  ;;  %v4629_v59 = vand.u32 31, %v707_v8  ;;  %vm1641_vm15 = vcmp.gt.s32.totalorder %v1640_v36, 0  ;;  %3744 = vcosq.f32 %v263_v3 }
 0x11a   :  { %v1330_v51 = vsel %vm1329_vm11, %v1328_v12, 0  ;;  %3746 = vsinq.f32 %v263_v3  ;;  %v268_v56 = vadd.s32 3, %v264_v39  ;;  %v548_v55 = vadd.s32 536870912, %v547_v14 }
 0x11b   :  { %v4633_v38 = vsel %vm1433_vm12, %v1432_v1, 0  ;;  %v4636_v42 = vsel %vm1537_vm13, %v1536_v60, 0  ;;  %v363_v53 = vxor.u32 2147483648, %v362_v62  ;;  %v365_v54 = vsub.s32 4, %v4451_v50 }
 0x11c   :  { %vm385_vm0 = vcmp.lt.s32.totalorder %v4255_v30, 0  ;;  %v456_v8 = vshll.u32 %v4547_v48, %v454_v20  ;;  %v457_v2 = vshrl.u32 %v439_v9, %v455_v4  ;;  %v461_v33 = vshll.u32 %v460_v5, 23 }
 0x11d   :  { %v4641_v11 = vshrl.u32 %v548_v55, 30  ;;  %v4644_v12 = vsub.s32 32, %v4629_v59  ;;  %v4646_v15 = vshrl.u32 %v1330_v51, 5  ;;  %v4648_v1 = vand.u32 31, %v1330_v51 }
 0x11e   :  { %v4651_v60 = vsel %vm1641_vm15, %v1640_v36, 0  ;;  %v4654_v44 = vand.u32 31, %v4633_v38  ;;  %v4657_v63 = vand.u32 31, %v4636_v42  ;;  %v4659_v48 = vand.u32 3, %v268_v56 }
 0x11f   :  { %v550_v23 = vshll.u32 %v4641_v11, 30  ;;  %v364_v16 = vsel %vm281_vm7, %v363_v53, %v362_v62  ;;  %v366_v10 = vsel %vm281_vm7, %v365_v54, %v4451_v50  ;;  %v469_v36 = vsub.s32 4, %v4539_v29 }
 0x120   :  { %v458_v3 = vor.u32 %v457_v2, %v456_v8  ;;  %v462_v17 = vor.u32 4788187, %v461_v33  ;;  %v608_v40 = vshll.u32 %v6361_v52, %v4604_v28  ;;  %v609_v34 = vshrl.u32 %v6362_v32, %v606_v57 }
 0x121   :  { %v4669_v39 = vsub.s32 %v547_v14, %v550_v23  ;;  %v611_v62 = vshll.u32 %v6362_v32, %v4604_v28  ;;  %v612_v9 = vshrl.u32 %v6363_v24, %v606_v57  ;;  %v614_v50 = vshll.u32 %v6363_v24, %v4604_v28 }
 0x122   :  { %vm274_vm1 = vcmp.eq.s32.totalorder %v4659_v48, 2  ;;  %v615_v5 = vshrl.u32 %v6364_v46, %v606_v57  ;;  %v617_v14 = vshll.u32 %v6364_v46, %v4604_v28  ;;  %v618_v51 = vshrl.u32 %v6365_v13, %v606_v57 }
 0x123   :  { %v553_v4 = vsub.s32 0, %v4669_v39  ;;  %v3745_v56 = vpop.eup %3744  ;;  %vm271_vm2 = vcmp.eq.s32.totalorder %v4659_v48, 0  ;;  %v367_v55 = vsel %vm4622_vm14, %v4266_v49, %v364_v16  ;;  %v368_v53 = vsel %vm4622_vm14, 0, %v366_v10 }
 0x124   :  { %v6378_v54 = vand.u32 2147483647, %v4255_v30  ;;  %v620_v2 = vshll.u32 %v6365_v13, %v4604_v28  ;;  %v621_v33 = vshrl.u32 %v6366_v43, %v606_v57  ;;  %v3747_v23 = vpop.eup %3746  ;;  %v463_v20 = vand.u32 2147483647, %v462_v17 }
 0x125   :  { %v465_v27 = vcvt.s32.f32 %v458_v3  ;;  %v3367_v19 = vmin.u32 %v553_v4, %v4669_v39  ;;  %v6381_v16 = vand.u32 2147483647, %v4311_v61  ;;  %v470_v10 = vsel %vm385_vm0, %v469_v36, %v4539_v29 }
 0x126   :  { %vm4693_vm3 = vcmp.le.f32.partialorder %v6378_v54, 0.7853982  ;;  %v607_v54 = vshrl.u32 %v6361_v52, %v606_v57  ;;  %v610_v25 = vor.u32 %v609_v34, %v608_v40  ;;  %v613_v26 = vor.u32 %v612_v9, %v611_v62 }
 0x127   :  { %v598_v21 = vand.u32 8388607, %v6381_v16  ;;  %vm270_vm4 = vcmp.lt.s32.totalorder %v4659_v48, 2  ;;  %v555_v28 = vclz %v3367_v19  ;;  %v616_v22 = vor.u32 %v615_v5, %v614_v50 }
 0x128   :  { %v619_v41 = vor.u32 %v618_v51, %v617_v14  ;;  %vm623_vm5 = vcmp.lt.s32.totalorder %v4588_v45, 1  ;;  %v272_v3 = vxor.u32 2147483648, %v3747_v23  ;;  %v275_v17 = vxor.u32 2147483648, %v3745_v56 }
 0x129   :  { %3748 = vcosq.f32 %v367_v55  ;;  %v622_v4 = vor.u32 %v621_v33, %v620_v2  ;;  %v466_v16 = vmul.f32 %v465_v27, %v463_v20  ;;  %v3368_v18 = vadd.s32 4294967294, %v555_v28 }
 0x12a   :  { %v599_v47 = vor.u32 8388608, %v598_v21  ;;  %vm624_vm6 = vcmp.lt.s32.totalorder %v4588_v45, 2  ;;  %vm267_vm7 = vweird.f32 %v4257_v7  ;;  %vm625_vm9 = vcmp.lt.s32.totalorder %v4588_v45, 3 }
 0x12b   :  { %vm626_vm10 = vcmp.lt.s32.totalorder %v4588_v45, 4  ;;  %v627_v19 = vsel %vm623_vm5, %v607_v54, %v610_v25  ;;  %v631_v29 = vsel %vm623_vm5, %v610_v25, %v613_v26  ;;  %vm3369_vm11 = vcmp.lt.s32.totalorder %v3368_v18, 0 }
 0x12c   :  { %v628_v57 = vsel %vm626_vm10, %v616_v22, 2102212464  ;;  %v632_v36 = vsel %vm626_vm10, %v619_v41, 920167782  ;;  %v635_v27 = vsel %vm623_vm5, %v613_v26, %v616_v22  ;;  %v4719_v20 = vsel %vm3369_vm11, 0, %v3368_v18 }
 0x12d   :  { %v629_v40 = vsel %vm625_vm9, %v613_v26, %v628_v57  ;;  %v633_v34 = vsel %vm625_vm9, %v616_v22, %v632_v36  ;;  %v636_v62 = vsel %vm626_vm10, %v622_v4, 1326507024  ;;  %3750 = vsinq.f32 %v367_v55 }
 0x12e   :  { %v372_v9 = vadd.s32 3, %v368_v53  ;;  %v467_v50 = vxor.u32 2147483648, %v466_v16  ;;  %v472_v25 = vsel %vm4693_vm3, 0, %v470_v10  ;;  %v276_v5 = vsel %vm274_vm1, %v275_v17, %v3747_v23 }
 0x12f   :  { %v634_v18 = vsel %vm624_vm6, %v631_v29, %v633_v34  ;;  %v637_v14 = vsel %vm625_vm9, %v619_v41, %v636_v62  ;;  %v639_v26 = vshll.u32 %v599_v47, 8  ;;  %v273_v22 = vsel %vm271_vm2, %v3745_v56, %v272_v3 }
 0x130   :  { %v563_v51 = vsub.s32 4294967266, %v4719_v20  ;;  %v630_v55 = vsel %vm624_vm6, %v627_v19, %v629_v40  ;;  %v638_v53 = vsel %vm624_vm6, %v635_v27, %v637_v14  ;;  %v4748_v47 = vshrl.u32 %v4633_v38, 5 }
 0x131   :  { %v4740_v2 = vmul.u32.u64.low %v639_v26, %v638_v53  ;;  %v4741_v33 = vmul.u32.u64.high %v639_v26, %v638_v53, %v4740_v2  ;;  %v4743_v23 = vmul.u32.u64.low %v639_v26, %v634_v18  ;;  %v4744_v21 = vmul.u32.u64.high %v639_v26, %v634_v18, %v4743_v23 }
 0x132   :  { %v4751_v41 = vshrl.u32 %v4636_v42, 5  ;;  %v4754_v56 = vand.u32 31, %v4651_v60  ;;  %v468_v45 = vsel %vm385_vm0, %v467_v50, %v466_v16  ;;  %v4761_v54 = vshrl.u32 %v4651_v60, 5 }
 0x133   :  { %v4758_v10 = vpop.eup %3748  ;;  %v277_v28 = vsel %vm270_vm4, %v273_v22, %v276_v5  ;;  %v4765_v3 = vand.u32 3, %v372_v9  ;;  %v476_v38 = vadd.s32 3, %v472_v25  ;;  %v4768_v42 = vsub.s32 32, %v4648_v1 }
 0x134   :  { %v4771_v17 = vsub.s32 32, %v4654_v44  ;;  %v564_v4 = vadd.s32 127, %v563_v51  ;;  %v646_v19 = vmul.u32 %v639_v26, %v630_v55  ;;  %v4774_v16 = vsub.s32 32, %v4657_v63  ;;  %v4812_v55 = vpop.permute.xlu1 %1056 }
 0x135   :  { %v471_v60 = vsel %vm4693_vm3, %v4255_v30, %v468_v45  ;;  %vm648_vm12 = vc.u32 %v4741_v33, %v4743_v23  ;;  %v649_v48 = vadd.s32 1, %v4744_v21  ;;  %v4783_v29 = vsub.s32 32, %v4754_v56 }
 0x136   :  { %v4787_v57 = vsel %vm267_vm7, nan, %v277_v28  ;;  %v543_v36 = vadd.s32 %v4583_v58, %v4598_v35  ;;  %v559_v27 = vsub.s32 32, %v4719_v20  ;;  %vm378_vm13 = vcmp.eq.s32.totalorder %v4765_v3, 2 }
 0x137   :  { %v379_v8 = vxor.u32 2147483648, %v4758_v10  ;;  %v4794_v40 = vand.u32 3, %v476_v38  ;;  %v650_v34 = vsel %vm648_vm12, %v649_v48, %v4744_v21  ;;  %v3751_v62 = vpop.eup %3750  ;;  %vm375_vm14 = vcmp.eq.s32.totalorder %v4765_v3, 0 }
 0x138   :  { %3752 = vcosq.f32 %v471_v60  ;;  %v565_v9 = vshll.u32 %v564_v4, 23  ;;  %v651_v50 = vadd.s32 %v650_v34, %v646_v19  ;;  %v6326_v25 = vand.u32 2147483647, %v4330_v31 }
 0x139   :  { %vm811_vm15 = vcmp.lt.f32.partialorder %v4787_v57, 0.0  ;;  %v712_v58 = vshll.u32 %v6361_v52, %v4629_v59  ;;  %v713_v35 = vshrl.u32 %v6362_v32, %v4644_v12  ;;  %v715_v5 = vshll.u32 %v6362_v32, %v4629_v59 }
 0x13a   :  { %v716_v18 = vshrl.u32 %v6363_v24, %v4644_v12  ;;  %v560_v14 = vshll.u32 %v4669_v39, %v4719_v20  ;;  %v561_v26 = vshrl.u32 %v543_v36, %v559_v27  ;;  %v652_v22 = vadd.s32 536870912, %v651_v50 }
 0x13b   :  { %v718_v51 = vshll.u32 %v6363_v24, %v4629_v59  ;;  %vm374_vm0 = vcmp.lt.s32.totalorder %v4765_v3, 2  ;;  %v719_v53 = vshrl.u32 %v6364_v46, %v4644_v12  ;;  %v721_v2 = vshll.u32 %v6364_v46, %v4629_v59 }
 0x13c   :  { %v722_v21 = vshrl.u32 %v6365_v13, %v4644_v12  ;;  %v724_v39 = vshll.u32 %v6365_v13, %v4629_v59  ;;  %3754 = vsinq.f32 %v471_v60  ;;  %v573_v20 = vsub.s32 4, %v4641_v11 }
 0x13d   :  { %v4824_v45 = vshrl.u32 %v652_v22, 30  ;;  %v702_v28 = vand.u32 8388607, %v6326_v25  ;;  %vm489_vm1 = vcmp.lt.s32.totalorder %v4262_v6, 0  ;;  %v566_v38 = vor.u32 4788187, %v565_v9 }
 0x13e   :  { %v714_v4 = vor.u32 %v713_v35, %v712_v58  ;;  %v717_v19 = vor.u32 %v716_v18, %v715_v5  ;;  %v725_v48 = vshrl.u32 %v6366_v43, %v4644_v12  ;;  %vm371_vm2 = vweird.f32 %v4266_v49 }
 0x13f   :  { %v376_v36 = vxor.u32 2147483648, %v3751_v62  ;;  %vm805_vm3 = vcmp.gt.f32.partialorder %v4787_v57, 0.0  ;;  %v562_v59 = vor.u32 %v561_v26, %v560_v14  ;;  %v654_v60 = vshll.u32 %v4824_v45, 30 }
 0x140   :  { %v723_v27 = vor.u32 %v722_v21, %v721_v2  ;;  %v380_v34 = vsel %vm378_vm13, %v379_v8, %v3751_v62  ;;  %v720_v22 = vor.u32 %v719_v53, %v718_v51  ;;  %v726_v25 = vor.u32 %v725_v48, %v724_v39  ;;  %v4849_v8 = vpop.permute.xlu1 %1061 }
 0x141   :  { %vm727_vm4 = vcmp.lt.s32.totalorder %v4610_v0, 1  ;;  %v6382_v9 = vand.u32 2147483647, %v4262_v6  ;;  %v4843_v35 = vsub.s32 %v651_v50, %v654_v60  ;;  %v711_v5 = vshrl.u32 %v6361_v52, %v4644_v12  ;;  %6385 = vst [vmem:[#allocation26_spill] sm:$0xff] %v4849_v8 }
 0x142   :  { %vm729_vm6 = vcmp.lt.s32.totalorder %v4610_v0, 3  ;;  %vm730_vm7 = vcmp.lt.s32.totalorder %v4610_v0, 4  ;;  %v567_v62 = vand.u32 2147483647, %v566_v38  ;;  %v703_v18 = vor.u32 8388608, %v702_v28  ;;  %v3753_v26 = vpop.eup %3752 }
 0x143   :  { %vm4839_vm5 = vcmp.le.f32.partialorder %v6382_v9, 0.7853982  ;;  %vm728_vm9 = vcmp.lt.s32.totalorder %v4610_v0, 2  ;;  %v735_v14 = vsel %vm727_vm4, %v714_v4, %v717_v19  ;;  %v569_v51 = vcvt.s32.f32 %v562_v59 }
 0x144   :  { %v657_v50 = vsub.s32 0, %v4843_v35  ;;  %v732_v53 = vsel %vm730_vm7, %v720_v22, 2102212464  ;;  %v736_v2 = vsel %vm730_vm7, %v723_v27, 920167782  ;;  %v377_v12 = vsel %vm375_vm14, %v4758_v10, %v376_v36 }
 0x145   :  { %v737_v21 = vsel %vm729_vm6, %v720_v22, %v736_v2  ;;  %v739_v39 = vsel %vm727_vm4, %v717_v19, %v720_v22  ;;  %v740_v28 = vsel %vm730_vm7, %v726_v25, 1326507024  ;;  %v6386_v38 = vmov 0.0  }
 0x146   :  { %v817_v48 = vsel %vm811_vm15, -1.0, %v6386_v38  ;;  %v3371_v59 = vmin.u32 %v657_v50, %v4843_v35  ;;  %v738_v60 = vsel %vm728_vm9, %v735_v14, %v737_v21  ;;  %v741_v9 = vsel %vm729_vm6, %v723_v27, %v740_v28  ;;  %v3755_v2 = vpop.eup %3754  ;;  %v4881_v21 = vpop.permute.xlu1 %833 }
 0x147   :  { %v731_v10 = vsel %vm727_vm4, %v711_v5, %v714_v4  ;;  %v733_v36 = vsel %vm729_vm6, %v717_v19, %v732_v53  ;;  %v742_v25 = vsel %vm728_vm9, %v739_v39, %v741_v9  ;;  %v743_v22 = vshll.u32 %v703_v18, 8 }
 0x148   :  { %v381_v50 = vsel %vm374_vm0, %v377_v12, %v380_v34  ;;  %v570_v8 = vmul.f32 %v569_v51, %v567_v62  ;;  %v574_v14 = vsel %vm489_vm1, %v573_v20, %v4641_v11  ;;  %v659_v27 = vclz %v3371_v59 }
 0x149   :  { %v4883_v4 = vmul.u32.u64.low %v743_v22, %v742_v25  ;;  %v4884_v5 = vmul.u32.u64.high %v743_v22, %v742_v25, %v4883_v4  ;;  %v4886_v19 = vmul.u32.u64.low %v743_v22, %v738_v60  ;;  %v4887_v53 = vmul.u32.u64.high %v743_v22, %v738_v60, %v4886_v19 }
 0x14a   :  { %vm841_vm10 = vcmp.eq.s32.totalorder %v4881_v21, 1  ;;  %vm478_vm11 = vcmp.lt.s32.totalorder %v4794_v40, 2  ;;  %v3372_v3 = vadd.s32 4294967294, %v659_v27  ;;  %v734_v34 = vsel %vm728_vm9, %v731_v10, %v733_v36 }
 0x14b   :  { %v4896_v11 = vsel %vm371_vm2, nan, %v381_v50  ;;  %v823_v20 = vsel %vm805_vm3, 1.0, %v817_v48  ;;  %vm479_vm12 = vcmp.eq.s32.totalorder %v4794_v40, 0  ;;  %v576_v62 = vsel %vm4839_vm5, 0, %v574_v14 }
 0x14c   :  { %v480_v18 = vxor.u32 2147483648, %v3755_v2  ;;  %v483_v51 = vxor.u32 2147483648, %v3753_v26  ;;  %v647_v12 = vadd.s32 %v4743_v23, %v4741_v33  ;;  %vm3373_vm13 = vcmp.lt.s32.totalorder %v3372_v3, 0 }
 0x14d   :  { %vm475_vm14 = vweird.f32 %v4255_v30  ;;  %vm482_vm15 = vcmp.eq.s32.totalorder %v4794_v40, 2  ;;  %v571_v0 = vxor.u32 2147483648, %v570_v8  ;;  %v662_v39 = vsel %vm3373_vm13, 0, %v3372_v3 }
 0x14e   :  { %v750_v28 = vmul.u32 %v743_v22, %v734_v34  ;;  %v663_v59 = vsub.s32 32, %v662_v39  ;;  %v664_v48 = vshll.u32 %v4843_v35, %v662_v39  ;;  %v667_v60 = vsub.s32 4294967266, %v662_v39 }
 0x14f   :  { %vm752_vm0 = vc.u32 %v4884_v5, %v4886_v19  ;;  %vm812_vm2 = vcmp.lt.f32.partialorder %v4896_v11, 0.0  ;;  %v4914_v33 = vsel %vm841_vm10, %v4787_v57, %v823_v20  ;;  %v580_v23 = vadd.s32 3, %v576_v62 }
 0x150   :  { %v753_v9 = vadd.s32 1, %v4887_v53  ;;  %v481_v10 = vsel %vm479_vm12, %v3753_v26, %v480_v18  ;;  %v484_v36 = vsel %vm482_vm15, %v483_v51, %v3755_v2  ;;  %v665_v25 = vshrl.u32 %v647_v12, %v663_v59 }
 0x151   :  { %v668_v35 = vadd.s32 127, %v667_v60  ;;  %v572_v22 = vsel %vm489_vm1, %v571_v0, %v570_v8  ;;  %v6329_v14 = vand.u32 2147483647, %v4447_v37  ;;  %v1335_v57 = vshll.u32 %v6361_v52, %v4648_v1  ;;  %v4954_v60 = vpop.permute.xlu1 %854 }
 0x152   :  { %v754_v50 = vsel %vm752_vm0, %v753_v9, %v4887_v53  ;;  %v666_v27 = vor.u32 %v665_v25, %v664_v48  ;;  %v1336_v34 = vshrl.u32 %v6362_v32, %v4768_v42  ;;  %vm806_vm3 = vcmp.gt.f32.partialorder %v4896_v11, 0.0  ;;  %v4935_v53 = vpop.permute.xlu0 %1051 }
 0x153   :  { %v669_v4 = vshll.u32 %v668_v35, 23  ;;  %v755_v3 = vadd.s32 %v754_v50, %v750_v28  ;;  %v818_v26 = vsel %vm812_vm2, -1.0, %v6386_v38  ;;  %v1338_v8 = vshll.u32 %v6362_v32, %v4648_v1 }
 0x154   :  { %v1339_v2 = vshrl.u32 %v6363_v24, %v4768_v42  ;;  %v485_v20 = vsel %vm478_vm11, %v481_v10, %v484_v36  ;;  %v575_v62 = vsel %vm4839_vm5, %v4262_v6, %v572_v22  ;;  %v1325_v12 = vand.u32 8388607, %v6329_v14 }
 0x155   :  { %v670_v18 = vor.u32 4788187, %v669_v4  ;;  %v756_v51 = vadd.s32 536870912, %v755_v3  ;;  %v1341_v0 = vshll.u32 %v6363_v24, %v4648_v1  ;;  %v1342_v39 = vshrl.u32 %v6364_v46, %v4768_v42 }
 0x156   :  { %v1344_v28 = vshll.u32 %v6364_v46, %v4648_v1  ;;  %v673_v40 = vcvt.s32.f32 %v666_v27  ;;  %v1337_v48 = vor.u32 %v1336_v34, %v1335_v57  ;;  %v1345_v58 = vshrl.u32 %v6365_v13, %v4768_v42 }
 0x157   :  { %v4950_v59 = vshrl.u32 %v756_v51, 30  ;;  %v671_v9 = vand.u32 2147483647, %v670_v18  ;;  %v1340_v10 = vor.u32 %v1339_v2, %v1338_v8  ;;  %v1347_v36 = vshll.u32 %v6365_v13, %v4648_v1  ;;  %v4969_v1 = vpop.permute.xlu0 %1066  ;;  %v2475_v2 = vld [vmem:[%s6250_s9] sm:$0xff] }
 0x158   :  { %v1348_v25 = vshrl.u32 %v6366_v43, %v4768_v42  ;;  %vm862_vm1 = vcmp.eq.s32.totalorder %v4954_v60, 1  ;;  %v4963_v35 = vsel %vm475_vm14, nan, %v485_v20  ;;  %vm593_vm4 = vcmp.lt.s32.totalorder %v4311_v61, 0  ;;  %6387 = vst [vmem:[#allocation27_spill] sm:$0xff] %v4969_v1  ;;  %2596 = vrot.lane.b32.xlu1 %v2475_v2, %s3839_s22 }
 0x159   :  { %v758_v22 = vshll.u32 %v4950_v59, 30  ;;  %v1346_v50 = vor.u32 %v1345_v58, %v1344_v28  ;;  %vm1350_vm5 = vcmp.lt.s32.totalorder %v4646_v15, 1  ;;  %3756 = vcosq.f32 %v575_v62 }
 0x15a   :  { %v1343_v57 = vor.u32 %v1342_v39, %v1341_v0  ;;  %v1349_v27 = vor.u32 %v1348_v25, %v1347_v36  ;;  %vm1353_vm6 = vcmp.lt.s32.totalorder %v4646_v15, 4  ;;  %v1326_v34 = vor.u32 8388608, %v1325_v12 }
 0x15b   :  { %v4971_v4 = vsub.s32 %v755_v3, %v758_v22  ;;  %v1334_v8 = vshrl.u32 %v6361_v52, %v4768_v42  ;;  %vm1352_vm7 = vcmp.lt.s32.totalorder %v4646_v15, 3  ;;  %v674_v20 = vmul.f32 %v673_v40, %v671_v9 }
 0x15c   :  { %vm1351_vm9 = vcmp.lt.s32.totalorder %v4646_v15, 2  ;;  %v1358_v18 = vsel %vm1350_vm5, %v1337_v48, %v1340_v10  ;;  %v1359_v3 = vsel %vm1353_vm6, %v1346_v50, 920167782  ;;  %3758 = vsinq.f32 %v575_v62 }
 0x15d   :  { %v4985_v42 = vand.u32 3, %v580_v23  ;;  %v761_v51 = vsub.s32 0, %v4971_v4  ;;  %v1355_v12 = vsel %vm1353_vm6, %v1343_v57, 2102212464  ;;  %v824_v0 = vsel %vm806_vm3, 1.0, %v818_v26  ;;  %v2476_v26 = vld [vmem:[%s6250_s9 + $0x8] sm:$0xff] }
 0x15e   :  { %vm813_vm11 = vcmp.lt.f32.partialorder %v4963_v35, 0.0  ;;  %v1360_v39 = vsel %vm1352_vm7, %v1343_v57, %v1359_v3  ;;  %v1363_v28 = vsel %vm1353_vm6, %v1349_v27, 1326507024  ;;  %v1354_v23 = vsel %vm1350_vm5, %v1334_v8, %v1337_v48  ;;  %2598 = vrot.lane.b32.xlu0 %v2476_v26, %s3839_s22  ;;  %v5015_v27 = vpop.permute.xlu0 %836  ;;  %v2478_v26 = vld [vmem:[%s6250_s9 + $0x18] sm:$0xff] }
 0x15f   :  { %v3375_v62 = vmin.u32 %v761_v51, %v4971_v4  ;;  %v1361_v40 = vsel %vm1351_vm9, %v1358_v18, %v1360_v39  ;;  %v1362_v58 = vsel %vm1350_vm5, %v1340_v10, %v1343_v57  ;;  %v675_v9 = vxor.u32 2147483648, %v674_v20  ;;  %v2477_v51 = vld [vmem:[%s6250_s9 + $0x10] sm:$0xff] }
 0x160   :  { %v1356_v36 = vsel %vm1352_vm7, %v1340_v10, %v1355_v12  ;;  %v1364_v25 = vsel %vm1352_vm7, %v1346_v50, %v1363_v28  ;;  %v1366_v22 = vshll.u32 %v1326_v34, 8  ;;  %v845_v48 = vsel %vm841_vm10, %v4896_v11, %v824_v0  ;;  %2600 = vrot.lane.b32.xlu1 %v2477_v51, %s3839_s22 }
 0x161   :  { %vm807_vm12 = vcmp.gt.f32.partialorder %v4963_v35, 0.0  ;;  %v677_v57 = vsub.s32 4, %v4824_v45  ;;  %v763_v8 = vclz %v3375_v62  ;;  %v819_v10 = vsel %vm813_vm11, -1.0, %v6386_v38 }
 0x162   :  { %v1365_v50 = vsel %vm1351_vm9, %v1362_v58, %v1364_v25  ;;  %v5024_v34 = vmul.u32.u64.low %v1366_v22, %v1361_v40  ;;  %v5025_v2 = vmul.u32.u64.high %v1366_v22, %v1361_v40, %v5024_v34  ;;  %v1357_v11 = vsel %vm1351_vm9, %v1354_v23, %v1356_v36  ;;  %2602 = vrot.lane.b32.xlu0 %v2478_v26, %s3839_s22 }
 0x163   :  { %v3376_v21 = vadd.s32 4294967294, %v763_v8  ;;  %v5030_v18 = vmul.u32.u64.low %v1366_v22, %v1365_v50  ;;  %v5031_v3 = vmul.u32.u64.high %v1366_v22, %v1365_v50, %v5030_v18  ;;  %v3757_v12 = vpop.eup %3756  ;;  %v5040_v0 = vsel %vm862_vm1, %v4257_v7, %v4914_v33  ;;  %v5089_v8 = vpop.permute.xlu1 %857 }
 0x164   :  { %6388 = vst [vmem:[#allocation28_spill] sm:$0xff] %v5040_v0  ;;  %vm842_vm10 = vcmp.eq.s32.totalorder %v5015_v27, 1  ;;  %v6389_v39 = vand.u32 2147483647, %v4311_v61  ;;  %v676_v28 = vsel %vm593_vm4, %v675_v9, %v674_v20  ;;  %vm583_vm14 = vcmp.eq.s32.totalorder %v4985_v42, 0 }
 0x165   :  { %v825_v62 = vsel %vm807_vm12, 1.0, %v819_v10  ;;  %v5058_v7 = vsel %vm593_vm4, %v677_v57, %v4824_v45  ;;  %v751_v33 = vadd.s32 %v4886_v19, %v4884_v5  ;;  %vm3377_vm15 = vcmp.lt.s32.totalorder %v3376_v21, 0  ;;  %v6392_v10 = vld [vmem:[#allocation23_spill] sm:$0xff] }
 0x166   :  { %vm5045_vm13 = vcmp.le.f32.partialorder %v6389_v39, 0.7853982  ;;  %v5065_v20 = vsel %vm862_vm1, %v4266_v49, %v845_v48  ;;  %v766_v23 = vsel %vm3377_vm15, 0, %v3376_v21  ;;  %v1373_v40 = vmul.u32 %v1366_v22, %v1357_v11  ;;  %v3759_v9 = vpop.eup %3758 }
 0x167   :  { %v1376_v58 = vadd.s32 1, %v5025_v2  ;;  %v679_v45 = vsel %vm5045_vm13, %v4311_v61, %v676_v28  ;;  %v767_v5 = vsub.s32 32, %v766_v23  ;;  %v768_v19 = vshll.u32 %v4971_v4, %v766_v23 }
 0x168   :  { %v771_v36 = vsub.s32 4294967266, %v766_v23  ;;  %vm586_vm0 = vcmp.eq.s32.totalorder %v4985_v42, 2  ;;  %v5080_v49 = vsel %vm842_vm10, %v4963_v35, %v825_v62  ;;  %v680_v60 = vsel %vm5045_vm13, 0, %v5058_v7 }
 0x169   :  { %vm1375_vm2 = vc.u32 %v5031_v3, %v5024_v34  ;;  %vm582_vm3 = vcmp.lt.s32.totalorder %v4985_v42, 2  ;;  %v587_v4 = vxor.u32 2147483648, %v3757_v12  ;;  %v769_v25 = vshrl.u32 %v751_v33, %v767_v5 }
 0x16a   :  { %v772_v22 = vadd.s32 127, %v771_v36  ;;  %v1377_v48 = vsel %vm1375_vm2, %v1376_v58, %v5025_v2  ;;  %v584_v57 = vxor.u32 2147483648, %v3759_v9  ;;  %3760 = vcosq.f32 %v679_v45 }
 0x16b   :  { %v1378_v35 = vadd.s32 %v1377_v48, %v1373_v40  ;;  %v6328_v50 = vand.u32 2147483647, %v6392_v10  ;;  %v770_v21 = vor.u32 %v769_v25, %v768_v19  ;;  %v1439_v18 = vshll.u32 %v6361_v52, %v4654_v44 }
 0x16c   :  { %v773_v11 = vshll.u32 %v772_v22, 23  ;;  %v1440_v51 = vshrl.u32 %v6362_v32, %v4771_v17  ;;  %vm697_vm1 = vcmp.lt.s32.totalorder %v4330_v31, 0  ;;  %v1442_v2 = vshll.u32 %v6362_v32, %v4654_v44 }
 0x16d   :  { %v1379_v39 = vadd.s32 536870912, %v1378_v35  ;;  %v1443_v15 = vshrl.u32 %v6363_v24, %v4771_v17  ;;  %v1445_v28 = vshll.u32 %v6363_v24, %v4654_v44  ;;  %vm579_vm4 = vweird.f32 %v4262_v6 }
 0x16e   :  { %vm863_vm5 = vcmp.eq.s32.totalorder %v5089_v8, 1  ;;  %v774_v62 = vor.u32 4788187, %v773_v11  ;;  %v1446_v7 = vshrl.u32 %v6364_v46, %v4771_v17  ;;  %v1448_v33 = vshll.u32 %v6364_v46, %v4654_v44 }
 0x16f   :  { %v1449_v23 = vshrl.u32 %v6365_v13, %v4771_v17  ;;  %v588_v40 = vsel %vm586_vm0, %v587_v4, %v3759_v9  ;;  %3762 = vsinq.f32 %v679_v45  ;;  %v777_v58 = vcvt.s32.f32 %v770_v21 }
 0x170   :  { %v5113_v26 = vshrl.u32 %v1379_v39, 30  ;;  %v775_v5 = vand.u32 2147483647, %v774_v62  ;;  %v1429_v19 = vand.u32 8388607, %v6328_v50  ;;  %v1451_v36 = vshll.u32 %v6365_v13, %v4654_v44 }
 0x171   :  { %v1452_v25 = vshrl.u32 %v6366_v43, %v4771_v17  ;;  %v585_v22 = vsel %vm583_vm14, %v3757_v12, %v584_v57  ;;  %v6393_v48 = vand.u32 2147483647, %v4330_v31  ;;  %v781_v45 = vsub.s32 4, %v4950_v59 }
 0x172   :  { %v1381_v4 = vshll.u32 %v5113_v26, 30  ;;  %v1438_v21 = vshrl.u32 %v6361_v52, %v4771_v17  ;;  %v1441_v44 = vor.u32 %v1440_v51, %v1439_v18  ;;  %v1444_v11 = vor.u32 %v1443_v15, %v1442_v2 }
 0x173   :  { %vm5125_vm6 = vcmp.le.f32.partialorder %v6393_v48, 0.7853982  ;;  %v1447_v39 = vor.u32 %v1446_v7, %v1445_v28  ;;  %v1450_v62 = vor.u32 %v1449_v23, %v1448_v33  ;;  %v778_v50 = vmul.f32 %v777_v58, %v775_v5 }
 0x174   :  { %v5133_v14 = vsub.s32 %v1378_v35, %v1381_v4  ;;  %vm1454_vm7 = vcmp.lt.s32.totalorder %v4748_v47, 1  ;;  %vm1457_vm9 = vcmp.lt.s32.totalorder %v4748_v47, 4  ;;  %v1430_v12 = vor.u32 8388608, %v1429_v19  ;;  %v3761_v1 = vpop.eup %3760 }
 0x175   :  { %v1453_v57 = vor.u32 %v1452_v25, %v1451_v36  ;;  %vm1456_vm11 = vcmp.lt.s32.totalorder %v4748_v47, 3  ;;  %v1459_v48 = vsel %vm1457_vm9, %v1447_v39, 2102212464  ;;  %v589_v17 = vsel %vm582_vm3, %v585_v22, %v588_v40 }
 0x176   :  { %v684_v18 = vadd.s32 3, %v680_v60  ;;  %v1384_v51 = vsub.s32 0, %v5133_v14  ;;  %vm1455_vm12 = vcmp.lt.s32.totalorder %v4748_v47, 2  ;;  %v782_v35 = vsel %vm697_vm1, %v781_v45, %v4950_v59 }
 0x177   :  { %v1458_v2 = vsel %vm1454_vm7, %v1438_v21, %v1441_v44  ;;  %v1462_v15 = vsel %vm1454_vm7, %v1441_v44, %v1444_v11  ;;  %v1463_v28 = vsel %vm1457_vm9, %v1450_v62, 920167782  ;;  %v779_v42 = vxor.u32 2147483648, %v778_v50 }
 0x178   :  { %v3387_v60 = vmin.u32 %v1384_v51, %v5133_v14  ;;  %v1460_v7 = vsel %vm1456_vm11, %v1444_v11, %v1459_v48  ;;  %v1464_v33 = vsel %vm1456_vm11, %v1447_v39, %v1463_v28  ;;  %v1466_v23 = vsel %vm1454_vm7, %v1444_v11, %v1447_v39 }
 0x179   :  { %v1465_v59 = vsel %vm1455_vm12, %v1462_v15, %v1464_v33  ;;  %v1467_v40 = vsel %vm1457_vm9, %v1453_v57, 1326507024  ;;  %v1470_v58 = vshll.u32 %v1430_v12, 8  ;;  %v3763_v5 = vpop.eup %3762  ;;  %v5166_v19 = vsel %vm579_vm4, nan, %v589_v17 }
 0x17a   :  { %v5172_v36 = vsel %vm863_vm5, %v4255_v30, %v5080_v49  ;;  %v685_v25 = vand.u32 3, %v684_v18  ;;  %v1386_v22 = vclz %v3387_v60  ;;  %v784_v45 = vsel %vm5125_vm6, 0, %v782_v35 }
 0x17b   :  { %6396 = vst [vmem:[#allocation23_spill] sm:$0xff] %v5172_v36  ;;  %v1468_v4 = vsel %vm1456_vm11, %v1450_v62, %v1467_v40  ;;  %v5178_v21 = vmul.u32.u64.low %v1470_v58, %v1465_v59  ;;  %v5179_v44 = vmul.u32.u64.high %v1470_v58, %v1465_v59, %v5178_v21  ;;  %v691_v11 = vxor.u32 2147483648, %v3761_v1 }
 0x17c   :  { %v3388_v39 = vadd.s32 4294967294, %v1386_v22  ;;  %v1461_v12 = vsel %vm1455_vm12, %v1458_v2, %v1460_v7  ;;  %v1469_v30 = vsel %vm1455_vm12, %v1466_v23, %v1468_v4  ;;  %v688_v57 = vxor.u32 2147483648, %v3763_v5 }
 0x17d   :  { %v5186_v49 = vpop.f32.mrb[0].mxu1  ;;  %v780_v48 = vsel %vm697_vm1, %v779_v42, %v778_v50  ;;  %v5190_v17 = vmul.u32.u64.low %v1470_v58, %v1469_v30  ;;  %v5191_v62 = vmul.u32.u64.high %v1470_v58, %v1469_v30, %v5190_v17  ;;  %vm683_vm13 = vweird.f32 %v4311_v61 }
 0x17e   :  { %v5193_v18 = vpop.f32.mrb[1].mxu1  ;;  %vm687_vm14 = vcmp.eq.s32.totalorder %v685_v25, 0  ;;  %vm690_vm15 = vcmp.eq.s32.totalorder %v685_v25, 2  ;;  %vm3389_vm0 = vcmp.lt.s32.totalorder %v3388_v39, 0  ;;  %v788_v47 = vadd.s32 3, %v784_v45 }
 0x17f   :  { %v1389_v35 = vsel %vm3389_vm0, 0, %v3388_v39  ;;  %v1477_v2 = vmul.u32 %v1470_v58, %v1461_v12  ;;  %v1480_v15 = vadd.s32 1, %v5179_v44  ;;  %vm814_vm2 = vcmp.lt.f32.partialorder %v5166_v19, 0.0 }
 0x180   :  { %vm686_vm3 = vcmp.lt.s32.totalorder %v685_v25, 2  ;;  %v783_v50 = vsel %vm5125_vm6, %v4330_v31, %v780_v48  ;;  %v1394_v28 = vsub.s32 4294967266, %v1389_v35  ;;  %vm808_vm1 = vcmp.gt.f32.partialorder %v5166_v19, 0.0 }
 0x181   :  { %v5203_v42 = vpop.f32.mrb[2].mxu1  ;;  %v689_v60 = vsel %vm687_vm14, %v3761_v1, %v688_v57  ;;  %v692_v7 = vsel %vm690_vm15, %v691_v11, %v3763_v5  ;;  %vm1479_vm4 = vc.u32 %v5191_v62, %v5178_v21  ;;  %v1374_v59 = vadd.s32 %v5024_v34, %v5031_v3  ;;  %v6397_v5 = vld [vmem:[#allocation24_spill] sm:$0xff] }
 0x182   :  { %v5208_v33 = vpop.f32.mrb[3].mxu1  ;;  %v1390_v23 = vsub.s32 32, %v1389_v35  ;;  %v1395_v40 = vadd.s32 127, %v1394_v28  ;;  %v1481_v9 = vsel %vm1479_vm4, %v1480_v15, %v5179_v44  ;;  %v820_v58 = vsel %vm814_vm2, -1.0, %v6386_v38 }
 0x183   :  { %3764 = vcosq.f32 %v783_v50  ;;  %v5214_v22 = vand.u32 3, %v788_v47  ;;  %v1482_v45 = vadd.s32 %v1481_v9, %v1477_v2  ;;  %v693_v1 = vsel %vm686_vm3, %v689_v60, %v692_v7 }
 0x184   :  { %3766 = vsinq.f32 %v783_v50  ;;  %v6333_v4 = vand.u32 2147483647, %v6397_v5  ;;  %v1543_v11 = vshll.u32 %v6361_v52, %v4657_v63  ;;  %v1391_v34 = vshll.u32 %v5133_v14, %v1389_v35 }
 0x185   :  { %v5220_v39 = vpop.f32.mrb[4].mxu1  ;;  %v1483_v3 = vadd.s32 536870912, %v1482_v45  ;;  %v1544_v44 = vshrl.u32 %v6362_v32, %v4774_v16  ;;  %v1546_v12 = vshll.u32 %v6362_v32, %v4657_v63  ;;  %v1392_v25 = vshrl.u32 %v1374_v59, %v1390_v23 }
 0x186   :  { %v5227_v30 = vpop.f32.mrb[5].mxu1  ;;  %v1396_v57 = vshll.u32 %v1395_v40, 23  ;;  %v1552_v48 = vshll.u32 %v6364_v46, %v4657_v63  ;;  %v1553_v17 = vshrl.u32 %v6365_v13, %v4774_v16  ;;  %v1547_v14 = vshrl.u32 %v6363_v24, %v4774_v16 }
 0x187   :  { %v5233_v47 = vshrl.u32 %v1483_v3, 30  ;;  %v1549_v35 = vshll.u32 %v6363_v24, %v4657_v63  ;;  %v1550_v2 = vshrl.u32 %v6364_v46, %v4774_v16  ;;  %v5243_v15 = vsel %vm808_vm1, 1.0, %v820_v58 }
 0x188   :  { %vm1320_vm6 = vcmp.lt.s32.totalorder %v4447_v37, 0  ;;  %v1555_v50 = vshll.u32 %v6365_v13, %v4657_v63  ;;  %v1556_v28 = vshrl.u32 %v6366_v43, %v4774_v16  ;;  %v5254_v7 = vsel %vm683_vm13, nan, %v693_v1 }
 0x189   :  { %v5250_v60 = vpop.f32.mrb[6].mxu1  ;;  %v1485_v59 = vshll.u32 %v5233_v47, 30  ;;  %v1533_v23 = vand.u32 8388607, %v6333_v4  ;;  %v1542_v40 = vshrl.u32 %v6361_v52, %v4774_v16  ;;  %v1393_v63 = vor.u32 %v1392_v25, %v1391_v34 }
 0x18a   :  { %v5261_v9 = vpop.f32.mrb[7].mxu1  ;;  %v1397_v58 = vor.u32 4788187, %v1396_v57  ;;  %v1545_v3 = vor.u32 %v1544_v44, %v1543_v11  ;;  %v1554_v51 = vor.u32 %v1553_v17, %v1552_v48  ;;  %vm791_vm7 = vcmp.eq.s32.totalorder %v5214_v22, 0 }
 0x18b   :  { %6398 = vst [vmem:[#allocation24_spill] sm:$0xff] %v5261_v9  ;;  %v5264_v0 = vsub.s32 %v1482_v45, %v1485_v59  ;;  %v1548_v1 = vor.u32 %v1547_v14, %v1546_v12  ;;  %v1551_v36 = vor.u32 %v1550_v2, %v1549_v35  ;;  %vm1561_vm9 = vcmp.lt.s32.totalorder %v4751_v41, 4 }
 0x18c   :  { %vm794_vm11 = vcmp.eq.s32.totalorder %v5214_v22, 2  ;;  %vm815_vm12 = vcmp.lt.f32.partialorder %v5254_v7, 0.0  ;;  %v6399_v16 = vand.u32 2147483647, %v4447_v37  ;;  %v1557_v11 = vor.u32 %v1556_v28, %v1555_v50 }
 0x18d   :  { %vm1558_vm14 = vcmp.lt.s32.totalorder %v4751_v41, 1  ;;  %v5276_v34 = vpop.f32.mrb[8].mxu1  ;;  %v3765_v45 = vpop.eup %3764  ;;  %v1404_v44 = vsub.s32 4, %v5113_v26  ;;  %v1488_v12 = vsub.s32 0, %v5264_v0  ;;  %vm1560_vm15 = vcmp.lt.s32.totalorder %v4751_v41, 3 }
 0x18e   :  { %vm5271_vm13 = vcmp.le.f32.partialorder %v6399_v16, 0.7853982  ;;  %6402 = vst [vmem:[#allocation29_spill] sm:$0xff] %v5276_v34  ;;  %v1563_v25 = vsel %vm1561_vm9, %v1551_v36, 2102212464  ;;  %v5283_v57 = vpop.f32.mrb[9].mxu1  ;;  %v3767_v48 = vpop.eup %3766  ;;  %v1400_v14 = vcvt.s32.f32 %v1393_v63  ;;  %v1562_v28 = vsel %vm1558_vm14, %v1542_v40, %v1545_v3 }
 0x18f   :  { %6403 = vst [vmem:[#allocation30_spill] sm:$0xff] %v5283_v57  ;;  %vm790_vm0 = vcmp.lt.s32.totalorder %v5214_v22, 2  ;;  %v1398_v17 = vand.u32 2147483647, %v1397_v58  ;;  %v1534_v35 = vor.u32 8388608, %v1533_v23  ;;  %v3391_v50 = vmin.u32 %v1488_v12, %v5264_v0 }
 0x190   :  { %v1567_v2 = vsel %vm1561_vm9, %v1554_v51, 920167782  ;;  %vm1559_vm2 = vcmp.lt.s32.totalorder %v4751_v41, 2  ;;  %v1566_v59 = vsel %vm1558_vm14, %v1545_v3, %v1548_v1  ;;  %v1564_v16 = vsel %vm1560_vm15, %v1548_v1, %v1563_v25 }
 0x191   :  { %v1568_v63 = vsel %vm1560_vm15, %v1551_v36, %v1567_v2  ;;  %v1570_v23 = vsel %vm1558_vm14, %v1548_v1, %v1551_v36  ;;  %v1571_v58 = vsel %vm1561_vm9, %v1557_v11, 1326507024  ;;  %v5302_v12 = vpop.f32.mrb[10].mxu1  ;;  %v792_v57 = vxor.u32 2147483648, %v3767_v48 }
 0x192   :  { %6404 = vst [vmem:[#allocation31_spill] sm:$0xff] %v5302_v12  ;;  %v795_v34 = vxor.u32 2147483648, %v3765_v45  ;;  %v1405_v40 = vsel %vm1320_vm6, %v1404_v44, %v5113_v26  ;;  %v1490_v3 = vclz %v3391_v50  ;;  %v5307_v9 = vpop.f32.mrb[11].mxu1  ;;  %v1401_v25 = vmul.f32 %v1400_v14, %v1398_v17 }
 0x193   :  { %v1569_v2 = vsel %vm1559_vm2, %v1566_v59, %v1568_v63  ;;  %v1572_v36 = vsel %vm1560_vm15, %v1554_v51, %v1571_v58  ;;  %v1574_v1 = vshll.u32 %v1534_v35, 8  ;;  %vm809_vm3 = vcmp.gt.f32.partialorder %v5254_v7, 0.0 }
 0x194   :  { %v3392_v11 = vadd.s32 4294967294, %v1490_v3  ;;  %v1565_v12 = vsel %vm1559_vm2, %v1562_v28, %v1564_v16  ;;  %v1573_v26 = vsel %vm1559_vm2, %v1570_v23, %v1572_v36  ;;  %v821_v51 = vsel %vm815_vm12, -1.0, %v6386_v38 }
 0x195   :  { %v5318_v44 = vmul.u32.u64.low %v1574_v1, %v1573_v26  ;;  %v5319_v50 = vmul.u32.u64.high %v1574_v1, %v1573_v26, %v5318_v44  ;;  %v5321_v17 = vmul.u32.u64.low %v1574_v1, %v1569_v2  ;;  %v5322_v14 = vmul.u32.u64.high %v1574_v1, %v1569_v2, %v5321_v17  ;;  %v5325_v59 = vpop.f32.mrb[12].mxu1 }
 0x196   :  { %v1407_v35 = vsel %vm5271_vm13, 0, %v1405_v40  ;;  %v1478_v41 = vadd.s32 %v5178_v21, %v5191_v62  ;;  %vm3393_vm1 = vcmp.lt.s32.totalorder %v3392_v11, 0  ;;  %v5334_v28 = vpop.f32.mrb[13].mxu1  ;;  %v793_v16 = vsel %vm791_vm7, %v3765_v45, %v792_v57  ;;  %v6406_v40 = vld [vmem:[#allocation25_spill] sm:$0xff] }
 0x197   :  { %v796_v63 = vsel %vm794_vm11, %v795_v34, %v3767_v48  ;;  %v1402_v23 = vxor.u32 2147483648, %v1401_v25  ;;  %v1493_v58 = vsel %vm3393_vm1, 0, %v3392_v11  ;;  %v1581_v26 = vmul.u32 %v1574_v1, %v1565_v12 }
 0x198   :  { %v1494_v3 = vsub.s32 32, %v1493_v58  ;;  %v1495_v2 = vshll.u32 %v5264_v0, %v1493_v58  ;;  %v1498_v36 = vsub.s32 4294967266, %v1493_v58  ;;  %v5345_v21 = vsel %vm842_vm10, %v5166_v19, %v5243_v15 }
 0x199   :  { %v5349_v62 = vsel %vm809_vm3, 1.0, %v821_v51  ;;  %vm1583_vm4 = vc.u32 %v5319_v50, %v5321_v17  ;;  %v1584_v34 = vadd.s32 1, %v5322_v14  ;;  %v5354_v45 = vpop.f32.mrb[14].mxu1  ;;  %v5358_v0 = vsel %vm790_vm0, %v793_v16, %v796_v63  ;;  %v5382_v63 = vpop.permute.xlu0 %839 }
 0x19a   :  { %v5360_v57 = vadd.s32 3, %v1407_v35  ;;  %v1496_v27 = vshrl.u32 %v1478_v41, %v1494_v3  ;;  %v1499_v19 = vadd.s32 127, %v1498_v36  ;;  %v5362_v15 = vpop.f32.mrb[15].mxu1  ;;  %v1403_v48 = vsel %vm1320_vm6, %v1402_v23, %v1401_v25 }
 0x19b   :  { %6405 = vst [vmem:[#allocation32_spill] sm:$0xff] %v5362_v15  ;;  %v1585_v12 = vsel %vm1583_vm4, %v1584_v34, %v5322_v14  ;;  %v6334_v1 = vand.u32 2147483647, %v6406_v40  ;;  %v1647_v11 = vshll.u32 %v6361_v52, %v4754_v56  ;;  %vm1424_vm10 = vcmp.lt.s32.totalorder %v6392_v10, 0 }
 0x19c   :  { %v1497_v22 = vor.u32 %v1496_v27, %v1495_v2  ;;  %v1500_v44 = vshll.u32 %v1499_v19, 23  ;;  %v1586_v51 = vadd.s32 %v1585_v12, %v1581_v26  ;;  %v1648_v35 = vshrl.u32 %v6362_v32, %v4783_v29 }
 0x19d   :  { %vm787_vm7 = vweird.f32 %v4330_v31  ;;  %v1650_v25 = vshll.u32 %v6362_v32, %v4754_v56  ;;  %v1651_v14 = vshrl.u32 %v6363_v24, %v4783_v29  ;;  %v1653_v41 = vshll.u32 %v6363_v24, %v4754_v56 }
 0x19e   :  { %v1656_v16 = vshll.u32 %v6364_v46, %v4754_v56  ;;  %v1501_v23 = vor.u32 4788187, %v1500_v44  ;;  %v1504_v58 = vcvt.s32.f32 %v1497_v22  ;;  %v1587_v3 = vadd.s32 536870912, %v1586_v51 }
 0x19f   :  { %v1654_v2 = vshrl.u32 %v6364_v46, %v4783_v29  ;;  %v6407_v36 = vand.u32 2147483647, %v6392_v10  ;;  %v1637_v24 = vand.u32 8388607, %v6334_v1  ;;  %v1657_v26 = vshrl.u32 %v6365_v13, %v4783_v29 }
 0x1a0   :  { %v1659_v34 = vshll.u32 %v6365_v13, %v4754_v56  ;;  %v1660_v27 = vshrl.u32 %v6366_v43, %v4783_v29  ;;  %v1406_v46 = vsel %vm5271_vm13, %v4447_v37, %v1403_v48  ;;  %v1502_v19 = vand.u32 2147483647, %v1501_v23 }
 0x1a1   :  { %vm5388_vm6 = vcmp.le.f32.partialorder %v6407_v36, 0.7853982  ;;  %v5403_v12 = vshrl.u32 %v1587_v3, 30  ;;  %v1646_v22 = vshrl.u32 %v6361_v52, %v4783_v29  ;;  %vm843_vm9 = vcmp.eq.s32.totalorder %v5382_v63, 1  ;;  %v2837_v3 = vld [vmem:[%s6252_s11 + $0x10] sm:$0xff] }
 0x1a2   :  { %v1649_v44 = vor.u32 %v1648_v35, %v1647_v11  ;;  %v1652_v36 = vor.u32 %v1651_v14, %v1650_v25  ;;  %v1658_v1 = vor.u32 %v1657_v26, %v1656_v16  ;;  %v1661_v15 = vor.u32 %v1660_v27, %v1659_v34  ;;  %2892 = vperm.xlu0 %3734, %v2837_v3  }
 0x1a3   :  { %v1505_v13 = vmul.f32 %v1504_v58, %v1502_v19  ;;  %v1589_v56 = vshll.u32 %v5403_v12, 30  ;;  %v1655_v43 = vor.u32 %v1654_v2, %v1653_v41  ;;  %vm1662_vm11 = vcmp.lt.s32.totalorder %v4761_v54, 1  ;;  %v2835_v58 = vld [vmem:[%s6252_s11] sm:$0xff]  ;;  %v5429_v2 = vpop.permute.xlu1 %860 }
 0x1a4   :  { %3768 = vcosq.f32 %v1406_v46  ;;  %v1508_v4 = vsub.s32 4, %v5233_v47  ;;  %v1638_v48 = vor.u32 8388608, %v1637_v24  ;;  %vm1665_vm12 = vcmp.lt.s32.totalorder %v4761_v54, 4  ;;  %2841 = vperm.xlu1 %3731, %v2835_v58  }
 0x1a5   :  { %v1506_v23 = vxor.u32 2147483648, %v1505_v13  ;;  %v5412_v52 = vsub.s32 %v1586_v51, %v1589_v56  ;;  %vm1664_vm13 = vcmp.lt.s32.totalorder %v4761_v54, 3  ;;  %v1667_v29 = vsel %vm1665_vm12, %v1655_v43, 2102212464 }
 0x1a6   :  { %vm1663_vm14 = vcmp.lt.s32.totalorder %v4761_v54, 2  ;;  %v1670_v11 = vsel %vm1662_vm11, %v1649_v44, %v1652_v36  ;;  %v1671_v35 = vsel %vm1665_vm12, %v1658_v1, 920167782  ;;  %v1675_v25 = vsel %vm1665_vm12, %v1661_v15, 1326507024 }
 0x1a7   :  { %v1592_v14 = vsub.s32 0, %v5412_v52  ;;  %v1666_v41 = vsel %vm1662_vm11, %v1646_v22, %v1649_v44  ;;  %v1668_v16 = vsel %vm1664_vm13, %v1652_v36, %v1667_v29  ;;  %v1674_v51 = vsel %vm1662_vm11, %v1652_v36, %v1655_v43 }
 0x1a8   :  { %v1507_v15 = vsel %vm1424_vm10, %v1506_v23, %v1505_v13  ;;  %v1672_v24 = vsel %vm1664_vm13, %v1655_v43, %v1671_v35  ;;  %v1676_v26 = vsel %vm1664_vm13, %v1658_v1, %v1675_v25  ;;  %v1678_v34 = vshll.u32 %v1638_v48, 8  ;;  %v2836_v23 = vld [vmem:[%s6252_s11 + $0x8] sm:$0xff] }
 0x1a9   :  { %v798_v27 = vsel %vm787_vm7, nan, %v5358_v0  ;;  %v1509_v19 = vsel %vm1424_vm10, %v1508_v4, %v5233_v47  ;;  %v3395_v22 = vmin.u32 %v1592_v14, %v5412_v52  ;;  %v1673_v44 = vsel %vm1663_vm14, %v1670_v11, %v1672_v24  ;;  %v5500_v24 = vld [vmem:[%s6253_s12 + $0x8] sm:$0xff] }
 0x1aa   :  { %3770 = vsinq.f32 %v1406_v46  ;;  %v1677_v1 = vsel %vm1663_vm14, %v1674_v51, %v1676_v26  ;;  %v5444_v36 = vmul.u32.u64.low %v1678_v34, %v1673_v44  ;;  %v5445_v13 = vmul.u32.u64.high %v1678_v34, %v1673_v44, %v5444_v36 }
 0x1ab   :  { %vm864_vm15 = vcmp.eq.s32.totalorder %v5429_v2, 1  ;;  %v1510_v0 = vsel %vm5388_vm6, %v6392_v10, %v1507_v15  ;;  %v1594_v47 = vclz %v3395_v22  ;;  %v1669_v56 = vsel %vm1663_vm14, %v1666_v41, %v1668_v16 }
 0x1ac   :  { %vm816_vm0 = vcmp.lt.f32.partialorder %v798_v27, 0.0  ;;  %v1511_v46 = vsel %vm5388_vm6, 0, %v1509_v19  ;;  %v5456_v43 = vmul.u32.u64.low %v1678_v34, %v1677_v1  ;;  %v5457_v4 = vmul.u32.u64.high %v1678_v34, %v1677_v1, %v5456_v43 }
 0x1ad   :  { %v6410_v48 = vmov 1   ;;  %v6411_v29 = vmov 0   ;;  %v5468_v54 = vsel %vm863_vm5, %v4262_v6, %v5345_v21  ;;  %v848_v32 = vsel %vm843_vm9, %v5254_v7, %v5349_v62 }
 0x1ae   :  { %3732 = vset.pattern.permute.xlu1 %v6410_v48  ;;  %3735 = vset.pattern.permute.xlu0 %v6411_v29  ;;  %v5475_v11 = vand.u32 3, %v5360_v57  ;;  %v3396_v35 = vadd.s32 4294967294, %v1594_v47  ;;  %v5477_v25 = vpop.eup %3768  ;;  %vm810_vm2 = vcmp.gt.f32.partialorder %v798_v27, 0.0  ;;  %3772 = vcosq.f32 %v1510_v0 }
 0x1af   :  { %2884 = vperm.xlu1 %3732, %v2835_v58   ;;  %2846 = vperm.xlu0 %3735, %v2836_v23   ;;  %v1685_v14 = vmul.u32 %v1678_v34, %v1669_v56  ;;  %v1688_v8 = vadd.s32 1, %v5445_v13  ;;  %v822_v6 = vsel %vm816_vm0, -1.0, %v6386_v38  ;;  %3774 = vsinq.f32 %v1510_v0 }
 0x1b0   :  { %v1515_v21 = vadd.s32 3, %v1511_v46  ;;  %vm3397_vm5 = vcmp.lt.s32.totalorder %v3396_v35, 0  ;;  %v5487_v62 = vsel %vm864_vm15, %v4311_v61, %v848_v32  ;;  %vm1687_vm3 = vc.u32 %v5457_v4, %v5444_v36 }
 0x1b1   :  { %v1597_v57 = vsel %vm3397_vm5, 0, %v3396_v35  ;;  %v1582_v41 = vadd.s32 %v5321_v17, %v5319_v50  ;;  %v1689_v58 = vsel %vm1687_vm3, %v1688_v8, %v5445_v13  ;;  %v828_v15 = vsel %vm810_vm2, 1.0, %v822_v6  ;;  %v6415_v6 = vld [vmem:[#allocation26_spill] sm:$0xff] }
 0x1b2   :  { %v1598_v16 = vsub.s32 32, %v1597_v57  ;;  %v1602_v51 = vsub.s32 4294967266, %v1597_v57  ;;  %vm1414_vm1 = vcmp.eq.s32.totalorder %v5475_v11, 0  ;;  %vm1417_vm4 = vcmp.eq.s32.totalorder %v5475_v11, 2 }
 0x1b3   :  { %2888 = vperm.xlu1 %3732, %v2836_v23   ;;  %2851 = vperm.xlu0 %3735, %v2837_v3   ;;  %v1690_v61 = vadd.s32 %v1689_v58, %v1685_v14  ;;  %v5502_v26 = vand.u32 3, %v1515_v21  ;;  %vm1528_vm10 = vcmp.lt.s32.totalorder %v6397_v5, 0  ;;  %v1151_v17 = vadd.f32 %v5203_v42, %v4812_v55  ;;  %v2838_v3 = vld [vmem:[%s6252_s11 + $0x18] sm:$0xff] }
 0x1b4   :  { %v1603_v50 = vadd.s32 127, %v1602_v51  ;;  %v3771_v34 = vpop.eup %3770  ;;  %v1418_v19 = vxor.u32 2147483648, %v5477_v25  ;;  %v1612_v22 = vsub.s32 4, %v5403_v12  ;;  %v1145_v1 = vadd.f32 %v5186_v49, %v4935_v53  ;;  %v5552_v51 = vld [vmem:[%s6253_s12] sm:$0xff] }
 0x1b5   :  { %v1691_v44 = vadd.s32 536870912, %v1690_v61  ;;  %v5516_v13 = vsel %vm843_vm9, %v798_v27, %v828_v15  ;;  %v6412_v0 = vand.u32 2147483647, %v6397_v5  ;;  %v1599_v47 = vshll.u32 %v5412_v52, %v1597_v57 }
 0x1b6   :  { %v1600_v56 = vshrl.u32 %v1582_v41, %v1598_v16  ;;  %v1604_v46 = vshll.u32 %v1603_v50, 23  ;;  %v1147_v49 = vadd.f32 %v5193_v18, %v4935_v53  ;;  %v1153_v63 = vadd.f32 %v5208_v33, %v4812_v55  ;;  %v6416_v41 = vld [vmem:[#allocation27_spill] sm:$0xff] }
 0x1b7   :  { %vm5520_vm7 = vcmp.le.f32.partialorder %v6412_v0, 0.7853982  ;;  %3733 = vset.pattern.permute.xlu1 %v6411_v29  ;;  %2934 = vperm.xlu0 %3735, %v5500_v24   ;;  %v5527_v43 = vshrl.u32 %v1691_v44, 30  ;;  %v1415_v27 = vxor.u32 2147483648, %v3771_v34  ;;  %vm1518_vm6 = vcmp.eq.s32.totalorder %v5502_v26, 0  ;;  %v6419_v44 = vld [vmem:[#allocation10_spill] sm:$0xff] }
 0x1b8   :  { %2856 = vperm.xlu1 %3733, %v2838_v3   ;;  %vm1521_vm9 = vcmp.eq.s32.totalorder %v5502_v26, 2  ;;  %v1260_v52 = vmax.f32 %v1151_v17, 0.0  ;;  %v3773_v23 = vpop.eup %3772  ;;  %v5537_v32 = vsel %vm1417_vm4, %v1418_v19, %v3771_v34  ;;  %v1613_v35 = vsel %vm1528_vm10, %v1612_v22, %v5403_v12  ;;  %v6417_v17 = vld [vmem:[#allocation8_spill] sm:$0xff] }
 0x1b9   :  { %v1693_v18 = vshll.u32 %v5527_v43, 30  ;;  %v1256_v14 = vmax.f32 %v1145_v1, 0.0  ;;  %v3775_v33 = vpop.eup %3774  ;;  %v1601_v8 = vor.u32 %v1600_v56, %v1599_v47  ;;  %v1157_v21 = vadd.f32 %v5220_v39, %v6415_v6 }
 0x1ba   :  { %v1159_v57 = vadd.f32 %v5227_v30, %v6415_v6  ;;  %v1163_v16 = vadd.f32 %v5250_v60, %v6416_v41  ;;  %vm1517_vm11 = vcmp.lt.s32.totalorder %v5502_v26, 2  ;;  %v1605_v12 = vor.u32 4788187, %v1604_v46  ;;  %v6442_v26 = vld [vmem:[#allocation11_spill] sm:$0xff] }
 0x1bb   :  { %3738 = vset.pattern.permute.xlu0 %v6410_v48  ;;  %v5556_v58 = vsub.s32 %v1690_v61, %v1693_v18  ;;  %v1257_v15 = vmax.f32 %v1147_v49, 0.0  ;;  %v1261_v39 = vmax.f32 %v1153_v63, 0.0  ;;  %v5563_v30 = vsel %vm1414_vm1, %v5477_v25, %v1415_v27  ;;  %v6421_v25 = vld [vmem:[#allocation24_spill] sm:$0xff] }
 0x1bc   :  { %3736 = vset.pattern.permute.xlu1 %v6410_v48  ;;  %2968 = vperm.xlu0 %3738, %v5552_v51   ;;  %v1522_v60 = vxor.u32 2147483648, %v3773_v23  ;;  %v1615_v50 = vsel %vm5520_vm7, 0, %v1613_v35  ;;  %v6418_v34 = vmax.f32 %v6417_v17, 0.0  ;;  %v1519_v61 = vxor.u32 2147483648, %v3775_v33  ;;  %v5577_v27 = vld [vmem:[%s6253_s12 + $0x18] sm:$0xff]  ;;  %v6422_v35 = vld [vmem:[#allocation9_spill] sm:$0xff] }
 0x1bd   :  { %2896 = vperm.xlu1 %3736, %v2838_v3   ;;  %v1696_v22 = vsub.s32 0, %v5556_v58  ;;  %v6420_v1 = vmax.f32 %v6419_v44, 0.0  ;;  %v1268_v47 = vmax.f32 %v1163_v16, 0.0  ;;  %v1608_v56 = vcvt.s32.f32 %v1601_v8  ;;  %v6426_v8 = vld [vmem:[#allocation16_spill] sm:$0xff] }
 0x1be   :  { %v1276_v19 = vadd.f32 %v1260_v52, %v6418_v34  ;;  %v1264_v46 = vmax.f32 %v1157_v21, 0.0  ;;  %v1265_v49 = vmax.f32 %v1159_v57, 0.0  ;;  %v1165_v63 = vadd.f32 %v6421_v25, %v6416_v41  ;;  %v6424_v34 = vld [vmem:[#allocation7_spill] sm:$0xff]  ;;  %v6428_v25 = vld [vmem:[#allocation29_spill] sm:$0xff] }
 0x1bf   :  { %v1272_v0 = vadd.f32 %v1256_v14, %v6420_v1  ;;  %v1606_v52 = vand.u32 2147483647, %v1605_v12  ;;  %v3399_v3 = vmin.u32 %v1696_v22, %v5556_v58  ;;  %v6423_v18 = vmax.f32 %v6422_v35, 0.0  ;;  %v6429_v35 = vld [vmem:[#allocation14_spill] sm:$0xff] }
 0x1c0   :  { %v6425_v14 = vmax.f32 %v6424_v34, 0.0  ;;  %2980 = vperm.xlu0 %3738, %v5577_v27   ;;  %v6427_v21 = vmax.f32 %v6426_v8, 0.0  ;;  %v1269_v44 = vmax.f32 %v1165_v63, 0.0  ;;  %v1234_v7 = vadd.f32 %v6428_v25, %v4935_v53  ;;  %v6433_v34 = vld [vmem:[#allocation17_spill] sm:$0xff] }
 0x1c1   :  { %v1273_v17 = vadd.f32 %v1257_v15, %v6423_v18  ;;  %v3522_v1 = vpack.c.bf16 %v1276_v19, %v1272_v0  ;;  %3737 = vset.pattern.permute.xlu1 %v6411_v29  ;;  %v1520_v12 = vsel %vm1518_vm6, %v3773_v23, %v1519_v61  ;;  %v1523_v15 = vsel %vm1521_vm9, %v1522_v60, %v3775_v33  ;;  %v6431_v19 = vld [vmem:[#allocation13_spill] sm:$0xff]  ;;  %v5606_v23 = vld [vmem:[%s6253_s12 + $0x10] sm:$0xff]  ;;  %v6435_v61 = vld [vmem:[#allocation30_spill] sm:$0xff] }
 0x1c2   :  { %v1277_v16 = vadd.f32 %v1261_v39, %v6425_v14  ;;  %v1284_v57 = vadd.f32 %v1268_v47, %v6427_v21  ;;  %v5594_v22 = vadd.s32 3, %v1615_v50  ;;  %v1698_v39 = vclz %v3399_v3  ;;  %2929 = vperm.xlu1 %3737, %v5552_v51  }
 0x1c3   :  { %v6430_v47 = vmax.f32 %v6429_v35, 0.0  ;;  %v6432_v0 = vmax.f32 %v6431_v19, 0.0  ;;  %v6434_v14 = vmax.f32 %v6433_v34, 0.0  ;;  %vm1413_vm12 = vcmp.lt.s32.totalorder %v5475_v11, 2  ;;  %v6438_v35 = vld [vmem:[#allocation18_spill] sm:$0xff] }
 0x1c4   :  { %v3520_v21 = vpack.c.bf16 %v1277_v16, %v1273_v17  ;;  %v1609_v33 = vmul.f32 %v1608_v56, %v1606_v52  ;;  %v3400_v60 = vadd.s32 4294967294, %v1698_v39  ;;  %v1258_v50 = vmax.f32 %v1234_v7, 0.0 }
 0x1c5   :  { %v1280_v63 = vadd.f32 %v1264_v46, %v6430_v47  ;;  %v1281_v18 = vadd.f32 %v1265_v49, %v6432_v0  ;;  %v1285_v8 = vadd.f32 %v1269_v44, %v6434_v14  ;;  %v1236_v46 = vadd.f32 %v6435_v61, %v4935_v53  ;;  %v6437_v49 = vld [vmem:[#allocation31_spill] sm:$0xff] }
 0x1c6   :  { %v6436_v3 = vmov 2   ;;  %vm1514_vm13 = vweird.f32 %v6392_v10  ;;  %3521 = vmatprep.subr.bf16.mxu0 %v3520_v21  ;;  %v1240_v17 = vadd.f32 %v6437_v49, %v4812_v55  ;;  %v1242_v16 = vadd.f32 %v5307_v9, %v4812_v55  ;;  %2939 = vperm.xlu1 %3737, %v5606_v23  }
 0x1c7   :  { %3741 = vset.pattern.permute.xlu0 %v6436_v3  ;;  %v3524_v44 = vpack.c.bf16 %v1285_v8, %v1281_v18  ;;  %v3526_v25 = vpack.c.bf16 %v1284_v57, %v1280_v63  ;;  %v1686_v56 = vadd.s32 %v5444_v36, %v5457_v4  ;;  %vm3401_vm14 = vcmp.lt.s32.totalorder %v3400_v60, 0  ;;  %3523 = vmatpush1.bf16.msra.mxu0 %v3522_v1  ;;  %v6440_v63 = vld [vmem:[#allocation15_spill] sm:$0xff]  ;;  %v6444_v8 = vld [vmem:[#allocation12_spill] sm:$0xff] }
 0x1c8   :  { %v1259_v7 = vmax.f32 %v1236_v46, 0.0  ;;  %v1246_v53 = vadd.f32 %v5325_v59, %v6415_v6  ;;  %vm1410_vm0 = vweird.f32 %v4447_v37  ;;  %v1524_v52 = vsel %vm1517_vm11, %v1520_v12, %v1523_v15  ;;  %3109 = vperm.xlu0 %3741, %v5500_v24  }
 0x1c9   :  { %v1701_v39 = vsel %vm3401_vm14, 0, %v3400_v60  ;;  %v1262_v55 = vmax.f32 %v1240_v17, 0.0  ;;  %v1263_v9 = vmax.f32 %v1242_v16, 0.0  ;;  %3525 = vmatprep.subr.bf16.mxu0 %v3524_v44  ;;  %v1610_v36 = vxor.u32 2147483648, %v1609_v33  ;;  %v6450_v44 = vld [vmem:[#allocation32_spill] sm:$0xff] }
 0x1ca   :  { %v1702_v4 = vsub.s32 32, %v1701_v39  ;;  %v1703_v57 = vshll.u32 %v5556_v58, %v1701_v39  ;;  %v1706_v1 = vsub.s32 4294967266, %v1701_v39  ;;  %v6439_v59 = vmax.f32 %v6438_v35, 0.0  ;;  %v2034_v58 = vld [vmem:[%s6246_s5] sm:$0xff]  ;;  %2944 = vperm.xlu1 %3737, %v5577_v27  }
 0x1cb   :  { %v6441_v19 = vmax.f32 %v6440_v63, 0.0  ;;  %v6443_v12 = vmax.f32 %v6442_v26, 0.0  ;;  %v1266_v18 = vmax.f32 %v1246_v53, 0.0  ;;  %v6445_v21 = vmax.f32 %v6444_v8, 0.0  ;;  %3527 = vmatpush1.bf16.msra.mxu0 %v3526_v25  ;;  %v6456_v35 = vld [vmem:[#allocation21_spill] sm:$0xff] }
 0x1cc   :  { %v5629_v47 = vadd.f32 %v1258_v50, %v6439_v59  ;;  %v1704_v34 = vshrl.u32 %v1686_v56, %v1702_v4  ;;  %v1707_v14 = vadd.s32 127, %v1706_v1  ;;  %v1252_v50 = vadd.f32 %v5354_v45, %v6416_v41  ;;  %3742 = vset.pattern.permute.xlu0 %v6411_v29  ;;  %v5698_v26 = vld [vmem:[%s6342_s19] sm:$0xff] }
 0x1cd   :  { %v5633_v0 = vadd.f32 %v1262_v55, %v6441_v19  ;;  %v1279_v15 = vadd.f32 %v1263_v9, %v6443_v12  ;;  %v1275_v60 = vadd.f32 %v1259_v7, %v6445_v21  ;;  %v6446_v61 = vand.u32 2147483647, %v6406_v40  ;;  %v6451_v9 = vld [vmem:[#allocation22_spill] sm:$0xff]  ;;  %v6458_v21 = vld [vmem:[#allocation19_spill] sm:$0xff] }
 0x1ce   :  { %v1716_v49 = vsub.s32 4, %v5527_v43  ;;  %v6449_v16 = vpack.c.bf16 %v5468_v54, %v5065_v20  ;;  %v1248_v45 = vadd.f32 %v5334_v28, %v6415_v6  ;;  %v1254_v25 = vadd.f32 %v6450_v44, %v6416_v41  ;;  %3434 = vmatmul.mubr.msk.f32.vlgmr.msra.gmra.mrb[0].mxu0 %vm6335_vm8, %v2034_v58  ;;  %v5676_v28 = vld [vmem:[%s6342_s19 + $0x8] sm:$0xff]  ;;  %3739 = vset.pattern.permute.xlu1 %v6410_v48  ;;  %v5732_v58 = vpop.permute.xlu0 %1754 }
 0x1cf   :  { %vm5647_vm2 = vcmp.le.f32.partialorder %v6446_v61, 0.7853982  ;;  %v3534_v17 = vpack.c.bf16 %v5633_v0, %v5629_v47  ;;  %v1705_v56 = vor.u32 %v1704_v34, %v1703_v57  ;;  %v1708_v7 = vshll.u32 %v1707_v14, 23  ;;  %2120 = vmatprep.mubr.f32.mxu0 %v6386_v38  ;;  %2972 = vperm.xlu1 %3739, %v5500_v24  }
 0x1d0   :  { %3529 = vmatprep.subr.bf16.mxu0 %v6449_v16  ;;  %v1270_v53 = vmax.f32 %v1252_v50, 0.0  ;;  %v3532_v39 = vpack.c.bf16 %v1279_v15, %v1275_v60  ;;  %v1611_v55 = vsel %vm1528_vm10, %v1610_v36, %v1609_v33  ;;  %v6452_v4 = vmax.f32 %v6451_v9, 0.0  ;;  %v6453_v33 = vld [vmem:[#allocation23_spill] sm:$0xff]  ;;  %v6454_v36 = vld [vmem:[#allocation28_spill] sm:$0xff] }
 0x1d1   :  { %v870_v20 = vsel %vm864_vm15, %v4330_v31, %v5516_v13  ;;  %v1771_v54 = vmul.f32 10.0, %v5676_v28  ;;  %v1709_v6 = vor.u32 4788187, %v1708_v7  ;;  %v1712_v41 = vcvt.s32.f32 %v1705_v56  ;;  %v2035_v31 = vld [vmem:[%s6246_s5 + $0x8] sm:$0xff] }
 0x1d2   :  { %v5666_v1 = vadd.f32 %v1266_v18, %v6452_v4  ;;  %v6455_v57 = vpack.c.bf16 %v6453_v33, %v6454_v36  ;;  %v6457_v59 = vmax.f32 %v6456_v35, 0.0  ;;  %v1271_v19 = vmax.f32 %v1254_v25, 0.0  ;;  %3435 = vmatmul.mubr.msk.f32.gmra.mrb[2].mxu0 %vm6335_vm8, %v2035_v31  ;;  %v6463_v31 = vld [vmem:[#allocation6_spill] sm:$0xff] }
 0x1d3   :  { %v1420_v2 = vsel %vm1413_vm12, %v5563_v30, %v5537_v32  ;;  %vm1632_vm15 = vcmp.lt.s32.totalorder %v6406_v40, 0  ;;  %v3684_v13 = vtrunc.f32 %v1771_v54  ;;  %v1770_v12 = vmul.f32 10.0, %v5698_v26  ;;  %2126 = vmatprep.mubr.f32.mxu0 %v6386_v38  ;;  %2976 = vperm.xlu1 %3739, %v5606_v23  }
 0x1d4   :  { %3531 = vmatpush1.bf16.msra.mxu0 %v6455_v57  ;;  %v5684_v63 = vadd.f32 %v1270_v53, %v6457_v59  ;;  %v5704_v15 = vsel %vm1514_vm13, nan, %v1524_v52  ;;  %v1710_v18 = vand.u32 2147483647, %v1709_v6  ;;  %v1267_v11 = vmax.f32 %v1248_v45, 0.0  ;;  %v2030_v59 = vld [vmem:[%s6249_s8] sm:$0xff] }
 0x1d5   :  { %2156 = vmatprep.subr.mxu0 %v870_v20  ;;  %v1614_v30 = vsel %vm5520_vm7, %v6397_v5, %v1611_v55  ;;  %v1717_v34 = vsel %vm1632_vm15, %v1716_v49, %v5527_v43  ;;  %v3685_v48 = vcvt.f32.s32 %v3684_v13  ;;  %v3682_v52 = vtrunc.f32 %v1770_v12  ;;  %v2036_v43 = vld [vmem:[%s6246_s5 + $0x10] sm:$0xff] }
 0x1d6   :  { %v3538_v32 = vpack.c.bf16 %v5684_v63, %v5666_v1  ;;  %v5718_v14 = vsel %vm1410_vm0, nan, %v1420_v2  ;;  %v5721_v8 = vand.u32 3, %v5594_v22  ;;  %v1713_v24 = vmul.f32 %v1712_v41, %v1710_v18  ;;  %3436 = vmatmul.mubr.msk.f32.gmra.mrb[4].mxu0 %vm6335_vm8, %v2036_v43  ;;  %v6462_v41 = vld [vmem:[#allocation5_spill] sm:$0xff] }
 0x1d7   :  { %v6459_v60 = vmax.f32 %v6458_v21, 0.0  ;;  %vm1741_vm5 = vcmp.lt.f32.partialorder %v5704_v15, 0.0  ;;  %v1775_v22 = vmul.u32 10, %v3685_v48  ;;  %v1777_v50 = vrot.slane %v3685_v48, 1  ;;  %2132 = vmatprep.mubr.f32.mxu0 %v6386_v38  ;;  %3740 = vset.pattern.permute.xlu1 %v6436_v3 }
 0x1d8   :  { %2157 = vmatpush1.msra.mxu0 %v5487_v62  ;;  %v3683_v61 = vcvt.f32.s32 %v3682_v52  ;;  %3776 = vcosq.f32 %v1614_v30  ;;  %v1714_v49 = vxor.u32 2147483648, %v1713_v24  ;;  %v1719_v16 = vsel %vm5647_vm2, 0, %v1717_v34  ;;  %v6460_v62 = vld [vmem:[#allocation20_spill] sm:$0xff]  ;;  %3105 = vperm.xlu1 %3740, %v5552_v51   ;;  %v2031_v52 = vld [vmem:[%s6249_s8 + $0x8] sm:$0xff] }
 0x1d9   :  { %v5725_v42 = vadd.f32 %v1271_v19, %v6459_v60  ;;  %3533 = vmatprep.subr.bf16.mxu0 %v3532_v39  ;;  %v6461_v45 = vmax.f32 %v6460_v62, 0.0  ;;  %3778 = vsinq.f32 %v1614_v30  ;;  %v1779_v25 = vadd.s32 %v1777_v50, %v1775_v22  ;;  %v2037_v39 = vld [vmem:[%s6246_s5 + $0x18] sm:$0xff]  ;;  %v5776_v19 = vpop.permute.xlu1 %1763  ;;  %v2032_v50 = vld [vmem:[%s6249_s8 + $0x10] sm:$0xff] }
 0x1da   :  { %v1774_v56 = vmul.u32 10, %v3683_v61  ;;  %v1776_v7 = vrot.slane %v3683_v61, 1  ;;  %v1715_v53 = vsel %vm1632_vm15, %v1714_v49, %v1713_v24  ;;  %vm1737_vm3 = vcmp.gt.f32.partialorder %v5704_v15, 0.0  ;;  %3437 = vmatmul.mubr.msk.f32.gmra.mrb[6].mxu0 %vm6335_vm8, %v2037_v39 }
 0x1db   :  { %v5739_v44 = vadd.f32 %v1267_v11, %v6461_v45  ;;  %vm1740_vm1 = vcmp.lt.f32.partialorder %v5718_v14, 0.0  ;;  %vm6336_vm4 = vcmp.eq.s32.totalorder %v5732_v58, 1  ;;  %v1718_v9 = vsel %vm5647_vm2, %v6406_v40, %v1715_v53  ;;  %2216 = vmatprep.mubr.f32.mxu0 %v6386_v38 }
 0x1dc   :  { %v1723_v4 = vadd.s32 3, %v1719_v16  ;;  %vm1782_vm10 = vcmp.gt.s32.totalorder %v1779_v25, 0  ;;  %v1778_v20 = vadd.s32 %v1776_v7, %v1774_v56  ;;  %3780 = vcosq.f32 %v1718_v9  ;;  %3113 = vperm.xlu1 %3740, %v5606_v23  }
 0x1dd   :  { %v3536_v55 = vpack.c.bf16 %v5725_v42, %v5739_v44  ;;  %v1745_v54 = vsel %vm1741_vm5, -1.0, %v6386_v38  ;;  %v1783_v6 = vsel %vm1782_vm10, %v1779_v25, 0  ;;  %v1790_v33 = vadd.s32 8, %v6462_v41  ;;  %v2033_v25 = vld [vmem:[%s6249_s8 + $0x18] sm:$0xff] }
 0x1de   :  { %3782 = vsinq.f32 %v1718_v9  ;;  %vm1786_vm7 = vcmp.lt.s32.totalorder %v1783_v6, 99  ;;  %vm1780_vm6 = vcmp.gt.s32.totalorder %v1778_v20, 0  ;;  %v1791_v36 = vadd.s32 16, %v6462_v41 }
 0x1df   :  { %v1787_v46 = vsel %vm1786_vm7, %v1783_v6, 99  ;;  %v1781_v57 = vsel %vm1780_vm6, %v1778_v20, 0  ;;  %v1792_v35 = vadd.s32 24, %v6462_v41  ;;  %vm2139_vm9 = vcmask 195584  }
 0x1e0   :  { %vm1622_vm11 = vcmp.eq.s32.totalorder %v5721_v8, 0  ;;  %v5772_v3 = vand.u32 3, %v1723_v4  ;;  %v1749_v51 = vsel %vm1737_vm3, 1.0, %v1745_v54  ;;  %v5779_v2 = vrot.slane %v1787_v46, %v6463_v31  ;;  %3438 = vmatmul.mubr.msk.f32.vlgmr.msra.gmra.mrb[0].mxu0 %vm2139_vm9, %v2030_v59  ;;  %3117 = vperm.xlu1 %3740, %v5577_v27   ;;  %v2241_v27 = vld [vmem:[%s6247_s6] sm:$0xff] }
 0x1e1   :  { %vm1784_vm13 = vcmp.lt.s32.totalorder %v1781_v57, 99  ;;  %v5782_v12 = vadd.s32 32, %v6462_v41  ;;  %v5785_v18 = vadd.s32 40, %v6462_v41  ;;  %v1758_v34 = vsel %vm6336_vm4, %v5704_v15, %v1749_v51  ;;  %3535 = vmatpush1.bf16.msra.mxu0 %v3534_v17  ;;  %2222 = vmatprep.mubr.f32.mxu0 %v6386_v38  ;;  %v60_v51 = vld [vmem:[%s6342_s19 + $0x18] sm:$0xf] }
 0x1e2   :  { %v1785_v13 = vsel %vm1784_vm13, %v1781_v57, 99  ;;  %vm1811_vm14 = vcmp.eq.s32.totalorder %v6462_v41, %v5779_v2  ;;  %vm1813_vm0 = vcmp.eq.s32.totalorder %v1790_v33, %v5779_v2  ;;  %vm1815_vm2 = vcmp.eq.s32.totalorder %v1791_v36, %v5779_v2  ;;  %v3777_v30 = vpop.eup %3776  ;;  %3537 = vmatprep.subr.bf16.mxu0 %v3536_v55 }
 0x1e3   :  { %v5791_v11 = vrot.slane %v1785_v13, %v6463_v31  ;;  %vm1765_vm15 = vcmp.eq.s32.totalorder %v5776_v19, 1  ;;  %vm3540_vm5 = vmpackc.low %vm1813_vm0, %vm1811_vm14  ;;  %vm1817_vm3 = vcmp.eq.s32.totalorder %v1792_v35, %v5779_v2  ;;  %v5804_v48 = vadd.s32 48, %v6462_v41  ;;  %v3779_v24 = vpop.eup %3778  ;;  %v3799_v19 = vld [vmem:[%s6250_s9 + $0x8] sm:$0xff] }
 0x1e4   :  { %v3840_v21 = vmov 1.0|1.0   ;;  %vm5815_vm6 = vmpackc.low %vm1817_vm3, %vm1815_vm2  ;;  %vm1819_vm8 = vcmp.eq.s32.totalorder %v5782_v12, %v5779_v2  ;;  %v1796_v0 = vadd.s32 56, %v6462_v41  ;;  %vm6337_vm2 = vcmask 1044480   ;;  %3439 = vmatmul.mubr.msk.f32.gmra.mrb[2].mxu0 %vm2139_vm9, %v2031_v52  ;;  %3743 = vset.pattern.permute.xlu1 %v6411_v29  ;;  %v2597_v52 = vpop.permute.xlu1 %2596 }
 0x1e5   :  { %3541 = vmatprep.subr.msk.bf16.mxu1 %vm3540_vm5, %v3840_v21  ;;  %vm1810_vm10 = vcmp.eq.s32.totalorder %v6462_v41, %v5791_v11  ;;  %vm1812_vm7 = vcmp.eq.s32.totalorder %v1790_v33, %v5791_v11  ;;  %vm1814_vm13 = vcmp.eq.s32.totalorder %v1791_v36, %v5791_v11  ;;  %vm1816_vm14 = vcmp.eq.s32.totalorder %v1792_v35, %v5791_v11  ;;  %v2244_v35 = vld [vmem:[%s6247_s6 + $0x18] sm:$0xff] }
 0x1e6   :  { %vm3542_vm0 = vmpackc.low %vm1812_vm7, %vm1810_vm10  ;;  %vm1821_vm5 = vcmp.eq.s32.totalorder %v5785_v18, %v5779_v2  ;;  %vm1725_vm3 = vcmp.lt.s32.totalorder %v5772_v3, 2  ;;  %vm1726_vm4 = vcmp.eq.s32.totalorder %v5772_v3, 0  ;;  %vm1736_vm12 = vcmp.gt.f32.partialorder %v5718_v14, 0.0  ;;  %v3781_v15 = vpop.eup %3780  ;;  %3539 = vmatpush1.bf16.msra.mxu0 %v3538_v32  ;;  %2228 = vmatprep.mubr.f32.mxu0 %v6386_v38 }
 0x1e7   :  { %v1744_v17 = vsel %vm1740_vm1, -1.0, %v6386_v38  ;;  %3543 = vmatpush1.bf16.msk.msra.mxu1 %vm3542_vm0, %v3840_v21  ;;  %v1623_v60 = vxor.u32 2147483648, %v3779_v24  ;;  %v1626_v42 = vxor.u32 2147483648, %v3777_v30  ;;  %vm1729_vm10 = vcmp.eq.s32.totalorder %v5772_v3, 2  ;;  %vm5843_vm7 = vmpackc.low %vm1816_vm14, %vm1814_vm13  ;;  %v2354_v3 = vld [vmem:[%s6248_s7] sm:$0xff] }
 0x1e8   :  { %3545 = vmatprep.subr.msk.bf16.mxu1 %vm5815_vm6, %v3840_v21  ;;  %v1767_v22 = vsel %vm1765_vm15, %v6392_v10, %v1758_v34  ;;  %v3783_v61 = vpop.eup %3782  ;;  %v1730_v49 = vxor.u32 2147483648, %v3781_v15  ;;  %vm5862_vm1 = vmpackc.low %vm1821_vm5, %vm1819_vm8  ;;  %vm1818_vm6 = vcmp.eq.s32.totalorder %v5782_v12, %v5791_v11  ;;  %vm1820_vm13 = vcmp.eq.s32.totalorder %v5785_v18, %v5791_v11  ;;  %3440 = vmatmul.mubr.msk.f32.gmra.mrb[4].mxu0 %vm2139_vm9, %v2032_v50  ;;  %v59_v34 = vld [vmem:[%s6342_s19 + $0x10] sm:$0xf]  ;;  %v2601_v47 = vpop.permute.xlu1 %2600 }
 0x1e9   :  { %3476 = vmatprep.subr.msk.mxu0 %vm6337_vm2, %v1767_v22  ;;  %v1797_v10 = vadd.s32 64, %v6462_v41  ;;  %v1727_v1 = vxor.u32 2147483648, %v3783_v61  ;;  %vm1823_vm14 = vcmp.eq.s32.totalorder %v5804_v48, %v5779_v2  ;;  %vm1825_vm8 = vcmp.eq.s32.totalorder %v1796_v0, %v5779_v2  ;;  %2234 = vmatprep.mubr.f32.mxu0 %v6386_v38 }
 0x1ea   :  { %v1798_v63 = vadd.s32 72, %v6462_v41  ;;  %vm1621_vm0 = vcmp.lt.s32.totalorder %v5721_v8, 2  ;;  %vm1722_vm5 = vweird.f32 %v6406_v40  ;;  %v1731_v32 = vsel %vm1729_vm10, %v1730_v49, %v3783_v61 }
 0x1eb   :  { %3547 = vmatpush1.bf16.msk.msra.mxu1 %vm5843_vm7, %v3840_v21  ;;  %v1624_v62 = vsel %vm1622_vm11, %v3777_v30, %v1623_v60  ;;  %vm6470_vm2 = vcmp.eq.s32.totalorder %v5721_v8, 2  ;;  %v1728_v23 = vsel %vm1726_vm4, %v3781_v15, %v1727_v1  ;;  %v1748_v44 = vsel %vm1736_vm12, 1.0, %v1744_v17  ;;  %vm3550_vm11 = vmpackc.low %vm1820_vm13, %vm1818_vm6  ;;  %v3800_v30 = vld [vmem:[%s6250_s9 + $0x10] sm:$0xff]  ;;  %v2715_v17 = vld [vmem:[%s6251_s10] sm:$0xff] }
 0x1ec   :  { %v1627_v45 = vsel %vm6470_vm2, %v1626_v42, %v3779_v24  ;;  %3549 = vmatprep.subr.msk.bf16.mxu1 %vm5862_vm1, %v3840_v21  ;;  %v1732_v56 = vsel %vm1725_vm3, %v1728_v23, %v1731_v32  ;;  %vm5914_vm4 = vmpackc.low %vm1825_vm8, %vm1823_vm14  ;;  %vm1822_vm12 = vcmp.eq.s32.totalorder %v5804_v48, %v5791_v11  ;;  %vm1824_vm2 = vcmp.eq.s32.totalorder %v1796_v0, %v5791_v11  ;;  %v3801_v48 = vld [vmem:[%s6250_s9 + $0x18] sm:$0xff]  ;;  %v2716_v15 = vld [vmem:[%s6251_s10 + $0x8] sm:$0xff] }
 0x1ed   :  { %v1799_v53 = vadd.s32 80, %v6462_v41  ;;  %v1733_v39 = vsel %vm1722_vm5, nan, %v1732_v56  ;;  %vm1827_vm3 = vcmp.eq.s32.totalorder %v1797_v10, %v5779_v2  ;;  %vm1829_vm10 = vcmp.eq.s32.totalorder %v1798_v63, %v5779_v2  ;;  %3441 = vmatmul.mubr.msk.f32.gmra.mrb[6].mxu0 %vm2139_vm9, %v2033_v25  ;;  %vm3554_vm14 = vmpackc.low %vm1824_vm2, %vm1822_vm12  ;;  %v2717_v60 = vld [vmem:[%s6251_s10 + $0x10] sm:$0xff]  ;;  %v2718_v42 = vld [vmem:[%s6251_s10 + $0x18] sm:$0xff] }
 0x1ee   :  { %v1800_v55 = vadd.s32 88, %v6462_v41  ;;  %vm1739_vm7 = vcmp.gt.f32.partialorder %v1733_v39, 0.0  ;;  %vm1743_vm1 = vcmp.lt.f32.partialorder %v1733_v39, 0.0  ;;  %vm1618_vm6 = vweird.f32 %v6397_v5  ;;  %2321 = vmatprep.mubr.f32.mxu0 %v6386_v38  ;;  %vm3556_vm9 = vmpackc.low %vm1829_vm10, %vm1827_vm3 }
 0x1ef   :  { %3551 = vmatpush1.bf16.msk.msra.mxu1 %vm3550_vm11, %v3840_v21  ;;  %v1747_v9 = vsel %vm1743_vm1, -1.0, %v6386_v38  ;;  %vm6473_vm13 = vcmp.eq.s32.totalorder %v5732_v58, 1  ;;  %v1628_v20 = vsel %vm1621_vm0, %v1624_v62, %v1627_v45  ;;  %vm1826_vm8 = vcmp.eq.s32.totalorder %v1797_v10, %v5791_v11 }
 0x1f0   :  { %v1757_v4 = vsel %vm6473_vm13, %v5718_v14, %v1748_v44  ;;  %3553 = vmatprep.subr.msk.bf16.mxu1 %vm5914_vm4, %v3840_v21  ;;  %v1751_v14 = vsel %vm1739_vm7, 1.0, %v1747_v9  ;;  %vm1828_vm5 = vcmp.eq.s32.totalorder %v1798_v63, %v5791_v11  ;;  %vm6474_vm11 = vmmov %vm6473_vm13  ;;  %vm1831_vm4 = vcmp.eq.s32.totalorder %v1799_v53, %v5779_v2 }
 0x1f1   :  { %v1760_v54 = vsel %vm6474_vm11, %v1733_v39, %v1751_v14  ;;  %vm1833_vm12 = vcmp.eq.s32.totalorder %v1800_v55, %v5779_v2  ;;  %v1801_v8 = vadd.s32 96, %v6462_v41  ;;  %v1766_v6 = vsel %vm1765_vm15, %v4447_v37, %v1757_v4  ;;  %vm3558_vm2 = vmpackc.low %vm1828_vm5, %vm1826_vm8  ;;  %v2242_v37 = vld [vmem:[%s6247_s6 + $0x8] sm:$0xff] }
 0x1f2   :  { %vm6475_vm0 = vcmask 261120   ;;  %v1629_v33 = vsel %vm1618_vm6, nan, %v1628_v20  ;;  %vm6476_vm3 = vcmask 1044480   ;;  %v1769_v29 = vsel %vm1765_vm15, %v6406_v40, %v1760_v54  ;;  %vm3560_vm10 = vmpackc.low %vm1833_vm12, %vm1831_vm4  ;;  %v2243_v40 = vld [vmem:[%s6247_s6 + $0x10] sm:$0xff] }
 0x1f3   :  { %3555 = vmatpush1.bf16.msk.msra.mxu1 %vm3554_vm14, %v3840_v21  ;;  %3442 = vmatmul.mubr.msk.f32.vlgmr.msra.gmra.mrb[0].mxu0 %vm6475_vm0, %v2241_v27  ;;  %vm1830_vm7 = vcmp.eq.s32.totalorder %v1799_v53, %v5791_v11  ;;  %vm1832_vm1 = vcmp.eq.s32.totalorder %v1800_v55, %v5791_v11  ;;  %vm6477_vm13 = vmmov %vm6476_vm3  ;;  %vm1835_vm6 = vcmp.eq.s32.totalorder %v1801_v8, %v5779_v2  ;;  %vm1742_vm14 = vcmp.lt.f32.partialorder %v1629_v33, 0.0  ;;  %v2355_v2 = vld [vmem:[%s6248_s7 + $0x8] sm:$0xff] }
 0x1f4   :  { %3557 = vmatprep.subr.msk.bf16.mxu1 %vm3556_vm9, %v3840_v21  ;;  %3477 = vmatpush1.msk.msra.mxu0 %vm6476_vm3, %v1766_v6  ;;  %vm6478_vm9 = vmmov %vm6475_vm0  ;;  %v3427_v36 = vsel %vm1835_vm6, 1.0, %v6386_v38  ;;  %vm2371_vm5 = vcmask 1043456   ;;  %vm1834_vm11 = vcmp.eq.s32.totalorder %v1801_v8, %v5791_v11  ;;  %vm1738_vm4 = vcmp.gt.f32.partialorder %v1629_v33, 0.0  ;;  %v2357_v11 = vld [vmem:[%s6248_s7 + $0x18] sm:$0xff] }
 0x1f5   :  { %3482 = vmatprep.subr.msk.mxu0 %vm6477_vm13, %v1769_v29  ;;  %2327 = vmatprep.mubr.f32.mxu0 %v6386_v38  ;;  %vm3562_vm8 = vmpackc.low %vm1832_vm1, %vm1830_vm7  ;;  %v1746_v46 = vsel %vm1742_vm14, -1.0, %v6386_v38  ;;  %v3426_v57 = vsel %vm1834_vm11, 1.0, %v6386_v38  ;;  %vm6481_vm3 = vcmp.eq.s32.totalorder %v5732_v58, 1  ;;  %v3564_v13 = vpack.c.bf16 %v60_v51, %v5676_v28  ;;  %v3798_v58 = vld [vmem:[%s6250_s9] sm:$0xff] }
 0x1f6   :  { %vm6479_vm12 = vmmov %vm6475_vm0  ;;  %v1750_v59 = vsel %vm1738_vm4, 1.0, %v1746_v46  ;;  %vm2358_vm0 = vcmask 818176   ;;  %vm3841_vm7 = vmmov 1   ;;  %v3567_v24 = vpack.c.bf16 %v59_v34, %v5698_v26 }
 0x1f7   :  { %3559 = vmatpush1.bf16.msk.msra.mxu1 %vm3558_vm2, %v3840_v21  ;;  %3443 = vmatmul.mubr.msk.f32.gmra.mrb[2].mxu0 %vm6478_vm9, %v2242_v37  ;;  %vm6480_vm2 = vmmov %vm6478_vm9  ;;  %v1759_v31 = vsel %vm6481_vm3, %v1629_v33, %v1750_v59  ;;  %v1888_v43 = vrot.slane %v5698_v26, 6  ;;  %v1889_v22 = vrot.slane %v5676_v28, 6 }
 0x1f8   :  { %3561 = vmatprep.subr.msk.bf16.mxu1 %vm3560_vm10, %v3840_v21  ;;  %2333 = vmatprep.mubr.f32.mxu0 %v6386_v38  ;;  %vm2479_vm10 = vcmask 39936   ;;  %v1768_v12 = vsel %vm1765_vm15, %v6397_v5, %v1759_v31  ;;  %vm6024_vm1 = vmpackc.low %vm2371_vm5, %vm3841_vm7  ;;  %v2356_v5 = vld [vmem:[%s6248_s7 + $0x10] sm:$0xff]  ;;  %vm2719_vm15 = vcmask 97280   ;;  %vm6484_vm7 = vcmask 261120  }
 0x1f9   :  { %v6091_v50 = vsub.f32 %v5698_v26, %v1888_v43  ;;  %v6094_v61 = vsub.f32 %v5676_v28, %v1889_v22 }
 0x1fb   :  { %3563 = vmatpush1.bf16.msk.msra.mxu1 %vm3562_vm8, %v3840_v21  ;;  %3444 = vmatmul.mubr.msk.f32.gmra.mrb[4].mxu0 %vm6479_vm12, %v2243_v40  ;;  %v2599_v21 = vpop.permute.xlu0 %2598  ;;  %v6097_v49 = vand.u32 2147483647, %v6091_v50  ;;  %v6100_v16 = vand.u32 2147483647, %v6094_v61  ;;  %vm1996_vm4 = vcmp.lt.f32.partialorder %v6091_v50, 0.0  ;;  %vm1997_vm12 = vcmp.lt.f32.partialorder %v6094_v61, 0.0 }
 0x1fc   :  { %3470 = vmatprep.subr.msk.mxu1 %vm2371_vm5, %v3427_v36  ;;  %2339 = vmatprep.mubr.f32.mxu0 %v6386_v38 }
 0x1fd   :  { %v1922_v10 = vrot.slane %v6097_v49, 1  ;;  %v1923_v1 = vrot.slane %v6100_v16, 1 }
 0x1ff   :  { %3471 = vmatpush1.msk.msra.mxu1 %vm2371_vm5, %v3426_v57  ;;  %3445 = vmatmul.mubr.msk.f32.gmra.mrb[6].mxu0 %vm6480_vm2, %v2244_v35  ;;  %v2603_v0 = vpop.permute.xlu0 %2602  ;;  %v1926_v63 = vmax.f32 %v6097_v49, %v1922_v10  ;;  %v1927_v32 = vmax.f32 %v6100_v16, %v1923_v1  ;;  %v1928_v28 = vmin.f32 %v6097_v49, %v1922_v10 }
 0x200   :  { %3472 = vmatmul.mubr.msk.f32.vlgmr.msra.gmra.mrb[16].mxu1 %vm2358_vm0, %v2354_v3  ;;  %2563 = vmatprep.mubr.f32.mxu0 %v6386_v38  ;;  %v1929_v23 = vmin.f32 %v6100_v16, %v1923_v1 }
 0x201   :  { %2448 = vmatprep.mubr.f32.mxu1 %v6386_v38  ;;  %vm1930_vm6 = vcmp.eq.f32.partialorder %v1926_v63, 0.0  ;;  %vm1931_vm14 = vcmp.eq.f32.partialorder %v1927_v32, 0.0 }
 0x202   :  { %v1932_v26 = vsel %vm1930_vm6, 1.0, %v1926_v63  ;;  %v1933_v62 = vsel %vm1931_vm14, 1.0, %v1927_v32 }
 0x203   :  { %3478 = vmatmul.mubr.msk.f32.vlgmr.msra.gmra.mrb[8].mxu0 %vm2479_vm10, %v3798_v58  ;;  %3784 = vrcp.f32 %v1932_v26 }
 0x204   :  { %3473 = vmatmul.mubr.msk.f32.gmra.mrb[18].mxu1 %vm2358_vm0, %v2355_v2  ;;  %3483 = vmatpush1.msk.msra.mxu0 %vm6477_vm13, %v1768_v12  ;;  %3786 = vrcp.f32 %v1933_v62  ;;  %v1974_v62 = vrot.slane %v6097_v49, 7 }
 0x205   :  { %2454 = vmatprep.mubr.f32.mxu1 %v6386_v38  ;;  %2569 = vmatprep.mubr.f32.mxu0 %v6386_v38 }
 0x206   :  { %3566 = vmatprep.subr.msk.bf16.mxu0 %vm6024_vm1, %v3564_v13  ;;  %vm1978_vm5 = vcmp.gt.f32.partialorder %v6097_v49, %v1974_v62 }
 0x207   :  { %3479 = vmatmul.mubr.msk.f32.gmra.mrb[10].mxu0 %vm2479_vm10, %v3799_v19 }
 0x208   :  { %3474 = vmatmul.mubr.msk.f32.gmra.mrb[20].mxu1 %vm2358_vm0, %v2356_v5  ;;  %2575 = vmatprep.mubr.f32.mxu0 %v6386_v38 }
 0x209   :  { %2460 = vmatprep.mubr.f32.mxu1 %v6386_v38 }
 0x20b   :  { %3480 = vmatmul.mubr.msk.f32.gmra.mrb[12].mxu0 %vm2479_vm10, %v3800_v30 }
 0x20c   :  { %3475 = vmatmul.mubr.msk.f32.gmra.mrb[22].mxu1 %vm2358_vm0, %v2357_v11  ;;  %2581 = vmatprep.mubr.f32.mxu0 %v6386_v38 }
 0x20d   :  { %3059 = vmatprep.mubr.f32.mxu1 %v6386_v38  ;;  %v3785_v45 = vpop.eup %3784 }
 0x20e   :  { %v3787_v44 = vpop.eup %3786  ;;  %v1935_v25 = vmul.f32 %v3785_v45, %v1928_v28  ;;  %v1975_v45 = vrot.slane %v6100_v16, 7 }
 0x20f   :  { %3481 = vmatmul.mubr.msk.f32.gmra.mrb[14].mxu0 %vm2479_vm10, %v3801_v48  ;;  %v1937_v56 = vmul.f32 %v3787_v44, %v1929_v23 }
 0x210   :  { %2682 = vmatprep.mubr.f32.mxu0 %v6386_v38  ;;  %v1942_v7 = vadd.f32 1.0, %v1935_v25  ;;  %v3428_v39 = vadd.f32 -1.0, %v1935_v25  ;;  %vm1938_vm9 = vcmp.gt.f32.partialorder %v1935_v25, 0.41421357  ;;  %vm1979_vm11 = vcmp.gt.f32.partialorder %v6100_v16, %v1975_v45 }
 0x211   :  { %v1943_v53 = vadd.f32 1.0, %v1937_v56  ;;  %v3429_v9 = vadd.f32 -1.0, %v1937_v56  ;;  %vm1939_vm8 = vcmp.gt.f32.partialorder %v1937_v56, 0.41421357 }
 0x212   :  { %3788 = vrcp.f32 %v1942_v7 }
 0x213   :  { %3484 = vmatmul.mubr.msk.f32.vlgmr.msra.gmra.mrb[8].mxu0 %vm2479_vm10, %v2597_v52  ;;  %3790 = vrcp.f32 %v1943_v53 }
 0x214   :  { %2688 = vmatprep.mubr.f32.mxu0 %v6386_v38  ;;  %3569 = vmatpush1.bf16.msk.msra.mxu0 %vm6024_vm1, %v3567_v24  ;;  %vm6485_vm1 = vmmov %vm6484_vm7 }
 0x215   :  { %vm6486_vm13 = vmmov %vm6485_vm1 }
 0x216   :  { %vm6488_vm6 = vmmov %vm6485_vm1 }
 0x217   :  { %3485 = vmatmul.mubr.msk.f32.gmra.mrb[10].mxu0 %vm2479_vm10, %v2599_v21  ;;  %vm6489_vm14 = vmmov %vm6485_vm1 }
 0x218   :  { %2694 = vmatprep.mubr.f32.mxu0 %v6386_v38 }
 0x21b   :  { %3486 = vmatmul.mubr.msk.f32.gmra.mrb[12].mxu0 %vm2479_vm10, %v2601_v47  ;;  %v1894_v47 = vmul.f32 %v6091_v50, %v6091_v50 }
 0x21c   :  { %2700 = vmatprep.mubr.f32.mxu0 %v6386_v38  ;;  %v3789_v55 = vpop.eup %3788 }
 0x21d   :  { %v3791_v4 = vpop.eup %3790  ;;  %v1945_v27 = vmul.f32 %v3789_v55, %v3428_v39  ;;  %v1898_v22 = vrot.slane %v1894_v47, 1 }
 0x21e   :  { %v1947_v20 = vmul.f32 %v3791_v4, %v3429_v9 }
 0x21f   :  { %3487 = vmatmul.mubr.msk.f32.gmra.mrb[14].mxu0 %vm2479_vm10, %v2603_v0  ;;  %v1948_v14 = vsel %vm1938_vm9, %v1945_v27, %v1935_v25  ;;  %v1895_v0 = vmul.f32 %v6094_v61, %v6094_v61  ;;  %v1902_v44 = vadd.f32 %v1898_v22, %v1894_v47  ;;  %v2861_v47 = vsub.s32 5, %v6462_v41 }
 0x220   :  { %2802 = vmatprep.mubr.f32.mxu0 %v6386_v38  ;;  %v1949_v54 = vsel %vm1939_vm8, %v1947_v20, %v1937_v56  ;;  %v1950_v8 = vmul.f32 %v1948_v14, %v1948_v14 }
 0x221   :  { %v1951_v6 = vmul.f32 %v1949_v54, %v1949_v54  ;;  %v1899_v63 = vrot.slane %v1895_v0, 1  ;;  %3792 = vrsqrt.f32 %v1902_v44  ;;  %vm1906_vm0 = vcmp.eq.f32.partialorder %v1902_v44, inf }
 0x222   :  { %v1952_v33 = vmul.f32 0.080537446, %v1950_v8  ;;  %vm1908_vm3 = vcmp.eq.f32.partialorder %v1902_v44, 0.0 }
 0x223   :  { %3490 = vmatmul.mubr.msk.f32.vlgmr.msra.gmra.mrb[8].mxu0 %vm2719_vm15, %v2715_v17  ;;  %v1953_v29 = vmul.f32 0.080537446, %v1951_v6  ;;  %v1903_v7 = vadd.f32 %v1899_v63, %v1895_v0 }
 0x224   :  { %2808 = vmatprep.mubr.f32.mxu0 %v6386_v38  ;;  %v3430_v37 = vadd.f32 -0.13877685, %v1952_v33  ;;  %v2842_v33 = vpop.permute.xlu1 %2841 }
 0x225   :  { %v3431_v40 = vadd.f32 -0.13877685, %v1953_v29  ;;  %3794 = vrsqrt.f32 %v1903_v7  ;;  %vm1913_vm2 = vcmp.eq.f32.partialorder %v1903_v7, inf  ;;  %vm1915_vm10 = vcmp.eq.f32.partialorder %v1903_v7, 0.0 }
 0x226   :  { %v1956_v36 = vmul.f32 %v3430_v37, %v1950_v8 }
 0x227   :  { %3491 = vmatmul.mubr.msk.f32.gmra.mrb[10].mxu0 %vm2719_vm15, %v2716_v15  ;;  %v1957_v46 = vmul.f32 %v3431_v40, %v1951_v6 }
 0x228   :  { %2814 = vmatprep.mubr.f32.mxu0 %v6386_v38  ;;  %v1958_v57 = vadd.f32 0.19977711, %v1956_v36 }
 0x229   :  { %v1959_v35 = vadd.f32 0.19977711, %v1957_v46 }
 0x22a   :  { %v1960_v59 = vmul.f32 %v1958_v57, %v1950_v8 }
 0x22b   :  { %3492 = vmatmul.mubr.msk.f32.gmra.mrb[12].mxu0 %vm2719_vm15, %v2717_v60  ;;  %v1961_v3 = vmul.f32 %v1959_v35, %v1951_v6 }
 0x22c   :  { %2820 = vmatprep.mubr.f32.mxu0 %v6386_v38  ;;  %v3432_v51 = vadd.f32 -0.3333295, %v1960_v59 }
 0x22d   :  { %v3433_v31 = vadd.f32 -0.3333295, %v1961_v3 }
 0x22e   :  { %v1964_v2 = vmul.f32 %v3432_v51, %v1950_v8  ;;  %v2885_v35 = vpop.permute.xlu1 %2884  ;;  %v3793_v51 = vpop.eup %3792 }
 0x22f   :  { %3493 = vmatmul.mubr.msk.f32.gmra.mrb[14].mxu0 %vm2719_vm15, %v2718_v42  ;;  %v1965_v13 = vmul.f32 %v3433_v31, %v1951_v6  ;;  %v3795_v31 = vpop.eup %3794  ;;  %vm6487_vm15 = vmmov %vm6485_vm1 }
 0x230   :  { %v1966_v12 = vmul.f32 %v1964_v2, %v1948_v14 }
 0x231   :  { %v1967_v18 = vmul.f32 %v1965_v13, %v1949_v54 }
 0x232   :  { %v1968_v19 = vadd.f32 %v1966_v12, %v1948_v14  ;;  %v1905_v12 = vmul.f32 %v3793_v51, %v1902_v44 }
 0x233   :  { %v1969_v30 = vadd.f32 %v1967_v18, %v1949_v54 }
 0x234   :  { %v1970_v48 = vadd.f32 0.7853982, %v1968_v19 }
 0x235   :  { %v1971_v24 = vadd.f32 0.7853982, %v1969_v30 }
 0x236   :  { %v1972_v17 = vsel %vm1938_vm9, %v1970_v48, %v1968_v19  ;;  %vm6490_vm9 = vmmov %vm6485_vm1 }
 0x237   :  { %v1973_v60 = vsel %vm1939_vm8, %v1971_v24, %v1969_v30  ;;  %v1980_v32 = vsub.f32 1.5707964, %v1972_v17  ;;  %v1990_v39 = vrot.slane %v1972_v17, 7  ;;  %v1907_v30 = vsel %vm1906_vm0, %v1902_v44, %v1905_v12  ;;  %vm6491_vm8 = vmmov %vm6485_vm1 }
 0x238   :  { %v1981_v28 = vsub.f32 1.5707964, %v1973_v60  ;;  %v1991_v4 = vrot.slane %v1973_v60, 7 }
 0x239   :  { %v1984_v53 = vrot.slane %v1980_v32, 7 }
 0x23a   :  { %v1985_v9 = vrot.slane %v1981_v28, 7 }
 0x23b   :  { %v1994_v54 = vsel %vm1978_vm5, %v1984_v53, %v1990_v39  ;;  %vm6492_vm5 = vmmov %vm6485_vm1 }
 0x23c   :  { %v1995_v6 = vsel %vm1979_vm11, %v1985_v9, %v1991_v4  ;;  %v1998_v37 = vsub.f32 3.1415927, %v1994_v54  ;;  %v2008_v57 = vrot.slane %v1994_v54, 1  ;;  %vm6493_vm11 = vmmov %vm6485_vm1 }
 0x23d   :  { %v1999_v36 = vsub.f32 3.1415927, %v1995_v6  ;;  %v2009_v3 = vrot.slane %v1995_v6, 1 }
 0x23e   :  { %v2002_v16 = vrot.slane %v1998_v37, 1 }
 0x23f   :  { %v2003_v59 = vrot.slane %v1999_v36, 1 }
 0x240   :  { %v2012_v2 = vsel %vm1996_vm4, %v2002_v16, %v2008_v57 }
 0x241   :  { %v2013_v13 = vsel %vm1997_vm12, %v2003_v59, %v2009_v3  ;;  %v2014_v18 = vsub.f32 0.0, %v2012_v2  ;;  %v2024_v24 = vrot.slane %v2012_v2, 7 }
 0x242   :  { %v2015_v19 = vsub.f32 0.0, %v2013_v13  ;;  %v2025_v17 = vrot.slane %v2013_v13, 7 }
 0x244   :  { %v2019_v0 = vrot.slane %v2015_v19, 7 }
 0x246   :  { %v2029_v63 = vsel %vm1997_vm12, %v2019_v0, %v2025_v17 }
 0x2c6   :  { %v2323_v58 = vpop.f32.mrb[0].mxu0 }
 0x2c7   :  { %v2325_v5 = vpop.f32.mrb[1].mxu0 }
 0x2ca   :  { %v2329_v11 = vpop.f32.mrb[2].mxu0 }
 0x2cb   :  { %v2331_v34 = vpop.f32.mrb[3].mxu0 }
 0x2ce   :  { %v2335_v52 = vpop.f32.mrb[4].mxu0 }
 0x2cf   :  { %v2337_v21 = vpop.f32.mrb[5].mxu0 }
 0x2d2   :  { %v2341_v15 = vpop.f32.mrb[6].mxu0 }
 0x2d3   :  { %v2444_v42 = vpop.f32.mrb[16].mxu1  ;;  %v2343_v43 = vpop.f32.mrb[7].mxu0 }
 0x2d4   :  { %v6116_v10 = vadd.f32 %v2444_v42, %v2323_v58  ;;  %v2446_v1 = vpop.f32.mrb[17].mxu1  ;;  %v1912_v58 = vmul.f32 %v3795_v31, %v1903_v7 }
 0x2d5   :  { %v6118_v26 = vadd.f32 %v2446_v1, %v2325_v5  ;;  %v2889_v5 = vpop.permute.xlu1 %2888 }
 0x2d6   :  { %v1914_v48 = vsel %vm1913_vm2, %v1903_v7, %v1912_v58 }
 0x2d7   :  { %v2450_v23 = vpop.f32.mrb[18].mxu1 }
 0x2d8   :  { %v6122_v25 = vadd.f32 %v2450_v23, %v2329_v11  ;;  %v2452_v56 = vpop.f32.mrb[19].mxu1  ;;  %v1909_v11 = vand.u32 2147483648, %v1902_v44 }
 0x2d9   :  { %v6124_v55 = vadd.f32 %v2452_v56, %v2331_v34  ;;  %v1916_v34 = vand.u32 2147483648, %v1903_v7  ;;  %v2857_v60 = vpop.permute.xlu1 %2856 }
 0x2db   :  { %v2456_v27 = vpop.f32.mrb[20].mxu1  ;;  %v1917_v42 = vsel %vm1915_vm10, %v1916_v34, %v1914_v48 }
 0x2dc   :  { %v6128_v20 = vadd.f32 %v2456_v27, %v2335_v52  ;;  %v2458_v14 = vpop.f32.mrb[21].mxu1  ;;  %v2018_v52 = vrot.slane %v2014_v18, 7  ;;  %v2866_v32 = vrot.slane %v1917_v42, %v2861_v47 }
 0x2dd   :  { %v6130_v8 = vadd.f32 %v2458_v14, %v2337_v21  ;;  %v2893_v21 = vpop.permute.xlu0 %2892  ;;  %v2897_v23 = vpop.permute.xlu1 %2896 }
 0x2de   :  { %v2028_v22 = vsel %vm1996_vm4, %v2018_v52, %v2024_v24  ;;  %v2868_v39 = vmul.f32 %v2866_v32, %v2842_v33 }
 0x2df   :  { %v2462_v29 = vpop.f32.mrb[22].mxu1 }
 0x2e0   :  { %v6132_v40 = vadd.f32 %v2462_v29, %v2341_v15  ;;  %v2464_v49 = vpop.f32.mrb[23].mxu1  ;;  %v1910_v15 = vsel %vm1908_vm3, %v1909_v11, %v1907_v30 }
 0x2e1   :  { %v6134_v46 = vadd.f32 %v2464_v49, %v2343_v43  ;;  %v2901_v43 = vsub.s32 6, %v6462_v41  ;;  %v2862_v1 = vrot.slane %v1910_v15, %v2861_v47  ;;  %v2847_v62 = vpop.permute.xlu0 %2846  ;;  %v2930_v36 = vpop.permute.xlu1 %2929  ;;  %v2874_v47 = vmul.f32 %v2866_v32, %v2857_v60 }
 0x2e2   :  { %v2870_v14 = vmul.f32 %v2866_v32, %v2847_v62 }
 0x2e3   :  { %v2902_v28 = vrot.slane %v2028_v22, %v2901_v43  ;;  %v2906_v45 = vrot.slane %v2029_v63, %v2901_v43  ;;  %v2867_v56 = vmul.f32 %v2862_v1, %v2842_v33  ;;  %v2869_v50 = vmul.f32 %v2862_v1, %v2847_v62 }
 0x2e4   :  { %v2873_v34 = vmul.f32 %v2862_v1, %v2857_v60 }
 0x2e5   :  { %v2907_v9 = vmul.f32 %v2902_v28, %v2885_v35  ;;  %v2908_v27 = vmul.f32 %v2906_v45, %v2885_v35  ;;  %v2852_v61 = vpop.permute.xlu0 %2851  ;;  %v2909_v57 = vmul.f32 %v2902_v28, %v2889_v5  ;;  %v2911_v19 = vmul.f32 %v2902_v28, %v2893_v21  ;;  %v2940_v48 = vpop.permute.xlu1 %2939 }
 0x2e6   :  { %v2871_v33 = vmul.f32 %v2862_v1, %v2852_v61  ;;  %v2872_v13 = vmul.f32 %v2866_v32, %v2852_v61  ;;  %v2913_v1 = vmul.f32 %v2902_v28, %v2897_v23  ;;  %v2964_v61 = vld [vmem:[%s6254_s13 + $0x8] sm:$0xff] }
 0x2e9   :  { %v2935_v12 = vpop.permute.xlu0 %2934 }
 0x2f6   :  { %v2804_v44 = vpop.f32.mrb[8].mxu0 }
 0x2f7   :  { %v3595_v7 = vadd.f32 %v6116_v10, %v2804_v44  ;;  %v2806_v53 = vpop.f32.mrb[9].mxu0  ;;  %v2914_v44 = vmul.f32 %v2906_v45, %v2897_v23 }
 0x2f8   :  { %v3597_v41 = vadd.f32 %v6118_v26, %v2806_v53  ;;  %v2910_v26 = vmul.f32 %v2906_v45, %v2889_v5  ;;  %v2912_v5 = vmul.f32 %v2906_v45, %v2893_v21  ;;  %v2945_v53 = vpop.permute.xlu1 %2944 }
 0x2f9   :  { %v2875_v4 = vadd.f32 %v3595_v7, %v2867_v56 }
 0x2fa   :  { %v2876_v54 = vadd.f32 %v3597_v41, %v2868_v39  ;;  %v2810_v6 = vpop.f32.mrb[10].mxu0 }
 0x2fb   :  { %v2915_v29 = vadd.f32 %v2907_v9, %v2875_v4  ;;  %v3599_v37 = vadd.f32 %v6122_v25, %v2810_v6  ;;  %v2812_v49 = vpop.f32.mrb[11].mxu0  ;;  %v2966_v6 = vld [vmem:[%s6254_s13 + $0x18] sm:$0xff] }
 0x2fc   :  { %v2916_v16 = vadd.f32 %v2908_v27, %v2876_v54  ;;  %v3601_v10 = vadd.f32 %v6124_v55, %v2812_v49  ;;  %v2965_v54 = vld [vmem:[%s6254_s13 + $0x10] sm:$0xff]  ;;  %v2973_v49 = vpop.permute.xlu1 %2972 }
 0x2fd   :  { %v2877_v59 = vadd.f32 %v3599_v37, %v2869_v50  ;;  %v6156_v11 = vadd.f32 %v2930_v36, %v2915_v29  ;;  %v2969_v29 = vpop.permute.xlu0 %2968 }
 0x2fe   :  { %v2878_v3 = vadd.f32 %v3601_v10, %v2870_v14  ;;  %v2816_v51 = vpop.f32.mrb[12].mxu0  ;;  %v6153_v58 = vadd.f32 %v2930_v36, %v2916_v16  ;;  %v2963_v14 = vld [vmem:[%s6254_s13] sm:$0xff] }
 0x2ff   :  { %v2917_v31 = vadd.f32 %v2909_v57, %v2877_v59  ;;  %v3603_v35 = vadd.f32 %v6128_v20, %v2816_v51  ;;  %v2818_v2 = vpop.f32.mrb[13].mxu0  ;;  %v2955_v63 = vmax.f32 %v6156_v11, 0.0 }
 0x300   :  { %v2918_v25 = vadd.f32 %v2910_v26, %v2878_v3  ;;  %v3605_v18 = vadd.f32 %v6130_v8, %v2818_v2  ;;  %v2956_v42 = vmax.f32 %v6153_v58, 0.0 }
 0x301   :  { %v6158_v55 = vadd.f32 %v2935_v12, %v2917_v31  ;;  %v2879_v30 = vadd.f32 %v3603_v35, %v2871_v33  ;;  %v2977_v35 = vpop.permute.xlu1 %2976 }
 0x302   :  { %v2880_v52 = vadd.f32 %v3605_v18, %v2872_v13  ;;  %v2822_v24 = vpop.f32.mrb[14].mxu0  ;;  %v6160_v20 = vadd.f32 %v2935_v12, %v2918_v25 }
 0x303   :  { %v2957_v0 = vmax.f32 %v6158_v55, 0.0  ;;  %v2919_v17 = vadd.f32 %v2911_v19, %v2879_v30  ;;  %v3607_v15 = vadd.f32 %v6132_v40, %v2822_v24  ;;  %v2824_v8 = vpop.f32.mrb[15].mxu0  ;;  %v2981_v30 = vpop.permute.xlu0 %2980 }
 0x304   :  { %v2920_v43 = vadd.f32 %v2912_v5, %v2880_v52  ;;  %v3609_v22 = vadd.f32 %v6134_v46, %v2824_v8  ;;  %v2958_v21 = vmax.f32 %v6160_v20, 0.0 }
 0x305   :  { %v2881_v62 = vadd.f32 %v3607_v15, %v2873_v34  ;;  %v3572_v7 = vpack.c.bf16 %v2957_v0, %v2955_v63  ;;  %v6170_v41 = vadd.f32 %v2940_v48, %v2919_v17 }
 0x306   :  { %v2882_v56 = vadd.f32 %v3609_v22, %v2874_v47  ;;  %v3570_v60 = vpack.c.bf16 %v2958_v21, %v2956_v42  ;;  %v6168_v40 = vadd.f32 %v2940_v48, %v2920_v43 }
 0x307   :  { %v2921_v32 = vadd.f32 %v2913_v1, %v2881_v62  ;;  %v2959_v45 = vmax.f32 %v6170_v41, 0.0  ;;  %v3101_v62 = vld [vmem:[%s6255_s14 + $0x8] sm:$0xff] }
 0x308   :  { %v2922_v39 = vadd.f32 %v2914_v44, %v2882_v56  ;;  %3571 = vmatprep.subr.bf16.mxu1 %v3570_v60  ;;  %v2960_v28 = vmax.f32 %v6168_v40, 0.0  ;;  %v3102_v44 = vld [vmem:[%s6255_s14 + $0x10] sm:$0xff]  ;;  %v3103_v56 = vld [vmem:[%s6255_s14 + $0x18] sm:$0xff]  ;;  %v3239_v60 = vld [vmem:[%s6257_s16] sm:$0xff] }
 0x309   :  { %v2953_v9 = vadd.f32 %v2945_v53, %v2921_v32  ;;  %3573 = vmatpush1.bf16.msra.mxu1 %v3572_v7  ;;  %v3240_v32 = vld [vmem:[%s6257_s16 + $0x8] sm:$0x3]  ;;  %3243 = vperm.xlu0 %3742, %v3239_v60   ;;  %v3106_v7 = vpop.permute.xlu1 %3105 }
 0x30a   :  { %v2954_v46 = vadd.f32 %v2945_v53, %v2922_v39  ;;  %3248 = vperm.xlu1 %3743, %v3240_v32  }
 0x30b   :  { %v2961_v50 = vmax.f32 %v2953_v9, 0.0  ;;  %v3110_v9 = vpop.permute.xlu0 %3109 }
 0x30c   :  { %v2962_v4 = vmax.f32 %v2954_v46, 0.0 }
 0x30d   :  { %v3576_v27 = vpack.c.bf16 %v2961_v50, %v2959_v45 }
 0x30e   :  { %v3574_v23 = vpack.c.bf16 %v2962_v4, %v2960_v28 }
 0x310   :  { %3575 = vmatprep.subr.bf16.mxu1 %v3574_v23 }
 0x311   :  { %3577 = vmatpush1.bf16.msra.mxu1 %v3576_v27 }
 0x314   :  { %3494 = vmatmul.mubr.msk.f32.vlgmr.msra.gmra.mrb[24].mxu1 %vm6484_vm7, %v2963_v14 }
 0x315   :  { %3065 = vmatprep.mubr.f32.mxu1 %v6386_v38 }
 0x318   :  { %3495 = vmatmul.mubr.msk.f32.gmra.mrb[26].mxu1 %vm6485_vm1, %v2964_v61 }
 0x319   :  { %3071 = vmatprep.mubr.f32.mxu1 %v6386_v38 }
 0x31c   :  { %3496 = vmatmul.mubr.msk.f32.gmra.mrb[28].mxu1 %vm6486_vm13, %v2965_v54 }
 0x31d   :  { %3077 = vmatprep.mubr.f32.mxu1 %v6386_v38 }
 0x320   :  { %3497 = vmatmul.mubr.msk.f32.gmra.mrb[30].mxu1 %vm6487_vm15, %v2966_v6 }
 0x321   :  { %3196 = vmatprep.mubr.f32.mxu1 %v6386_v38 }
 0x3e7   :  { %v3061_v37 = vpop.f32.mrb[24].mxu1 }
 0x3e8   :  { %v3063_v36 = vpop.f32.mrb[25].mxu1  ;;  %v3062_v10 = vadd.f32 %v3061_v37, %v2969_v29 }
 0x3e9   :  { %v3064_v16 = vadd.f32 %v3063_v36, %v2969_v29 }
 0x3ea   :  { %v3084_v51 = vmax.f32 %v3062_v10, 0.0 }
 0x3eb   :  { %v3067_v57 = vpop.f32.mrb[26].mxu1  ;;  %v3085_v26 = vmax.f32 %v3064_v16, 0.0 }
 0x3ec   :  { %v3068_v33 = vadd.f32 %v3067_v57, %v2973_v49  ;;  %v3069_v59 = vpop.f32.mrb[27].mxu1  ;;  %v3092_v11 = vadd.f32 %v3084_v51, %v2955_v63  ;;  %v3100_v63 = vld [vmem:[%s6255_s14] sm:$0xff] }
 0x3ed   :  { %v3070_v3 = vadd.f32 %v3069_v59, %v2973_v49  ;;  %v3093_v25 = vadd.f32 %v3085_v26, %v2956_v42 }
 0x3ee   :  { %v3086_v31 = vmax.f32 %v3068_v33, 0.0 }
 0x3ef   :  { %v3087_v2 = vmax.f32 %v3070_v3, 0.0  ;;  %v3073_v13 = vpop.f32.mrb[28].mxu1 }
 0x3f0   :  { %v3094_v12 = vadd.f32 %v3086_v31, %v2957_v0  ;;  %v3075_v58 = vpop.f32.mrb[29].mxu1  ;;  %v3074_v55 = vadd.f32 %v3073_v13, %v2977_v35 }
 0x3f1   :  { %v3095_v18 = vadd.f32 %v3087_v2, %v2958_v21  ;;  %v3076_v19 = vadd.f32 %v3075_v58, %v2977_v35 }
 0x3f2   :  { %v3580_v48 = vpack.c.bf16 %v3094_v12, %v3092_v11  ;;  %v3088_v17 = vmax.f32 %v3074_v55, 0.0 }
 0x3f3   :  { %v3079_v5 = vpop.f32.mrb[30].mxu1  ;;  %v3578_v34 = vpack.c.bf16 %v3095_v18, %v3093_v25  ;;  %v3089_v20 = vmax.f32 %v3076_v19, 0.0 }
 0x3f4   :  { %v3080_v52 = vadd.f32 %v3079_v5, %v2981_v30  ;;  %v3081_v24 = vpop.f32.mrb[31].mxu1  ;;  %v3096_v22 = vadd.f32 %v3088_v17, %v2959_v45  ;;  %v3114_v45 = vpop.permute.xlu1 %3113  ;;  %v3238_v5 = vld [vmem:[%s6256_s15 + $0x8] sm:$0x3] }
 0x3f5   :  { %v3082_v47 = vadd.f32 %v3081_v24, %v2981_v30  ;;  %3579 = vmatprep.subr.bf16.mxu1 %v3578_v34  ;;  %v3097_v43 = vadd.f32 %v3089_v20, %v2960_v28  ;;  %v3237_v30 = vld [vmem:[%s6256_s15] sm:$0xff]  ;;  %v3244_v34 = vpop.permute.xlu0 %3243  ;;  %s3802_s15 = scalar_lea.vmem %s3344_s30, 512 }
 0x3f6   :  { %v3090_v15 = vmax.f32 %v3080_v52, 0.0  ;;  %3581 = vmatpush1.bf16.msra.mxu1 %v3580_v48  ;;  %p3803_p0 = scmp.ne.s32.totalorder %s3344_s30, %s3802_s15  ;;  %p3808_p2 = scmp.lt.s32.totalorder %s3802_s15, %s3802_s15 }
 0x3f7   :  { %v3091_v8 = vmax.f32 %v3082_v47, 0.0 }
 0x3f8   :  { %v3098_v0 = vadd.f32 %v3090_v15, %v2961_v50  ;;  %v3118_v33 = vpop.permute.xlu1 %3117  ;;  %p3809_p3 = por %p3808_p2, %p3807_p1 }
 0x3f9   :  { %v3099_v42 = vadd.f32 %v3091_v8, %v2962_v4 }
 0x3fa   :  { %v3584_v1 = vpack.c.bf16 %v3098_v0, %v3096_v22  ;;  %p3810_p4 = pnand %p3809_p3, %p3803_p0 }
 0x3fb   :  { %v3582_v21 = vpack.c.bf16 %v3099_v42, %v3097_v43 }
 0x3fc   :  { %v3249_v47 = vpop.permute.xlu1 %3248 }
 0x3fd   :  { %3583 = vmatprep.subr.bf16.mxu1 %v3582_v21 }
 0x3fe   :  { %3585 = vmatpush1.bf16.msra.mxu1 %v3584_v1 }
 0x401   :  { %3498 = vmatmul.mubr.msk.f32.vlgmr.msra.gmra.mrb[32].mxu1 %vm6488_vm6, %v3100_v63 }
 0x402   :  { %3202 = vmatprep.mubr.f32.mxu1 %v6386_v38 }
 0x405   :  { %3499 = vmatmul.mubr.msk.f32.gmra.mrb[34].mxu1 %vm6489_vm14, %v3101_v62 }
 0x406   :  { %3208 = vmatprep.mubr.f32.mxu1 %v6386_v38 }
 0x409   :  { %3500 = vmatmul.mubr.msk.f32.gmra.mrb[36].mxu1 %vm6490_vm9, %v3102_v44 }
 0x40a   :  { %3214 = vmatprep.mubr.f32.mxu1 %v6386_v38 }
 0x40d   :  { %3501 = vmatmul.mubr.msk.f32.gmra.mrb[38].mxu1 %vm6491_vm8, %v3103_v56 }
 0x40e   :  { %3321 = vmatprep.mubr.f32.mxu1 %v6386_v38 }
 0x4d4   :  { %v3198_v53 = vpop.f32.mrb[32].mxu1 }
 0x4d5   :  { %v3199_v39 = vadd.f32 %v3198_v53, %v3106_v7  ;;  %v3200_v40 = vpop.f32.mrb[33].mxu1 }
 0x4d6   :  { %v3201_v41 = vadd.f32 %v3200_v40, %v3106_v7 }
 0x4d7   :  { %v3221_v50 = vmax.f32 %v3199_v39, 0.0 }
 0x4d8   :  { %v3204_v46 = vpop.f32.mrb[34].mxu1  ;;  %v3222_v23 = vmax.f32 %v3201_v41, 0.0 }
 0x4d9   :  { %v3205_v28 = vadd.f32 %v3204_v46, %v3110_v9  ;;  %v3206_v4 = vpop.f32.mrb[35].mxu1  ;;  %v3229_v6 = vadd.f32 %v3221_v50, %v3092_v11 }
 0x4da   :  { %v3207_v27 = vadd.f32 %v3206_v4, %v3110_v9  ;;  %v3230_v36 = vadd.f32 %v3222_v23, %v3093_v25 }
 0x4db   :  { %v3223_v14 = vmax.f32 %v3205_v28, 0.0 }
 0x4dc   :  { %v3224_v61 = vmax.f32 %v3207_v27, 0.0  ;;  %v3210_v54 = vpop.f32.mrb[36].mxu1 }
 0x4dd   :  { %v3231_v29 = vadd.f32 %v3223_v14, %v3094_v12  ;;  %v3211_v37 = vadd.f32 %v3210_v54, %v3114_v45  ;;  %v3212_v49 = vpop.f32.mrb[37].mxu1 }
 0x4de   :  { %v3232_v16 = vadd.f32 %v3224_v61, %v3095_v18  ;;  %v3213_v10 = vadd.f32 %v3212_v49, %v3114_v45 }
 0x4df   :  { %v3588_v57 = vpack.c.bf16 %v3231_v29, %v3229_v6  ;;  %v3225_v3 = vmax.f32 %v3211_v37, 0.0 }
 0x4e0   :  { %v3216_v59 = vpop.f32.mrb[38].mxu1  ;;  %v3586_v26 = vpack.c.bf16 %v3232_v16, %v3230_v36  ;;  %v3226_v35 = vmax.f32 %v3213_v10, 0.0 }
 0x4e1   :  { %v3217_v51 = vadd.f32 %v3216_v59, %v3118_v33  ;;  %v3218_v31 = vpop.f32.mrb[39].mxu1  ;;  %v3233_v19 = vadd.f32 %v3225_v3, %v3096_v22 }
 0x4e2   :  { %v3219_v2 = vadd.f32 %v3218_v31, %v3118_v33  ;;  %3587 = vmatprep.subr.bf16.mxu1 %v3586_v26  ;;  %v3234_v11 = vadd.f32 %v3226_v35, %v3097_v43 }
 0x4e3   :  { %v3227_v13 = vmax.f32 %v3217_v51, 0.0  ;;  %3589 = vmatpush1.bf16.msra.mxu1 %v3588_v57 }
 0x4e4   :  { %v3228_v58 = vmax.f32 %v3219_v2, 0.0 }
 0x4e5   :  { %v3235_v12 = vadd.f32 %v3227_v13, %v3098_v0 }
 0x4e6   :  { %v3236_v55 = vadd.f32 %v3228_v58, %v3099_v42 }
 0x4e7   :  { %v3592_v25 = vpack.c.bf16 %v3235_v12, %v3233_v19 }
 0x4e8   :  { %v3590_v18 = vpack.c.bf16 %v3236_v55, %v3234_v11 }
 0x4ea   :  { %3591 = vmatprep.subr.bf16.mxu1 %v3590_v18 }
 0x4eb   :  { %3593 = vmatpush1.bf16.msra.mxu1 %v3592_v25 }
 0x4ee   :  { %3502 = vmatmul.mubr.msk.f32.vlgmr.msra.gmra.mrb[40].mxu1 %vm6492_vm5, %v3237_v30 }
 0x4ef   :  { %3327 = vmatprep.mubr.f32.mxu1 %v6386_v38 }
 0x4f2   :  { %3503 = vmatmul.mubr.msk.f32.gmra.mrb[42].mxu1 %vm6493_vm11, %v3238_v5 }
 0x5c1   :  { %v3323_v48 = vpop.f32.mrb[40].mxu1 }
 0x5c2   :  { %v3324_v52 = vadd.f32 %v3323_v48, %v3244_v34  ;;  %v3325_v24 = vpop.f32.mrb[41].mxu1 }
 0x5c3   :  { %v3326_v20 = vadd.f32 %v3325_v24, %v3244_v34 }
 0x5c4   :  { %3334 = vst [vmem:[#allocation2] sm:$0xff] %v3324_v52 }
 0x5c5   :  { %3335 = vst [vmem:[#allocation2 + $0x8] sm:$0xff] %v3326_v20  ;;  %v3329_v17 = vpop.f32.mrb[42].mxu1 }
 0x5c6   :  { %v3330_v15 = vadd.f32 %v3329_v17, %v3249_v47  ;;  %v3331_v8 = vpop.f32.mrb[43].mxu1 }
 0x5c7   :  { %v3332_v38 = vadd.f32 %v3331_v8, %v3249_v47 }
 0x5c8   :  { %3336 = vst [vmem:[#allocation2 + $0x10] sm:$0x3] %v3330_v15 }
 0x5c9   :  { %3337 = vst [vmem:[#allocation2 + $0x18] sm:$0x3] %v3332_v38 }
 0x5ca   :  { %3813 = shalt.err (!%p3810_p4)
}
 0x5cb   :  { %s3814_s3 = scalar_lea.hbm %s6258_s17, 512 }
 0x5cc   :  { %p3815_p5 = scmp.ne.s32.totalorder %s6258_s17, %s3814_s3  ;;  %p3818_p6 = scmp.lt.u32.totalorder %s3814_s3, %s6258_s17 }
 0x5ce   :  { %p3820_p7 = pnand %p3818_p6, %p3815_p5 }
 0x5d0   :  { %3823 = shalt.err (!%p3820_p7)
}
 0x5d1   :  { %s3843_s5 = smov 256   ;;  %s3844_s21 = smov 16  }
 0x5d2   :  { %3349 = dma.vmem_to_hbm [thread:$0]  %s3344_s30, 512, %s6258_s17, [#allocation3], %s3843_s5, %s3843_s5, %s3844_s21  }
 0x5d3   :  { %3824 = dma.done.wait [#allocation3], 512  }
 0x5d4   :  { %3825 = vsyncadd [#allocation3], 4294966784 }
 0x5d5   :  { %3353 = vsyncpa [#allocation3], 1 }

</bundles_post_ra>
